<compile_context>
chip_gen: v6e
topology: v6e:2x2x1
jax: 0.10.0
libtpu: 0.0.40
codegen_flags: <defaults>
</compile_context>

<pallas_src>
import functools

import jax
import jax.numpy as jnp
from jax.experimental import pallas as pl
from jax.experimental.pallas import tpu as pltpu


def _round_up(n, m):
    return ((n + m - 1) // m) * m


def _num_parallel_tiles():
    """>=2 grid steps on 2-TC chips (v7x megacore); 1 step on single-TC v5e/v6e."""
    try:
        kind = jax.devices()[0].device_kind.lower()
    except Exception:
        return 1
    return 2 if "v7" in kind else 1


def _choose_tiling(batch, nb_target, max_tile=1024):
    """Batch tile: one grid step per TensorCore for small B, <=max_tile rows for large B."""
    b8 = _round_up(max(batch, 1), 8)
    tile_b = _round_up((b8 + nb_target - 1) // nb_target, 8)
    tile_b = min(tile_b, max_tile)
    b_pad = _round_up(b8, tile_b)
    return tile_b, b_pad


def _concat_lane(w):
    """[E, din, dout] -> [din, E*dout]; column block e == w[e]."""
    E, din, dout = w.shape
    return jnp.transpose(w, (1, 0, 2)).reshape(din, E * dout)


def _block_diag(w):
    """[E, din, dout] -> [E*din, E*dout] block-diagonal."""
    E, din, dout = w.shape
    eye = jnp.eye(E, dtype=w.dtype)
    return jnp.einsum("eij,ef->eifj", w, eye).reshape(E * din, E * dout)


def pack_mmoe_params(params, compute_dtype=jnp.bfloat16):
    """One-time weight re-layout (hoisted out of the per-call forward path).

    Returns a dict of lane-dense / block-diagonal weights:
      w1g : [D, E*H1 + T*E]   layer-1 weights with all task gates fused on the lane axis
      w2  : [E*H1, E*H2]      block-diagonal
      w3  : [E*H2, E*O]       block-diagonal
      biases are [1, *] f32.
    """
    w1, b1, w2, b2, w3, b3, wg, bg = params
    E, D, H1 = w1.shape
    H2 = w2.shape[-1]
    O = w3.shape[-1]
    T = wg.shape[0]
    w1g = jnp.concatenate([_concat_lane(w1), _concat_lane(wg)], axis=1).astype(compute_dtype)
    b1g = jnp.concatenate([b1.reshape(1, E * H1), bg.reshape(1, T * E)],
                          axis=1).astype(jnp.float32)
    return {
        "w1g": w1g,                                               # [D, E*H1 + T*E]
        "b1g": b1g,                                               # [1, E*H1 + T*E]
        "w2": _block_diag(w2).astype(compute_dtype),              # [E*H1, E*H2]
        "b2": b2.reshape(1, E * H2).astype(jnp.float32),
        "w3": _block_diag(w3).astype(compute_dtype),              # [E*H2, E*O]
        "b3": b3.reshape(1, E * O).astype(jnp.float32),
        "dims": {"D": D, "E": E, "H1": H1, "H2": H2, "O": O, "T": T},
    }


def _mmoe_kernel(x_ref, w1g_ref, b1g_ref, w2_ref, b2_ref, w3_ref, b3_ref, out_ref,
                 *, e_h1, num_experts, num_tasks, out_dim):
    """One batch tile of the fused MMoE forward.

    Layer-1 + all task gates run as one lane-dense matmul ([D, E*H1 + T*E]); layers
    2/3 run as single block-diagonal MXU passes. The gate mixture is a running
    accumulate over lane slices of the concatenated [TB, E*O] expert output.
    """
    # x arrives in its native dtype (f32); cast to the matmul compute dtype in-kernel
    # (VPU work hidden under MXU slack, avoids a wrapper-level HBM pass).
    x = x_ref[...].astype(w1g_ref.dtype)                           # [TB, D]

    # ---- layer 1 + gate logits in ONE matmul -------------------------------
    hg = jnp.dot(x, w1g_ref[...], preferred_element_type=jnp.float32)
    hg = hg + b1g_ref[...]                                         # [TB, E*H1 + T*E] f32
    h = jnp.maximum(hg[:, :e_h1], 0.0)                             # [TB, E*H1]
    gl = hg[:, e_h1:]                                              # [TB, T*E] (no ReLU)
    # TODO(synk): Dropout omitted (treated as eval-mode identity).

    # ---- layers 2 / 3: block-diagonal lane-dense MXU passes -----------------
    h = jnp.dot(h.astype(w2_ref.dtype), w2_ref[...],
                preferred_element_type=jnp.float32)
    h = jnp.maximum(h + b2_ref[...], 0.0)                          # [TB, E*H2]
    eo = jnp.dot(h.astype(w3_ref.dtype), w3_ref[...],
                 preferred_element_type=jnp.float32)
    eo = eo + b3_ref[...]                                          # [TB, E*O]

    # ---- per-task softmax gate + weighted expert mixture --------------------
    task_outs = []
    for t in range(num_tasks):                                     # static unroll (small T)
        lg = gl[:, t * num_experts:(t + 1) * num_experts]          # [TB, E]
        lg = lg - jnp.max(lg, axis=-1, keepdims=True)
        ge = jnp.exp(lg)
        gw = ge * pl.reciprocal(jnp.sum(ge, axis=-1, keepdims=True), approx=True)
        acc = gw[:, 0:1] * eo[:, 0:out_dim]
        for e in range(1, num_experts):                            # static unroll (small E)
            acc = acc + gw[:, e:e + 1] * eo[:, e * out_dim:(e + 1) * out_dim]
        task_outs.append(acc)

    # Single full-block store of the [TB, T*O] slab.
    out_ref[...] = jnp.concatenate(task_outs, axis=-1).astype(out_ref.dtype)


def mmoe_forward(x, packed, task_names, *, max_tile_b=1024, parallel_tiles=None):
    """Fused MMoE forward; `packed` comes from pack_mmoe_params (computed once).

    Returns {task_name: [B, O]}.
    """
    dims = packed["dims"]
    D, E, H1, H2, O, T = dims["D"], dims["E"], dims["H1"], dims["H2"], dims["O"], dims["T"]
    assert len(task_names) == T
    B = x.shape[0]
    assert x.shape[1] == D

    # --- grid sizing: 1 tile per TensorCore for small B, <=max_tile_b rows otherwise ---
    nb_target = parallel_tiles if parallel_tiles is not None else _num_parallel_tiles()
    tile_b, B_pad = _choose_tiling(B, nb_target, max_tile_b)
    nb = B_pad // tile_b
    if B_pad != B:                                                  # at most a few rows
        x = jnp.pad(x, ((0, B_pad - B), (0, 0)))

    # --- VMEM guardrail (resident block-diagonal weights; v7x has only 64 MiB) ---------
    weight_bytes = sum(int(packed[k].size) * packed[k].dtype.itemsize
                       for k in ("w1g", "b1g", "w2", "b2", "w3", "b3"))
    act_bytes = tile_b * (E * H1 + T * E + E * H2 + E * O) * 4
    io_bytes = 2 * tile_b * D * 4 + 2 * tile_b * T * O * 4
    vmem_est = 2 * weight_bytes + act_bytes + io_bytes              # assume double-buffered
    if vmem_est > (48 << 20):
        # TODO(synk): beyond this size, stream dense per-expert [H1,H2]/[H2,O] tiles over
        # an "arbitrary" expert grid axis instead of holding the E^2 block-diagonal resident.
        raise ValueError(
            f"Packed MMoE footprint ~{vmem_est >> 20} MiB exceeds the safe resident-VMEM "
            "budget; use an expert-streaming kernel variant.")
    vmem_limit = int(vmem_est + (4 << 20)) if vmem_est > (16 << 20) else None

    kernel = functools.partial(_mmoe_kernel, e_h1=E * H1, num_experts=E,
                               num_tasks=T, out_dim=O)

    def resident(shape):
        # Constant block index -> weights DMA'd once, stay resident in VMEM across steps.
        return pl.BlockSpec(shape, lambda i: (0, 0))

    out = pl.pallas_call(
        kernel,
        out_shape=jax.ShapeDtypeStruct((B_pad, T * O), jnp.float32),
        grid=(nb,),
        in_specs=[
            pl.BlockSpec((tile_b, D), lambda i: (i, 0)),            # x tiled on batch (f32)
            resident(packed["w1g"].shape), resident(packed["b1g"].shape),
            resident(packed["w2"].shape), resident(packed["b2"].shape),
            resident(packed["w3"].shape), resident(packed["b3"].shape),
        ],
        out_specs=pl.BlockSpec((tile_b, T * O), lambda i: (i, 0)),
        compiler_params=pltpu.CompilerParams(
            dimension_semantics=("parallel",),                      # 2-TC sharding on v7x
            vmem_limit_bytes=vmem_limit),
    )(x, packed["w1g"], packed["b1g"], packed["w2"], packed["b2"],
      packed["w3"], packed["b3"])

    return {name: out[:B, t * O:(t + 1) * O] for t, name in enumerate(task_names)}


def init_params(key, input_dim, hidden_dims, output_dim, num_experts, num_tasks):
    """Deterministic synthetic parameters (shapes match the torch module)."""
    h1, h2 = hidden_dims
    ks = jax.random.split(key, 8)
    scale = lambda fan_in: 1.0 / jnp.sqrt(jnp.float32(fan_in))
    w1 = jax.random.uniform(ks[0], (num_experts, input_dim, h1), jnp.float32, -1, 1) * scale(input_dim)
    b1 = jax.random.uniform(ks[1], (num_experts, h1), jnp.float32, -1, 1) * scale(input_dim)
    w2 = jax.random.uniform(ks[2], (num_experts, h1, h2), jnp.float32, -1, 1) * scale(h1)
    b2 = jax.random.uniform(ks[3], (num_experts, h2), jnp.float32, -1, 1) * scale(h1)
    w3 = jax.random.uniform(ks[4], (num_experts, h2, output_dim), jnp.float32, -1, 1) * scale(h2)
    b3 = jax.random.uniform(ks[5], (num_experts, output_dim), jnp.float32, -1, 1) * scale(h2)
    wg = jax.random.uniform(ks[6], (num_tasks, input_dim, num_experts), jnp.float32, -1, 1) * scale(input_dim)
    bg = jax.random.uniform(ks[7], (num_tasks, num_experts), jnp.float32, -1, 1) * scale(input_dim)
    return (w1, b1, w2, b2, w3, b3, wg, bg)


def mmoe_reference(x, params, task_names):
    """Pure-JAX f32 reference matching the torch forward (dropout = identity)."""
    w1, b1, w2, b2, w3, b3, wg, bg = params
    expert_outs = []
    for e in range(w1.shape[0]):
        h = jnp.maximum(x @ w1[e] + b1[e], 0.0)
        h = jnp.maximum(h @ w2[e] + b2[e], 0.0)
        expert_outs.append(h @ w3[e] + b3[e])
    expert_stack = jnp.stack(expert_outs, axis=1)                   # [B, E, O]
    outs = {}
    for t, name in enumerate(task_names):
        gw = jax.nn.softmax(x @ wg[t] + bg[t], axis=1)              # [B, E]
        outs[name] = jnp.einsum("be,beo->bo", gw, expert_stack)
    return outs


if __name__ == "__main__":
    B, D = 256, 32
    hidden_dims = (64, 32)
    O = 16
    E, T = 4, 2
    task_names = ["ctr", "cvr"]

    key = jax.random.PRNGKey(0)
    kx, kp = jax.random.split(key)
    x = jax.random.normal(kx, (B, D), jnp.float32)
    params = init_params(kp, D, hidden_dims, O, E, T)

    # One-time weight re-layout, hoisted out of the forward path.
    packed = pack_mmoe_params(params)

    out = mmoe_forward(x, packed, task_names)
    jax.block_until_ready(out)

    ref = mmoe_reference(x, params, task_names)
    for name in task_names:
        assert out[name].shape == (B, O)
        # bf16 matmul operands (f32 accumulation) + approx-reciprocal softmax denom
        # -> loosened tolerance vs the f32 reference.
        assert jnp.allclose(out[name], ref[name], rtol=3e-2, atol=3e-2), name

    print("KERNEL_OK")
</pallas_src>

<mosaic_0001>
module attributes {stable_mosaic.version = 11 : i64} {
  func.func @_mmoe_kernel(%arg0: i32, %arg1: memref<256x32xf32, #tpu.memory_space<vmem>>, %arg2: memref<32x264xbf16, #tpu.memory_space<vmem>>, %arg3: memref<1x264xf32, #tpu.memory_space<vmem>>, %arg4: memref<256x128xbf16, #tpu.memory_space<vmem>>, %arg5: memref<1x128xf32, #tpu.memory_space<vmem>>, %arg6: memref<128x64xbf16, #tpu.memory_space<vmem>>, %arg7: memref<1x64xf32, #tpu.memory_space<vmem>>, %arg8: memref<256x32xf32, #tpu.memory_space<vmem>>) attributes {dimension_semantics = [#tpu.dimension_semantics<parallel>], iteration_bounds = array<i64: 1>, scalar_prefetch = 0 : i64, scratch_operands = 0 : i64, tpu.core_type = #tpu.core_type<tc>, window_params = [{transform_indices = @transform_0, window_bounds = array<i64: 256, 32>}, {pipeline_mode = #tpu.pipeline_mode<synchronous>, transform_indices = @transform_1, window_bounds = array<i64: 32, 264>}, {pipeline_mode = #tpu.pipeline_mode<synchronous>, transform_indices = @transform_2, window_bounds = array<i64: 1, 264>}, {pipeline_mode = #tpu.pipeline_mode<synchronous>, transform_indices = @transform_3, window_bounds = array<i64: 256, 128>}, {pipeline_mode = #tpu.pipeline_mode<synchronous>, transform_indices = @transform_4, window_bounds = array<i64: 1, 128>}, {pipeline_mode = #tpu.pipeline_mode<synchronous>, transform_indices = @transform_5, window_bounds = array<i64: 128, 64>}, {pipeline_mode = #tpu.pipeline_mode<synchronous>, transform_indices = @transform_6, window_bounds = array<i64: 1, 64>}, {transform_indices = @transform_7, window_bounds = array<i64: 256, 32>}]} {
    %c0 = arith.constant 0 : index
    %c0_0 = arith.constant 0 : index
    %0 = vector.load %arg1[%c0, %c0_0] : memref<256x32xf32, #tpu.memory_space<vmem>>, vector<256x32xf32>
    %1 = arith.truncf %0 : vector<256x32xf32> to vector<256x32xbf16>
    %c0_1 = arith.constant 0 : index
    %c0_2 = arith.constant 0 : index
    %2 = vector.load %arg2[%c0_1, %c0_2] : memref<32x264xbf16, #tpu.memory_space<vmem>>, vector<32x264xbf16>
    %cst = arith.constant dense<0.000000e+00> : vector<256x264xf32>
    %3 = tpu.matmul %1, %2, %cst {dimension_numbers = #tpu.dot_dimension_numbers<[1], [0], [0], [1], [0, 0, 1, 1], [], []>} : vector<256x32xbf16>, vector<32x264xbf16>, vector<256x264xf32> -> vector<256x264xf32>
    %c0_3 = arith.constant 0 : index
    %c0_4 = arith.constant 0 : index
    %4 = vector.load %arg3[%c0_3, %c0_4] : memref<1x264xf32, #tpu.memory_space<vmem>>, vector<1x264xf32>
    %5 = vector.broadcast %4 : vector<1x264xf32> to vector<256x264xf32>
    %6 = arith.addf %3, %5 : vector<256x264xf32>
    %7 = vector.extract_strided_slice %6 {offsets = [0, 0], sizes = [256, 256], strides = [1, 1]} : vector<256x264xf32> to vector<256x256xf32>
    %cst_5 = arith.constant 0.000000e+00 : f32
    %8 = vector.broadcast %cst_5 : f32 to vector<256x256xf32>
    %9 = arith.maximumf %7, %8 : vector<256x256xf32>
    %10 = vector.extract_strided_slice %6 {offsets = [0, 256], sizes = [256, 8], strides = [1, 1]} : vector<256x264xf32> to vector<256x8xf32>
    %11 = arith.truncf %9 : vector<256x256xf32> to vector<256x256xbf16>
    %c0_6 = arith.constant 0 : index
    %c0_7 = arith.constant 0 : index
    %12 = vector.load %arg4[%c0_6, %c0_7] : memref<256x128xbf16, #tpu.memory_space<vmem>>, vector<256x128xbf16>
    %cst_8 = arith.constant dense<0.000000e+00> : vector<256x128xf32>
    %13 = tpu.matmul %11, %12, %cst_8 {dimension_numbers = #tpu.dot_dimension_numbers<[1], [0], [0], [1], [0, 0, 1, 1], [], []>} : vector<256x256xbf16>, vector<256x128xbf16>, vector<256x128xf32> -> vector<256x128xf32>
    %c0_9 = arith.constant 0 : index
    %c0_10 = arith.constant 0 : index
    %14 = vector.load %arg5[%c0_9, %c0_10] : memref<1x128xf32, #tpu.memory_space<vmem>>, vector<1x128xf32>
    %15 = vector.broadcast %14 : vector<1x128xf32> to vector<256x128xf32>
    %16 = arith.addf %13, %15 : vector<256x128xf32>
    %cst_11 = arith.constant 0.000000e+00 : f32
    %17 = vector.broadcast %cst_11 : f32 to vector<256x128xf32>
    %18 = arith.maximumf %16, %17 : vector<256x128xf32>
    %19 = arith.truncf %18 : vector<256x128xf32> to vector<256x128xbf16>
    %c0_12 = arith.constant 0 : index
    %c0_13 = arith.constant 0 : index
    %20 = vector.load %arg6[%c0_12, %c0_13] : memref<128x64xbf16, #tpu.memory_space<vmem>>, vector<128x64xbf16>
    %cst_14 = arith.constant dense<0.000000e+00> : vector<256x64xf32>
    %21 = tpu.matmul %19, %20, %cst_14 {dimension_numbers = #tpu.dot_dimension_numbers<[1], [0], [0], [1], [0, 0, 1, 1], [], []>} : vector<256x128xbf16>, vector<128x64xbf16>, vector<256x64xf32> -> vector<256x64xf32>
    %c0_15 = arith.constant 0 : index
    %c0_16 = arith.constant 0 : index
    %22 = vector.load %arg7[%c0_15, %c0_16] : memref<1x64xf32, #tpu.memory_space<vmem>>, vector<1x64xf32>
    %23 = vector.broadcast %22 : vector<1x64xf32> to vector<256x64xf32>
    %24 = arith.addf %21, %23 : vector<256x64xf32>
    %25 = vector.extract_strided_slice %10 {offsets = [0, 0], sizes = [256, 4], strides = [1, 1]} : vector<256x8xf32> to vector<256x4xf32>
    %cst_17 = arith.constant dense<0xFF800000> : vector<256xf32>
    %26 = vector.multi_reduction <maximumf>, %25, %cst_17 [1] : vector<256x4xf32> to vector<256xf32>
    %27 = vector.shape_cast %26 : vector<256xf32> to vector<256x1xf32>
    %28 = vector.broadcast %27 : vector<256x1xf32> to vector<256x4xf32>
    %29 = arith.subf %25, %28 : vector<256x4xf32>
    %30 = math.exp %29 : vector<256x4xf32>
    %cst_18 = arith.constant dense<0.000000e+00> : vector<256xf32>
    %31 = vector.multi_reduction <add>, %30, %cst_18 [1] : vector<256x4xf32> to vector<256xf32>
    %32 = vector.shape_cast %31 : vector<256xf32> to vector<256x1xf32>
    %33 = tpu.reciprocal %32 {approx = true} : vector<256x1xf32> -> vector<256x1xf32>
    %34 = vector.broadcast %33 : vector<256x1xf32> to vector<256x4xf32>
    %35 = arith.mulf %30, %34 : vector<256x4xf32>
    %36 = vector.extract_strided_slice %35 {offsets = [0, 0], sizes = [256, 1], strides = [1, 1]} : vector<256x4xf32> to vector<256x1xf32>
    %37 = vector.extract_strided_slice %24 {offsets = [0, 0], sizes = [256, 16], strides = [1, 1]} : vector<256x64xf32> to vector<256x16xf32>
    %38 = vector.broadcast %36 : vector<256x1xf32> to vector<256x16xf32>
    %39 = arith.mulf %38, %37 : vector<256x16xf32>
    %40 = vector.extract_strided_slice %35 {offsets = [0, 1], sizes = [256, 1], strides = [1, 1]} : vector<256x4xf32> to vector<256x1xf32>
    %41 = vector.extract_strided_slice %24 {offsets = [0, 16], sizes = [256, 16], strides = [1, 1]} : vector<256x64xf32> to vector<256x16xf32>
    %42 = vector.broadcast %40 : vector<256x1xf32> to vector<256x16xf32>
    %43 = arith.mulf %42, %41 : vector<256x16xf32>
    %44 = arith.addf %39, %43 : vector<256x16xf32>
    %45 = vector.extract_strided_slice %35 {offsets = [0, 2], sizes = [256, 1], strides = [1, 1]} : vector<256x4xf32> to vector<256x1xf32>
    %46 = vector.extract_strided_slice %24 {offsets = [0, 32], sizes = [256, 16], strides = [1, 1]} : vector<256x64xf32> to vector<256x16xf32>
    %47 = vector.broadcast %45 : vector<256x1xf32> to vector<256x16xf32>
    %48 = arith.mulf %47, %46 : vector<256x16xf32>
    %49 = arith.addf %44, %48 : vector<256x16xf32>
    %50 = vector.extract_strided_slice %35 {offsets = [0, 3], sizes = [256, 1], strides = [1, 1]} : vector<256x4xf32> to vector<256x1xf32>
    %51 = vector.extract_strided_slice %24 {offsets = [0, 48], sizes = [256, 16], strides = [1, 1]} : vector<256x64xf32> to vector<256x16xf32>
    %52 = vector.broadcast %50 : vector<256x1xf32> to vector<256x16xf32>
    %53 = arith.mulf %52, %51 : vector<256x16xf32>
    %54 = arith.addf %49, %53 : vector<256x16xf32>
    %55 = vector.extract_strided_slice %10 {offsets = [0, 4], sizes = [256, 4], strides = [1, 1]} : vector<256x8xf32> to vector<256x4xf32>
    %cst_19 = arith.constant dense<0xFF800000> : vector<256xf32>
    %56 = vector.multi_reduction <maximumf>, %55, %cst_19 [1] : vector<256x4xf32> to vector<256xf32>
    %57 = vector.shape_cast %56 : vector<256xf32> to vector<256x1xf32>
    %58 = vector.broadcast %57 : vector<256x1xf32> to vector<256x4xf32>
    %59 = arith.subf %55, %58 : vector<256x4xf32>
    %60 = math.exp %59 : vector<256x4xf32>
    %cst_20 = arith.constant dense<0.000000e+00> : vector<256xf32>
    %61 = vector.multi_reduction <add>, %60, %cst_20 [1] : vector<256x4xf32> to vector<256xf32>
    %62 = vector.shape_cast %61 : vector<256xf32> to vector<256x1xf32>
    %63 = tpu.reciprocal %62 {approx = true} : vector<256x1xf32> -> vector<256x1xf32>
    %64 = vector.broadcast %63 : vector<256x1xf32> to vector<256x4xf32>
    %65 = arith.mulf %60, %64 : vector<256x4xf32>
    %66 = vector.extract_strided_slice %65 {offsets = [0, 0], sizes = [256, 1], strides = [1, 1]} : vector<256x4xf32> to vector<256x1xf32>
    %67 = vector.extract_strided_slice %24 {offsets = [0, 0], sizes = [256, 16], strides = [1, 1]} : vector<256x64xf32> to vector<256x16xf32>
    %68 = vector.broadcast %66 : vector<256x1xf32> to vector<256x16xf32>
    %69 = arith.mulf %68, %67 : vector<256x16xf32>
    %70 = vector.extract_strided_slice %65 {offsets = [0, 1], sizes = [256, 1], strides = [1, 1]} : vector<256x4xf32> to vector<256x1xf32>
    %71 = vector.extract_strided_slice %24 {offsets = [0, 16], sizes = [256, 16], strides = [1, 1]} : vector<256x64xf32> to vector<256x16xf32>
    %72 = vector.broadcast %70 : vector<256x1xf32> to vector<256x16xf32>
    %73 = arith.mulf %72, %71 : vector<256x16xf32>
    %74 = arith.addf %69, %73 : vector<256x16xf32>
    %75 = vector.extract_strided_slice %65 {offsets = [0, 2], sizes = [256, 1], strides = [1, 1]} : vector<256x4xf32> to vector<256x1xf32>
    %76 = vector.extract_strided_slice %24 {offsets = [0, 32], sizes = [256, 16], strides = [1, 1]} : vector<256x64xf32> to vector<256x16xf32>
    %77 = vector.broadcast %75 : vector<256x1xf32> to vector<256x16xf32>
    %78 = arith.mulf %77, %76 : vector<256x16xf32>
    %79 = arith.addf %74, %78 : vector<256x16xf32>
    %80 = vector.extract_strided_slice %65 {offsets = [0, 3], sizes = [256, 1], strides = [1, 1]} : vector<256x4xf32> to vector<256x1xf32>
    %81 = vector.extract_strided_slice %24 {offsets = [0, 48], sizes = [256, 16], strides = [1, 1]} : vector<256x64xf32> to vector<256x16xf32>
    %82 = vector.broadcast %80 : vector<256x1xf32> to vector<256x16xf32>
    %83 = arith.mulf %82, %81 : vector<256x16xf32>
    %84 = arith.addf %79, %83 : vector<256x16xf32>
    %85 = tpu.concatenate %54, %84 in 1 : vector<256x16xf32>, vector<256x16xf32> -> vector<256x32xf32>
    %c0_21 = arith.constant 0 : index
    %c0_22 = arith.constant 0 : index
    %86 = vector.load %arg8[%c0_21, %c0_22] : memref<256x32xf32, #tpu.memory_space<vmem>>, vector<256x32xf32>
    tpu.vector_store %arg8[%c0_21, %c0_22], %85 {strides = array<i32>} : memref<256x32xf32, #tpu.memory_space<vmem>>, vector<256x32xf32>,
    return
  }
  func.func @transform_0(%arg0: i32) -> (i32, i32) {
    %c0_i32 = arith.constant 0 : i32
    %c0_i32_0 = arith.constant 0 : i32
    return %arg0, %c0_i32 : i32, i32
  }
  func.func @transform_1(%arg0: i32) -> (i32, i32) {
    %c0_i32 = arith.constant 0 : i32
    %c0_i32_0 = arith.constant 0 : i32
    %c0_i32_1 = arith.constant 0 : i32
    return %c0_i32, %c0_i32_0 : i32, i32
  }
  func.func @transform_2(%arg0: i32) -> (i32, i32) {
    %c0_i32 = arith.constant 0 : i32
    %c0_i32_0 = arith.constant 0 : i32
    %c0_i32_1 = arith.constant 0 : i32
    return %c0_i32, %c0_i32_0 : i32, i32
  }
  func.func @transform_3(%arg0: i32) -> (i32, i32) {
    %c0_i32 = arith.constant 0 : i32
    %c0_i32_0 = arith.constant 0 : i32
    %c0_i32_1 = arith.constant 0 : i32
    return %c0_i32, %c0_i32_0 : i32, i32
  }
  func.func @transform_4(%arg0: i32) -> (i32, i32) {
    %c0_i32 = arith.constant 0 : i32
    %c0_i32_0 = arith.constant 0 : i32
    %c0_i32_1 = arith.constant 0 : i32
    return %c0_i32, %c0_i32_0 : i32, i32
  }
  func.func @transform_5(%arg0: i32) -> (i32, i32) {
    %c0_i32 = arith.constant 0 : i32
    %c0_i32_0 = arith.constant 0 : i32
    %c0_i32_1 = arith.constant 0 : i32
    return %c0_i32, %c0_i32_0 : i32, i32
  }
  func.func @transform_6(%arg0: i32) -> (i32, i32) {
    %c0_i32 = arith.constant 0 : i32
    %c0_i32_0 = arith.constant 0 : i32
    %c0_i32_1 = arith.constant 0 : i32
    return %c0_i32, %c0_i32_0 : i32, i32
  }
  func.func @transform_7(%arg0: i32) -> (i32, i32) {
    %c0_i32 = arith.constant 0 : i32
    %c0_i32_0 = arith.constant 0 : i32
    return %arg0, %c0_i32 : i32, i32
  }
}

</mosaic_0001>

<bundles_post_ra>
// kernel: tpu_custom_call.1
= control target key start
LH: loop header
LB: loop body
LE: loop exit
PB: predicated region body
PF: predicated region fallthrough
CT: control target
= control target key end

     0   :  { %vm132_vm0 = vcmask 261120   ;;  %v8775_v54 = vmov 0   ;;  %v85_v55 = vlaneseq  ;;  %vm2712_vm1 = vcmask 64544   ;;  %s5287_s8 = smov 96   ;;  %s5292_s9 = smov 16   ;;  %s8767_s1 = inlined_call_operand.vmem [shape: bf16[32,264], index: 1, kind: input, shape index: {}]   ;;  %s8768_s0 = inlined_call_operand.vmem [shape: f32[256,32], index: 0, kind: input, shape index: {}]   ;;  %s8769_s2 = inlined_call_operand.vmem [shape: f32[1,264], index: 2, kind: input, shape index: {}]   ;;  %s8770_s3 = inlined_call_operand.vmem [shape: bf16[256,128], index: 3, kind: input, shape index: {}]   ;;  %s8771_s5 = inlined_call_operand.vmem [shape: bf16[128,64], index: 5, kind: input, shape index: {}]   ;;  %s8772_s4 = inlined_call_operand.vmem [shape: f32[1,128], index: 4, kind: input, shape index: {}]   ;;  %s8773_s6 = inlined_call_operand.vmem [shape: f32[1,64], index: 6, kind: input, shape index: {}]   ;;  %s8774_s7 = inlined_call_operand.vmem [shape: f32[256,32], index: 7, kind: output, shape index: {}]  }
   0x1   :  { %v4991_v0 = vld [vmem:[%s8767_s1 + $0x20] ss:$12 sps:$4 sm:$0xff]   ;;  %v4992_v1 = vld [vmem:[%s8767_s1 + $0x8] ss:$12 sps:$4 sm:$0xff]   ;;  %v30_v6 = vld [vmem:[%s8768_s0 + $0x18] sm:$0xff]  ;;  %213 = vmatprep.mubr.bf16.mxu0 %v8775_v54  ;;  %4861 = vset.pattern.permute.xlu0 %v8775_v54  ;;  %vm1207_vm2 = vcmask 31744  }
   0x2   :  { %4760 = vmatprep.subr.bf16.mxu1 %v4991_v0  ;;  %v27_v2 = vld [vmem:[%s8768_s0] sm:$0xff]  ;;  %v28_v3 = vld [vmem:[%s8768_s0 + $0x8] sm:$0xff]  ;;  %v29_v5 = vld [vmem:[%s8768_s0 + $0x10] sm:$0xff]  ;;  %4857 = vset.pattern.permute.xlu1 %v8775_v54  ;;  %v5523_v56 = vshrl.u32 %v85_v55, 7  ;;  %vm4473_vm3 = vcmask 130048  }
   0x3   :  { %4761 = vmatpush3.bf16.msra.mxu1 %v4991_v0  ;;  %v5345_v4 = vpack.c.bf16 %v28_v3, %v27_v2  ;;  %v31_v7 = vld [vmem:[%s8768_s0 + $0x20] sm:$0xff]  ;;  %v32_v8 = vld [vmem:[%s8768_s0 + $0x28] sm:$0xff]  ;;  %v5361_v9 = vpack.c.bf16 %v30_v6, %v29_v5  ;;  %v33_v11 = vld [vmem:[%s8768_s0 + $0x30] sm:$0xff] }
   0x4   :  { %4762 = vmatprep.subr.bf16.mxu1 %v4992_v1  ;;  %v5363_v10 = vpack.c.bf16 %v32_v8, %v31_v7  ;;  %v34_v12 = vld [vmem:[%s8768_s0 + $0x38] sm:$0xff]  ;;  %v35_v13 = vld [vmem:[%s8768_s0 + $0x40] sm:$0xff]  ;;  %v36_v14 = vld [vmem:[%s8768_s0 + $0x48] sm:$0xff]  ;;  %v95_v57 = vsub.s32 2, %v5523_v56 }
   0x5   :  { %4764 = vmatprep.mubr.msk.bf16.mxu1 %vm132_vm0, %v5345_v4  ;;  %v5381_v15 = vpack.c.bf16 %v34_v12, %v33_v11  ;;  %v5383_v16 = vpack.c.bf16 %v36_v14, %v35_v13  ;;  %v37_v17 = vld [vmem:[%s8768_s0 + $0x50] sm:$0xff]  ;;  %v38_v18 = vld [vmem:[%s8768_s0 + $0x58] sm:$0xff]  ;;  %v39_v19 = vld [vmem:[%s8768_s0 + $0x60] sm:$0xff] }
   0x6   :  { %v40_v20 = vld [vmem:[%s8768_s0 + $0x68] sm:$0xff]  ;;  %v64_v21 = vpack.c.bf16 %v38_v18, %v37_v17  ;;  %v41_v23 = vld [vmem:[%s8768_s0 + $0x70] sm:$0xff]  ;;  %v42_v24 = vld [vmem:[%s8768_s0 + $0x78] sm:$0xff] }
   0x7   :  { %4763 = vmatpush3.bf16.msra.mxu1 %v4992_v1  ;;  %v5401_v22 = vpack.c.bf16 %v40_v20, %v39_v19  ;;  %v43_v25 = vld [vmem:[%s8768_s0 + $0x80] sm:$0xff]  ;;  %v44_v26 = vld [vmem:[%s8768_s0 + $0x88] sm:$0xff]  ;;  %v66_v27 = vpack.c.bf16 %v42_v24, %v41_v23  ;;  %v45_v29 = vld [vmem:[%s8768_s0 + $0x90] sm:$0xff] }
   0x8   :  { %v67_v28 = vpack.c.bf16 %v44_v26, %v43_v25  ;;  %v46_v30 = vld [vmem:[%s8768_s0 + $0x98] sm:$0xff]  ;;  %v47_v31 = vld [vmem:[%s8768_s0 + $0xa0] sm:$0xff]  ;;  %v48_v32 = vld [vmem:[%s8768_s0 + $0xa8] sm:$0xff] }
   0x9   :  { %v68_v33 = vpack.c.bf16 %v46_v30, %v45_v29  ;;  %v69_v34 = vpack.c.bf16 %v48_v32, %v47_v31  ;;  %v49_v35 = vld [vmem:[%s8768_s0 + $0xb0] sm:$0xff]  ;;  %v50_v36 = vld [vmem:[%s8768_s0 + $0xb8] sm:$0xff]  ;;  %v51_v37 = vld [vmem:[%s8768_s0 + $0xc0] sm:$0xff] }
   0xa   :  { %4765 = vmatmul.mubr.msk.bf16.vlgmr.msra.gmra.mxu1 %vm132_vm0, %v5361_v9  ;;  %v52_v38 = vld [vmem:[%s8768_s0 + $0xc8] sm:$0xff]  ;;  %v5446_v39 = vpack.c.bf16 %v50_v36, %v49_v35  ;;  %v53_v41 = vld [vmem:[%s8768_s0 + $0xd0] sm:$0xff]  ;;  %v54_v42 = vld [vmem:[%s8768_s0 + $0xd8] sm:$0xff] }
   0xb   :  { %4768 = vmatprep.mubr.msk.bf16.mxu1 %vm132_vm0, %v5363_v10  ;;  %v5448_v40 = vpack.c.bf16 %v52_v38, %v51_v37  ;;  %v55_v43 = vld [vmem:[%s8768_s0 + $0xe0] sm:$0xff]  ;;  %v56_v44 = vld [vmem:[%s8768_s0 + $0xe8] sm:$0xff]  ;;  %v5466_v45 = vpack.c.bf16 %v54_v42, %v53_v41  ;;  %v57_v47 = vld [vmem:[%s8768_s0 + $0xf0] sm:$0xff] }
   0xc   :  { %v5468_v46 = vpack.c.bf16 %v56_v44, %v55_v43  ;;  %v58_v48 = vld [vmem:[%s8768_s0 + $0xf8] sm:$0xff]  ;;  %v4996_v52 = vld [vmem:[%s8767_s1 + $0x4] ss:$12 sps:$4 sm:$0xff]   ;;  %v4998_v53 = vld [vmem:[%s8767_s1] ss:$12 sps:$4 sm:$0xff]  }
   0xd   :  { %v5480_v49 = vpack.c.bf16 %v58_v48, %v57_v47  ;;  %v4993_v50 = vld [vmem:[%s8767_s1 + $0x1c] ss:$12 sps:$4 sm:$0xff]   ;;  %v4995_v51 = vld [vmem:[%s8767_s1 + $0x18] ss:$12 sps:$4 sm:$0xff]   ;;  %v5531_v58 = vld [vmem:[%s8769_s2] sm:$0x7] }
   0xe   :  { %193 = vmatprep.subr.bf16.mxu0 %v4993_v50  ;;  %v5534_v59 = vrot.slane %v5531_v58, %v95_v57  ;;  %s5286_s2 = smov 80  }
   0xf   :  { %194 = vmatpush1.bf16.msra.mxu0 %v4995_v51 }
  0x10   :  { %195 = vmatprep.subr.bf16.mxu0 %v4996_v52 }
  0x12   :  { %4769 = vmatmul.mubr.msk.bf16.gmra.mxu1 %vm132_vm0, %v5381_v15 }
  0x13   :  { %4772 = vmatprep.mubr.msk.bf16.mxu1 %vm132_vm0, %v5383_v16  ;;  %196 = vmatpush1.bf16.msra.mxu0 %v4998_v53 }
  0x16   :  { %4548 = vmatmul.mubr.msk.bf16.vlgmr.msra.gmra.mxu0 %vm132_vm0, %v5345_v4 }
  0x17   :  { %223 = vmatprep.mubr.bf16.mxu0 %v8775_v54 }
  0x1a   :  { %4773 = vmatmul.mubr.msk.bf16.gmra.mxu1 %vm132_vm0, %v64_v21 }
  0x1b   :  { %4776 = vmatprep.mubr.msk.bf16.mxu1 %vm132_vm0, %v5401_v22 }
  0x1e   :  { %4549 = vmatmul.mubr.msk.bf16.gmra.mxu0 %vm132_vm0, %v5361_v9 }
  0x1f   :  { %233 = vmatprep.mubr.bf16.mxu0 %v8775_v54 }
  0x22   :  { %4777 = vmatmul.mubr.msk.bf16.gmra.mxu1 %vm132_vm0, %v66_v27 }
  0x23   :  { %4780 = vmatprep.mubr.msk.bf16.mxu1 %vm132_vm0, %v67_v28 }
  0x26   :  { %4550 = vmatmul.mubr.msk.bf16.gmra.mxu0 %vm132_vm0, %v5363_v10 }
  0x27   :  { %243 = vmatprep.mubr.bf16.mxu0 %v8775_v54 }
  0x2a   :  { %4781 = vmatmul.mubr.msk.bf16.gmra.mxu1 %vm132_vm0, %v68_v33 }
  0x2b   :  { %4784 = vmatprep.mubr.msk.bf16.mxu1 %vm132_vm0, %v69_v34 }
  0x2e   :  { %4551 = vmatmul.mubr.msk.bf16.gmra.mxu0 %vm132_vm0, %v5381_v15 }
  0x2f   :  { %253 = vmatprep.mubr.bf16.mxu0 %v8775_v54 }
  0x32   :  { %4785 = vmatmul.mubr.msk.bf16.gmra.mxu1 %vm132_vm0, %v5446_v39 }
  0x33   :  { %4788 = vmatprep.mubr.msk.bf16.mxu1 %vm132_vm0, %v5448_v40 }
  0x36   :  { %4552 = vmatmul.mubr.msk.bf16.gmra.mxu0 %vm132_vm0, %v5383_v16 }
  0x37   :  { %263 = vmatprep.mubr.bf16.mxu0 %v8775_v54 }
  0x3a   :  { %4789 = vmatmul.mubr.msk.bf16.gmra.mxu1 %vm132_vm0, %v5466_v45 }
  0x3b   :  { %4792 = vmatprep.mubr.msk.bf16.mxu1 %vm132_vm0, %v5468_v46 }
  0x3e   :  { %4553 = vmatmul.mubr.msk.bf16.gmra.mxu0 %vm132_vm0, %v64_v21 }
  0x3f   :  { %273 = vmatprep.mubr.bf16.mxu0 %v8775_v54 }
  0x42   :  { %4793 = vmatmul.mubr.msk.bf16.gmra.mxu1 %vm132_vm0, %v5480_v49 }
  0x46   :  { %4554 = vmatmul.mubr.msk.bf16.gmra.mxu0 %vm132_vm0, %v5401_v22 }
  0x47   :  { %283 = vmatprep.mubr.bf16.mxu0 %v8775_v54 }
  0x4e   :  { %4555 = vmatmul.mubr.msk.bf16.gmra.mxu0 %vm132_vm0, %v66_v27 }
  0x4f   :  { %293 = vmatprep.mubr.bf16.mxu0 %v8775_v54 }
  0x56   :  { %4556 = vmatmul.mubr.msk.bf16.gmra.mxu0 %vm132_vm0, %v67_v28 }
  0x57   :  { %303 = vmatprep.mubr.bf16.mxu0 %v8775_v54 }
  0x5e   :  { %4557 = vmatmul.mubr.msk.bf16.gmra.mxu0 %vm132_vm0, %v68_v33 }
  0x5f   :  { %313 = vmatprep.mubr.bf16.mxu0 %v8775_v54 }
  0x66   :  { %4558 = vmatmul.mubr.msk.bf16.gmra.mxu0 %vm132_vm0, %v69_v34 }
  0x67   :  { %323 = vmatprep.mubr.bf16.mxu0 %v8775_v54 }
  0x6e   :  { %4559 = vmatmul.mubr.msk.bf16.gmra.mxu0 %vm132_vm0, %v5446_v39 }
  0x6f   :  { %333 = vmatprep.mubr.bf16.mxu0 %v8775_v54 }
  0x76   :  { %4560 = vmatmul.mubr.msk.bf16.gmra.mxu0 %vm132_vm0, %v5448_v40 }
  0x77   :  { %343 = vmatprep.mubr.bf16.mxu0 %v8775_v54 }
  0x7e   :  { %4561 = vmatmul.mubr.msk.bf16.gmra.mxu0 %vm132_vm0, %v5466_v45 }
  0x7f   :  { %353 = vmatprep.mubr.bf16.mxu0 %v8775_v54 }
  0x86   :  { %4562 = vmatmul.mubr.msk.bf16.gmra.mxu0 %vm132_vm0, %v5468_v46 }
  0x87   :  { %363 = vmatprep.mubr.bf16.mxu0 %v8775_v54 }
  0x8e   :  { %4563 = vmatmul.mubr.msk.bf16.gmra.mxu0 %vm132_vm0, %v5480_v49 }
  0xca   :  { %v4766_v60 = vpop.f32.mrf.mxu1 }
  0xcb   :  { %v5539_v61 = vadd.f32 %v4766_v60, %v5534_v59 }
  0xcc   :  { %v408_v62 = vpop.f32.mrf.mxu1 }
  0xcd   :  { %v5542_v63 = vadd.f32 %v408_v62, %v5534_v59  ;;  %v2719_v0 = vsel %vm2712_vm1, %v5539_v61, -inf  ;;  %v1214_v1 = vsel %vm1207_vm2, %v5539_v61, -inf }
  0xce   :  { %2720 = vmax.xlane.f32.xlu0 %v2719_v0  ;;  %1215 = vmax.xlane.f32.xlu1 %v1214_v1  ;;  %v4767_v2 = vpop.f32.mrf.mxu1 }
  0xcf   :  { %v5549_v3 = vadd.f32 %v4767_v2, %v5534_v59  ;;  %v1208_v7 = vsel %vm1207_vm2, %v5542_v63, -inf  ;;  %v2713_v12 = vsel %vm2712_vm1, %v5542_v63, -inf }
  0xd0   :  { %v411_v4 = vpop.f32.mrf.mxu1 }
  0xd1   :  { %v5554_v5 = vadd.f32 %v411_v4, %v5534_v59  ;;  %v1217_v6 = vsel %vm1207_vm2, %v5549_v3, -inf  ;;  %v2722_v16 = vsel %vm2712_vm1, %v5549_v3, -inf }
  0xd2   :  { %1218 = vmax.xlane.f32.xlu1 %v1217_v6  ;;  %1209 = vmax.xlane.f32.xlu0 %v1208_v7  ;;  %v4770_v8 = vpop.f32.mrf.mxu1 }
  0xd3   :  { %v5562_v9 = vadd.f32 %v4770_v8, %v5534_v59  ;;  %v2716_v11 = vsel %vm2712_vm1, %v5554_v5, -inf  ;;  %v1211_v20 = vsel %vm1207_vm2, %v5554_v5, -inf }
  0xd4   :  { %v424_v10 = vpop.f32.mrf.mxu1 }
  0xd5   :  { %v5569_v13 = vadd.f32 %v424_v10, %v5534_v59  ;;  %v2731_v14 = vsel %vm2712_vm1, %v5562_v9, -inf  ;;  %v1226_v23 = vsel %vm1207_vm2, %v5562_v9, -inf }
  0xd6   :  { %2717 = vmax.xlane.f32.xlu1 %v2716_v11  ;;  %2714 = vmax.xlane.f32.xlu0 %v2713_v12  ;;  %v4771_v15 = vpop.f32.mrf.mxu1 }
  0xd7   :  { %v5579_v17 = vadd.f32 %v4771_v15, %v5534_v59  ;;  %v2725_v18 = vsel %vm2712_vm1, %v5569_v13, -inf  ;;  %v1220_v27 = vsel %vm1207_vm2, %v5569_v13, -inf }
  0xd8   :  { %v427_v19 = vpop.f32.mrf.mxu1 }
  0xd9   :  { %v5586_v21 = vadd.f32 %v427_v19, %v5534_v59  ;;  %v1229_v22 = vsel %vm1207_vm2, %v5579_v17, -inf  ;;  %v2734_v31 = vsel %vm2712_vm1, %v5579_v17, -inf }
  0xda   :  { %2732 = vmax.xlane.f32.xlu1 %v2731_v14  ;;  %2723 = vmax.xlane.f32.xlu0 %v2722_v16  ;;  %v4774_v24 = vpop.f32.mrf.mxu1 }
  0xdb   :  { %v5596_v25 = vadd.f32 %v4774_v24, %v5534_v59  ;;  %v1223_v26 = vsel %vm1207_vm2, %v5586_v21, -inf  ;;  %v2728_v35 = vsel %vm2712_vm1, %v5586_v21, -inf }
  0xdc   :  { %v440_v28 = vpop.f32.mrf.mxu1 }
  0xdd   :  { %v5603_v29 = vadd.f32 %v440_v28, %v5534_v59  ;;  %v2743_v30 = vsel %vm2712_vm1, %v5596_v25, -inf  ;;  %v1238_v39 = vsel %vm1207_vm2, %v5596_v25, -inf }
  0xde   :  { %2726 = vmax.xlane.f32.xlu1 %v2725_v18  ;;  %1212 = vmax.xlane.f32.xlu0 %v1211_v20  ;;  %v4775_v32 = vpop.f32.mrf.mxu1 }
  0xdf   :  { %v5613_v33 = vadd.f32 %v4775_v32, %v5534_v59  ;;  %v2737_v34 = vsel %vm2712_vm1, %v5603_v29, -inf  ;;  %v1232_v43 = vsel %vm1207_vm2, %v5603_v29, -inf }
  0xe0   :  { %v443_v36 = vpop.f32.mrf.mxu1 }
  0xe1   :  { %v5620_v37 = vadd.f32 %v443_v36, %v5534_v59  ;;  %v1241_v38 = vsel %vm1207_vm2, %v5613_v33, -inf  ;;  %v2746_v47 = vsel %vm2712_vm1, %v5613_v33, -inf }
  0xe2   :  { %1230 = vmax.xlane.f32.xlu1 %v1229_v22  ;;  %1227 = vmax.xlane.f32.xlu0 %v1226_v23  ;;  %v4778_v40 = vpop.f32.mrf.mxu1 }
  0xe3   :  { %v5629_v41 = vadd.f32 %v4778_v40, %v5534_v59  ;;  %v1235_v42 = vsel %vm1207_vm2, %v5620_v37, -inf  ;;  %v2740_v51 = vsel %vm2712_vm1, %v5620_v37, -inf }
  0xe4   :  { %v456_v44 = vpop.f32.mrf.mxu1 }
  0xe5   :  { %v5636_v45 = vadd.f32 %v456_v44, %v5534_v59  ;;  %v2755_v46 = vsel %vm2712_vm1, %v5629_v41, -inf  ;;  %v1250_v57 = vsel %vm1207_vm2, %v5629_v41, -inf }
  0xe6   :  { %1224 = vmax.xlane.f32.xlu1 %v1223_v26  ;;  %1221 = vmax.xlane.f32.xlu0 %v1220_v27  ;;  %v4779_v48 = vpop.f32.mrf.mxu1 }
  0xe7   :  { %v5643_v49 = vadd.f32 %v4779_v48, %v5534_v59  ;;  %v2749_v50 = vsel %vm2712_vm1, %v5636_v45, -inf  ;;  %v1244_v1 = vsel %vm1207_vm2, %v5636_v45, -inf  ;;  %v4999_v48 = vld [vmem:[%s8770_s3 + $0x78] sm:$0xff]  }
  0xe8   :  { %v459_v52 = vpop.f32.mrf.mxu1  ;;  %4624 = vmatprep.subr.bf16.mxu1 %v4999_v48  ;;  %v5010_v48 = vld [vmem:[%s8770_s3 + $0x10] sm:$0xff]  }
  0xe9   :  { %v5650_v53 = vadd.f32 %v459_v52, %v5534_v59  ;;  %v1253_v55 = vsel %vm1207_vm2, %v5643_v49, -inf  ;;  %v2758_v7 = vsel %vm2712_vm1, %v5643_v49, -inf  ;;  %v5000_v52 = vld [vmem:[%s8770_s3 + $0x38] sm:$0xff]  }
  0xea   :  { %2744 = vmax.xlane.f32.xlu1 %v2743_v30  ;;  %2735 = vmax.xlane.f32.xlu0 %v2734_v31  ;;  %v4782_v60 = vpop.f32.mrf.mxu1 }
  0xeb   :  { %v5657_v62 = vadd.f32 %v4782_v60, %v5534_v59  ;;  %v1247_v0 = vsel %vm1207_vm2, %v5650_v53, -inf  ;;  %v2752_v12 = vsel %vm2712_vm1, %v5650_v53, -inf  ;;  %4625 = vmatpush3.bf16.msra.mxu1 %v5000_v52  ;;  %v5001_v60 = vld [vmem:[%s8770_s3 + $0x70] sm:$0xff]   ;;  %v87_v52 = vsub.s32 0, %v5523_v56 }
  0xec   :  { %v472_v2 = vpop.f32.mrf.mxu1  ;;  %4626 = vmatprep.subr.bf16.mxu1 %v5001_v60 }
  0xed   :  { %8864 = vst [vmem:[#allocation2_spill] sm:$0xff] %v5657_v62  ;;  %v5664_v4 = vadd.f32 %v472_v2, %v5534_v59  ;;  %v2767_v6 = vsel %vm2712_vm1, %v5657_v62, -inf  ;;  %v1262_v18 = vsel %vm1207_vm2, %v5657_v62, -inf  ;;  %v5002_v2 = vld [vmem:[%s8770_s3 + $0x30] sm:$0xff]  }
  0xee   :  { %2738 = vmax.xlane.f32.xlu1 %v2737_v34  ;;  %2729 = vmax.xlane.f32.xlu0 %v2728_v35  ;;  %v4783_v8 = vpop.f32.mrf.mxu1 }
  0xef   :  { %8865 = vst [vmem:[#allocation3_spill] sm:$0xff] %v5664_v4  ;;  %v5671_v10 = vadd.f32 %v4783_v8, %v5534_v59  ;;  %v2761_v11 = vsel %vm2712_vm1, %v5664_v4, -inf  ;;  %v1256_v23 = vsel %vm1207_vm2, %v5664_v4, -inf  ;;  %4627 = vmatpush3.bf16.msra.mxu1 %v5002_v2  ;;  %v5003_v8 = vld [vmem:[%s8770_s3 + $0x68] sm:$0xff]  }
  0xf0   :  { %v475_v14 = vpop.f32.mrf.mxu1  ;;  %4628 = vmatprep.subr.bf16.mxu1 %v5003_v8 }
  0xf1   :  { %8866 = vst [vmem:[#allocation4_spill] sm:$0xff] %v5671_v10  ;;  %v5678_v15 = vadd.f32 %v475_v14, %v5534_v59  ;;  %v1265_v16 = vsel %vm1207_vm2, %v5671_v10, -inf  ;;  %v2770_v28 = vsel %vm2712_vm1, %v5671_v10, -inf  ;;  %v5004_v14 = vld [vmem:[%s8770_s3 + $0x28] sm:$0xff]  }
  0xf2   :  { %1242 = vmax.xlane.f32.xlu1 %v1241_v38  ;;  %1239 = vmax.xlane.f32.xlu0 %v1238_v39  ;;  %v4786_v19 = vpop.f32.mrf.mxu1 }
  0xf3   :  { %8867 = vst [vmem:[#allocation5_spill] sm:$0xff] %v5678_v15  ;;  %v5685_v20 = vadd.f32 %v4786_v19, %v5534_v59  ;;  %v1259_v22 = vsel %vm1207_vm2, %v5678_v15, -inf  ;;  %v2764_v34 = vsel %vm2712_vm1, %v5678_v15, -inf  ;;  %4629 = vmatpush3.bf16.msra.mxu1 %v5004_v14 }
  0xf4   :  { %v488_v24 = vpop.f32.mrf.mxu1 }
  0xf5   :  { %8868 = vst [vmem:[#allocation6_spill] sm:$0xff] %v5685_v20  ;;  %v5692_v26 = vadd.f32 %v488_v24, %v5534_v59  ;;  %v2779_v27 = vsel %vm2712_vm1, %v5685_v20, -inf  ;;  %v1274_v39 = vsel %vm1207_vm2, %v5685_v20, -inf  ;;  %v5006_v24 = vld [vmem:[%s8770_s3 + $0x20] sm:$0xff]  }
  0xf6   :  { %1236 = vmax.xlane.f32.xlu1 %v1235_v42  ;;  %1233 = vmax.xlane.f32.xlu0 %v1232_v43  ;;  %v4787_v30 = vpop.f32.mrf.mxu1 }
  0xf7   :  { %8869 = vst [vmem:[#allocation7_spill] sm:$0xff] %v5692_v26  ;;  %v5699_v31 = vadd.f32 %v4787_v30, %v5534_v59  ;;  %v2773_v32 = vsel %vm2712_vm1, %v5692_v26, -inf  ;;  %v1268_v44 = vsel %vm1207_vm2, %v5692_v26, -inf }
  0xf8   :  { %v491_v35 = vpop.f32.mrf.mxu1 }
  0xf9   :  { %8870 = vst [vmem:[#allocation8_spill] sm:$0xff] %v5699_v31  ;;  %v5706_v36 = vadd.f32 %v491_v35, %v5534_v59  ;;  %v1277_v38 = vsel %vm1207_vm2, %v5699_v31, -inf  ;;  %v5008_v35 = vld [vmem:[%s8770_s3 + $0x18] sm:$0xff]  }
  0xfa   :  { %2756 = vmax.xlane.f32.xlu1 %v2755_v46  ;;  %2747 = vmax.xlane.f32.xlu0 %v2746_v47  ;;  %v4790_v40 = vpop.f32.mrf.mxu1  ;;  %v2782_v47 = vsel %vm2712_vm1, %v5699_v31, -inf }
  0xfb   :  { %8871 = vst [vmem:[#allocation9_spill] sm:$0xff] %v5706_v36  ;;  %v5713_v42 = vadd.f32 %v4790_v40, %v5534_v59  ;;  %v1271_v43 = vsel %vm1207_vm2, %v5706_v36, -inf  ;;  %v5009_v40 = vld [vmem:[%s8770_s3 + $0x50] sm:$0xff]  }
  0xfc   :  { %v504_v46 = vpop.f32.mrf.mxu1 }
  0xfd   :  { %8872 = vst [vmem:[#allocation10_spill] sm:$0xff] %v5713_v42 }
  0xfe   :  { %2750 = vmax.xlane.f32.xlu1 %v2749_v50  ;;  %2741 = vmax.xlane.f32.xlu0 %v2740_v51  ;;  %v5725_v50 = vadd.f32 %v504_v46, %v5534_v59  ;;  %v2791_v51 = vsel %vm2712_vm1, %v5713_v42, -inf }
 0x100   :  { %8873 = vst [vmem:[#allocation11_spill] sm:$0xff] %v5725_v50 }
 0x102   :  { %1254 = vmax.xlane.f32.xlu1 %v1253_v55  ;;  %1251 = vmax.xlane.f32.xlu0 %v1250_v57  ;;  %v4791_v55 = vpop.f32.mrf.mxu1  ;;  %v2776_v57 = vsel %vm2712_vm1, %v5706_v36, -inf }
 0x106   :  { %1248 = vmax.xlane.f32.xlu1 %v1247_v0  ;;  %1245 = vmax.xlane.f32.xlu0 %v1244_v1  ;;  %v5738_v0 = vadd.f32 %v4791_v55, %v5534_v59  ;;  %v2785_v1 = vsel %vm2712_vm1, %v5725_v50, -inf  ;;  %v91_v55 = vsub.s32 1, %v5523_v56 }
 0x108   :  { %8874 = vst [vmem:[#allocation12_spill] sm:$0xff] %v5738_v0  ;;  %v5813_v56 = vrot.slane %v5531_v58, %v91_v55 }
 0x10a   :  { %2768 = vmax.xlane.f32.xlu1 %v2767_v6  ;;  %2759 = vmax.xlane.f32.xlu0 %v2758_v7  ;;  %v507_v6 = vpop.f32.mrf.mxu1  ;;  %v1286_v7 = vsel %vm1207_vm2, %v5713_v42, -inf }
 0x10e   :  { %2762 = vmax.xlane.f32.xlu1 %v2761_v11  ;;  %2753 = vmax.xlane.f32.xlu0 %v2752_v12  ;;  %v5751_v11 = vadd.f32 %v507_v6, %v5534_v59  ;;  %v1289_v12 = vsel %vm1207_vm2, %v5738_v0, -inf }
 0x110   :  { %8875 = vst [vmem:[#allocation13_spill] sm:$0xff] %v5751_v11  ;;  %v2788_v46 = vsel %vm2712_vm1, %v5751_v11, -inf }
 0x112   :  { %1266 = vmax.xlane.f32.xlu1 %v1265_v16  ;;  %1263 = vmax.xlane.f32.xlu0 %v1262_v18  ;;  %v4794_v16 = vpop.f32.mrf.mxu1  ;;  %v5005_v18 = vld [vmem:[%s8770_s3 + $0x60] sm:$0xff]  }
 0x113   :  { %v5762_v19 = vadd.f32 %v4794_v16, %v5534_v59  ;;  %4630 = vmatprep.subr.bf16.mxu1 %v5005_v18 }
 0x114   :  { %4631 = vmatpush3.bf16.msra.mxu1 %v5006_v24  ;;  %v5013_v24 = vld [vmem:[%s8770_s3 + $0x40] sm:$0xff]  }
 0x115   :  { %8876 = vst [vmem:[#allocation14_spill] sm:$0xff] %v5762_v19  ;;  %v1298_v6 = vsel %vm1207_vm2, %v5762_v19, -inf }
 0x116   :  { %1260 = vmax.xlane.f32.xlu1 %v1259_v22  ;;  %1257 = vmax.xlane.f32.xlu0 %v1256_v23  ;;  %v1283_v22 = vsel %vm1207_vm2, %v5751_v11, -inf  ;;  %v1280_v23 = vsel %vm1207_vm2, %v5725_v50, -inf }
 0x11a   :  { %2780 = vmax.xlane.f32.xlu1 %v2779_v27  ;;  %2771 = vmax.xlane.f32.xlu0 %v2770_v28  ;;  %v520_v27 = vpop.f32.mrf.mxu1  ;;  %v5007_v28 = vld [vmem:[%s8770_s3 + $0x58] sm:$0xff]  }
 0x11b   :  { %v5775_v30 = vadd.f32 %v520_v27, %v5534_v59  ;;  %4632 = vmatprep.subr.bf16.mxu1 %v5007_v28 }
 0x11c   :  { %4633 = vmatpush3.bf16.msra.mxu1 %v5008_v35  ;;  %v5014_v35 = vld [vmem:[%s8770_s3] sm:$0xff]  }
 0x11d   :  { %8877 = vst [vmem:[#allocation15_spill] sm:$0xff] %v5775_v30  ;;  %4634 = vmatprep.subr.bf16.mxu1 %v5009_v40 }
 0x11e   :  { %2774 = vmax.xlane.f32.xlu1 %v2773_v32  ;;  %2765 = vmax.xlane.f32.xlu0 %v2764_v34  ;;  %v2803_v32 = vsel %vm2712_vm1, %v5762_v19, -inf  ;;  %v2794_v34 = vsel %vm2712_vm1, %v5738_v0, -inf }
 0x120   :  { %4635 = vmatpush3.bf16.msra.mxu1 %v5010_v48 }
 0x122   :  { %1278 = vmax.xlane.f32.xlu1 %v1277_v38  ;;  %1275 = vmax.xlane.f32.xlu0 %v1274_v39  ;;  %v4795_v38 = vpop.f32.mrf.mxu1  ;;  %v215_v39 = vpop.f32.mrf.mxu0 }
 0x126   :  { %1272 = vmax.xlane.f32.xlu1 %v1271_v43  ;;  %1269 = vmax.xlane.f32.xlu0 %v1268_v44  ;;  %v5788_v43 = vadd.f32 %v4795_v38, %v5534_v59  ;;  %v2797_v44 = vsel %vm2712_vm1, %v5775_v30, -inf }
 0x128   :  { %8878 = vst [vmem:[#allocation16_spill] sm:$0xff] %v5788_v43  ;;  %v1301_v2 = vsel %vm1207_vm2, %v5788_v43, -inf }
 0x12a   :  { %2792 = vmax.xlane.f32.xlu1 %v2791_v51  ;;  %2783 = vmax.xlane.f32.xlu0 %v2782_v47  ;;  %v523_v47 = vpop.f32.mrf.mxu1  ;;  %v217_v51 = vpop.f32.mrf.mxu0 }
 0x12b   :  { %v218_v14 = vadd.f32 %v217_v51, %v5813_v56 }
 0x12c   :  { %v219_v60 = vpop.f32.mrf.mxu0 }
 0x12d   :  { %v536_v28 = vmax.f32 %v218_v14, 0.0 }
 0x12e   :  { %2786 = vmax.xlane.f32.xlu1 %v2785_v1  ;;  %2777 = vmax.xlane.f32.xlu0 %v2776_v57  ;;  %v5800_v57 = vadd.f32 %v523_v47, %v5534_v59  ;;  %v5011_v1 = vld [vmem:[%s8770_s3 + $0x48] sm:$0xff]   ;;  %v221_v8 = vpop.f32.mrf.mxu0  ;;  %v2806_v47 = vsel %vm2712_vm1, %v5788_v43, -inf }
 0x12f   :  { %v5012_v59 = vld [vmem:[%s8770_s3 + $0x8] sm:$0xff]   ;;  %4636 = vmatprep.subr.bf16.mxu1 %v5011_v1  ;;  %v222_v18 = vadd.f32 %v221_v8, %v5813_v56  ;;  %s5281_s3 = smov 124  }
 0x130   :  { %8879 = vst [vmem:[#allocation17_spill] sm:$0xff] %v5800_v57  ;;  %4637 = vmatpush3.bf16.msra.mxu1 %v5012_v59  ;;  %v2800_v1 = vsel %vm2712_vm1, %v5800_v57, -inf }
 0x131   :  { %4638 = vmatprep.subr.bf16.mxu1 %v5013_v24 }
 0x132   :  { %1290 = vmax.xlane.f32.xlu1 %v1289_v12  ;;  %1287 = vmax.xlane.f32.xlu0 %v1286_v7  ;;  %v5810_v7 = vrot.slane %v5531_v58, %v87_v52  ;;  %v1295_v58 = vsel %vm1207_vm2, %v5800_v57, -inf }
 0x134   :  { %v216_v12 = vadd.f32 %v215_v39, %v5810_v7  ;;  %v220_v16 = vadd.f32 %v219_v60, %v5810_v7  ;;  %4639 = vmatpush3.bf16.msra.mxu1 %v5014_v35 }
 0x136   :  { %1284 = vmax.xlane.f32.xlu1 %v1283_v22  ;;  %1281 = vmax.xlane.f32.xlu0 %v1280_v23  ;;  %v1292_v22 = vsel %vm1207_vm2, %v5775_v30, -inf  ;;  %v225_v23 = vpop.f32.mrf.mxu0  ;;  %v535_v27 = vmax.f32 %v216_v12, 0.0 }
 0x138   :  { %v227_v38 = vpop.f32.mrf.mxu0 }
 0x139   :  { %v228_v52 = vadd.f32 %v227_v38, %v5813_v56 }
 0x13a   :  { %2804 = vmax.xlane.f32.xlu1 %v2803_v32  ;;  %2795 = vmax.xlane.f32.xlu0 %v2794_v34  ;;  %v537_v32 = vmax.f32 %v220_v16, 0.0  ;;  %v538_v34 = vmax.f32 %v222_v18, 0.0 }
 0x13c   :  { %v599_v39 = vpack.c.bf16 %v537_v32, %v535_v27  ;;  %v600_v40 = vpack.c.bf16 %v538_v34, %v536_v28 }
 0x13e   :  { %2798 = vmax.xlane.f32.xlu1 %v2797_v44  ;;  %2789 = vmax.xlane.f32.xlu0 %v2788_v46  ;;  %v226_v44 = vadd.f32 %v225_v23, %v5810_v7  ;;  %v229_v46 = vpop.f32.mrf.mxu0 }
 0x13f   :  { %798 = vmatprep.mubr.bf16.mxu1 %v600_v40  ;;  %v230_v55 = vadd.f32 %v229_v46, %v5810_v7 }
 0x140   :  { %v231_v48 = vpop.f32.mrf.mxu0  ;;  %799 = vmatmul.mubr.bf16.vlgmr.msra.gmra.mxu1 %v599_v39  ;;  %v539_v51 = vmax.f32 %v226_v44, 0.0 }
 0x141   :  { %v232_v60 = vadd.f32 %v231_v48, %v5813_v56 }
 0x142   :  { %1302 = vmax.xlane.f32.xlu1 %v1301_v2  ;;  %1299 = vmax.xlane.f32.xlu0 %v1298_v6  ;;  %v540_v2 = vmax.f32 %v228_v52, 0.0  ;;  %v541_v6 = vmax.f32 %v230_v55, 0.0  ;;  %v235_v14 = vpop.f32.mrf.mxu0 }
 0x143   :  { %v542_v59 = vmax.f32 %v232_v60, 0.0  ;;  %v236_v24 = vadd.f32 %v235_v14, %v5810_v7 }
 0x144   :  { %v601_v8 = vpack.c.bf16 %v541_v6, %v539_v51  ;;  %v237_v16 = vpop.f32.mrf.mxu0 }
 0x145   :  { %v602_v12 = vpack.c.bf16 %v542_v59, %v540_v2  ;;  %v238_v27 = vadd.f32 %v237_v16, %v5813_v56  ;;  %v543_v46 = vmax.f32 %v236_v24, 0.0 }
 0x146   :  { %1296 = vmax.xlane.f32.xlu1 %v1295_v58  ;;  %1293 = vmax.xlane.f32.xlu0 %v1292_v22  ;;  %v239_v28 = vpop.f32.mrf.mxu0 }
 0x147   :  { %806 = vmatprep.mubr.bf16.mxu1 %v602_v12  ;;  %v544_v39 = vmax.f32 %v238_v27, 0.0 }
 0x148   :  { %807 = vmatmul.mubr.bf16.gmra.mxu1 %v601_v8  ;;  %v241_v35 = vpop.f32.mrf.mxu0 }
 0x149   :  { %v242_v40 = vadd.f32 %v241_v35, %v5813_v56 }
 0x14a   :  { %2807 = vmax.xlane.f32.xlu0 %v2806_v47  ;;  %v240_v47 = vadd.f32 %v239_v28, %v5810_v7  ;;  %v245_v48 = vpop.f32.mrf.mxu0 }
 0x14b   :  { %v246_v55 = vadd.f32 %v245_v48, %v5810_v7 }
 0x14c   :  { %v545_v52 = vmax.f32 %v240_v47, 0.0  ;;  %v247_v60 = vpop.f32.mrf.mxu0 }
 0x14d   :  { %v248_v6 = vadd.f32 %v247_v60, %v5813_v56 }
 0x14e   :  { %2801 = vmax.xlane.f32.xlu0 %v2800_v1  ;;  %v603_v8 = vpack.c.bf16 %v545_v52, %v543_v46  ;;  %v249_v12 = vpop.f32.mrf.mxu0 }
 0x14f   :  { %v250_v14 = vadd.f32 %v249_v12, %v5810_v7 }
 0x151   :  { %v549_v24 = vmax.f32 %v250_v14, 0.0 }
 0x157   :  { %v2721_v18 = vpop.xlane.xlu0 %2720  ;;  %v1216_v58 = vpop.xlane.xlu1 %1215 }
 0x158   :  { %v2811_v22 = vsub.f32 %v5539_v61, %v2721_v18  ;;  %v1306_v23 = vsub.f32 %v5539_v61, %v1216_v58  ;;  %v546_v61 = vmax.f32 %v242_v40, 0.0  ;;  %v547_v18 = vmax.f32 %v246_v55, 0.0  ;;  %v251_v58 = vpop.f32.mrf.mxu0 }
 0x159   :  { %v252_v27 = vadd.f32 %v251_v58, %v5813_v56 }
 0x15a   :  { %v2845_v32 = vmul.f32 1.442695, %v2811_v22  ;;  %v1340_v34 = vmul.f32 1.442695, %v1306_v23  ;;  %v604_v2 = vpack.c.bf16 %v546_v61, %v544_v39  ;;  %v548_v23 = vmax.f32 %v248_v6, 0.0  ;;  %v255_v47 = vpop.f32.mrf.mxu0 }
 0x15b   :  { %v1210_v38 = vpop.xlane.xlu0 %1209  ;;  %v605_v35 = vpack.c.bf16 %v549_v24, %v547_v18  ;;  %v256_v6 = vadd.f32 %v255_v47, %v5810_v7 }
 0x15c   :  { %5023 = vpow2.f32 %v2845_v32  ;;  %v1304_v44 = vsub.f32 %v5542_v63, %v1210_v38  ;;  %814 = vmatprep.mubr.bf16.mxu1 %v604_v2  ;;  %v5853_v32 = vpop.xlane.xlu1 %1218  ;;  %v257_v55 = vpop.f32.mrf.mxu0 }
 0x15d   :  { %5025 = vpow2.f32 %v1340_v34  ;;  %815 = vmatmul.mubr.bf16.gmra.mxu1 %v603_v8  ;;  %v551_v18 = vmax.f32 %v256_v6, 0.0 }
 0x15e   :  { %v1336_v51 = vmul.f32 1.442695, %v1304_v44  ;;  %v259_v8 = vpop.f32.mrf.mxu0 }
 0x15f   :  { %v2715_v1 = vpop.xlane.xlu0 %2714  ;;  %v260_v14 = vadd.f32 %v259_v8, %v5810_v7 }
 0x160   :  { %v2809_v59 = vsub.f32 %v5542_v63, %v2715_v1  ;;  %5027 = vpow2.f32 %v1336_v51  ;;  %v550_v63 = vmax.f32 %v252_v27, 0.0  ;;  %v2718_v44 = vpop.xlane.xlu1 %2717 }
 0x161   :  { %v2810_v51 = vsub.f32 %v5554_v5, %v2718_v44  ;;  %v553_v58 = vmax.f32 %v260_v14, 0.0 }
 0x162   :  { %v2841_v16 = vmul.f32 1.442695, %v2809_v59  ;;  %v606_v38 = vpack.c.bf16 %v550_v63, %v548_v23  ;;  %v258_v59 = vadd.f32 %v257_v55, %v5813_v56 }
 0x163   :  { %v2724_v22 = vpop.xlane.xlu0 %2723  ;;  %v2843_v1 = vmul.f32 1.442695, %v2810_v51  ;;  %v607_v63 = vpack.c.bf16 %v553_v58, %v551_v18 }
 0x164   :  { %v2812_v28 = vsub.f32 %v5549_v3, %v2724_v22  ;;  %5029 = vpow2.f32 %v2841_v16  ;;  %822 = vmatprep.mubr.bf16.mxu1 %v606_v38  ;;  %v2733_v52 = vpop.xlane.xlu1 %2732  ;;  %v261_v22 = vpop.f32.mrf.mxu0  ;;  %v552_v23 = vmax.f32 %v258_v59, 0.0 }
 0x165   :  { %823 = vmatmul.mubr.bf16.gmra.mxu1 %v605_v35  ;;  %v2815_v2 = vsub.f32 %v5562_v9, %v2733_v52  ;;  %v262_v24 = vadd.f32 %v261_v22, %v5813_v56 }
 0x166   :  { %v2847_v34 = vmul.f32 1.442695, %v2812_v28  ;;  %v265_v27 = vpop.f32.mrf.mxu0 }
 0x167   :  { %v2853_v16 = vmul.f32 1.442695, %v2815_v2  ;;  %v554_v28 = vmax.f32 %v262_v24, 0.0  ;;  %v1307_v2 = vsub.f32 %v5549_v3, %v5853_v32  ;;  %v1213_v6 = vpop.xlane.xlu0 %1212 }
 0x168   :  { %5031 = vpow2.f32 %v2847_v34  ;;  %v266_v34 = vadd.f32 %v265_v27, %v5810_v7  ;;  %v267_v35 = vpop.f32.mrf.mxu0  ;;  %v1305_v58 = vsub.f32 %v5554_v5, %v1213_v6 }
 0x169   :  { %v5855_v39 = vpop.eup %5023  ;;  %5033 = vpow2.f32 %v2843_v1  ;;  %v608_v38 = vpack.c.bf16 %v554_v28, %v552_v23  ;;  %v268_v44 = vadd.f32 %v267_v35, %v5813_v56  ;;  %v1342_v18 = vmul.f32 1.442695, %v1307_v2 }
 0x16a   :  { %8880 = vst [vmem:[#allocation18_spill] sm:$0xff] %v5855_v39  ;;  %v5857_v40 = vpop.eup %5025  ;;  %2941 = vrot.lane.b32.xlu1 %v5855_v39, %s5281_s3  ;;  %5035 = vpow2.f32 %v2853_v16  ;;  %v1338_v23 = vmul.f32 1.442695, %v1305_v58 }
 0x16b   :  { %v1406_v46 = vsel %vm1207_vm2, %v5857_v40, 0.0  ;;  %830 = vmatprep.mubr.bf16.mxu1 %v608_v38  ;;  %v556_v52 = vmax.f32 %v268_v44, 0.0  ;;  %5037 = vpow2.f32 %v1342_v18  ;;  %v1228_v3 = vpop.xlane.xlu0 %1227 }
 0x16c   :  { %1407 = vadd.xlane.f32.xlu0 %v1406_v46  ;;  %v269_v46 = vpop.f32.mrf.mxu0  ;;  %5039 = vpow2.f32 %v1338_v23  ;;  %v1310_v32 = vsub.f32 %v5562_v9, %v1228_v3 }
 0x16d   :  { %v5863_v48 = vpop.eup %5027  ;;  %v270_v47 = vadd.f32 %v269_v46, %v5810_v7  ;;  %831 = vmatmul.mubr.bf16.gmra.mxu1 %v607_v63 }
 0x16e   :  { %v1400_v61 = vsel %vm1207_vm2, %v5863_v48, 0.0  ;;  %v271_v51 = vpop.f32.mrf.mxu0  ;;  %v1348_v27 = vmul.f32 1.442695, %v1310_v32 }
 0x16f   :  { %v557_v55 = vmax.f32 %v270_v47, 0.0  ;;  %v272_v1 = vadd.f32 %v271_v51, %v5813_v56  ;;  %v1222_v24 = vpop.xlane.xlu0 %1221 }
 0x170   :  { %1401 = vadd.xlane.f32.xlu0 %v1400_v61  ;;  %v555_v61 = vmax.f32 %v266_v34, 0.0  ;;  %v275_v28 = vpop.f32.mrf.mxu0  ;;  %5041 = vpow2.f32 %v1348_v27 }
 0x171   :  { %v5868_v60 = vpop.eup %5029  ;;  %v558_v59 = vmax.f32 %v272_v1, 0.0  ;;  %v276_v38 = vadd.f32 %v275_v28, %v5810_v7 }
 0x172   :  { %8881 = vst [vmem:[#allocation19_spill] sm:$0xff] %v5868_v60  ;;  %2937 = vrot.lane.b32.xlu1 %v5868_v60, %s5281_s3  ;;  %v609_v8 = vpack.c.bf16 %v557_v55, %v555_v61  ;;  %v277_v44 = vpop.f32.mrf.mxu0 }
 0x173   :  { %v610_v16 = vpack.c.bf16 %v558_v59, %v556_v52  ;;  %v2736_v63 = vpop.xlane.xlu0 %2735  ;;  %v278_v9 = vadd.f32 %v277_v44, %v5813_v56  ;;  %v559_v55 = vmax.f32 %v276_v38, 0.0 }
 0x174   :  { %v2816_v34 = vsub.f32 %v5579_v17, %v2736_v63  ;;  %v279_v47 = vpop.f32.mrf.mxu0  ;;  %v2727_v63 = vpop.xlane.xlu1 %2726 }
 0x175   :  { %v5875_v12 = vpop.eup %5031  ;;  %838 = vmatprep.mubr.bf16.mxu1 %v610_v16  ;;  %v280_v61 = vadd.f32 %v279_v47, %v5810_v7  ;;  %v560_v2 = vmax.f32 %v278_v9, 0.0  ;;  %v2813_v47 = vsub.f32 %v5569_v13, %v2727_v63 }
 0x176   :  { %8882 = vst [vmem:[#allocation20_spill] sm:$0xff] %v5875_v12  ;;  %2943 = vrot.lane.b32.xlu1 %v5875_v12, %s5281_s3  ;;  %v5887_v14 = vpop.eup %5033  ;;  %839 = vmatmul.mubr.bf16.gmra.mxu1 %v609_v8  ;;  %v2855_v51 = vmul.f32 1.442695, %v2816_v34  ;;  %v281_v1 = vpop.f32.mrf.mxu0 }
 0x177   :  { %8883 = vst [vmem:[#allocation21_spill] sm:$0xff] %v5887_v14  ;;  %v5892_v22 = vpop.eup %5035  ;;  %v561_v6 = vmax.f32 %v280_v61, 0.0  ;;  %v282_v59 = vadd.f32 %v281_v1, %v5813_v56  ;;  %v2849_v1 = vmul.f32 1.442695, %v2813_v47 }
 0x178   :  { %8884 = vst [vmem:[#allocation22_spill] sm:$0xff] %v5892_v22  ;;  %v5897_v5 = vpop.eup %5037  ;;  %v285_v8 = vpop.f32.mrf.mxu0  ;;  %5043 = vpow2.f32 %v2855_v51 }
 0x179   :  { %v1409_v35 = vsel %vm1207_vm2, %v5897_v5, 0.0  ;;  %v5903_v46 = vpop.eup %5039  ;;  %v562_v16 = vmax.f32 %v282_v59, 0.0  ;;  %v611_v18 = vpack.c.bf16 %v561_v6, %v559_v55  ;;  %v286_v3 = vadd.f32 %v285_v8, %v5810_v7  ;;  %v1231_v59 = vpop.xlane.xlu1 %1230 }
 0x17a   :  { %v1403_v52 = vsel %vm1207_vm2, %v5903_v46, 0.0  ;;  %v287_v58 = vpop.f32.mrf.mxu0  ;;  %5045 = vpow2.f32 %v2849_v1  ;;  %v1311_v8 = vsub.f32 %v5579_v17, %v1231_v59 }
 0x17b   :  { %v612_v23 = vpack.c.bf16 %v562_v16, %v560_v2  ;;  %v288_v27 = vadd.f32 %v287_v58, %v5813_v56  ;;  %v563_v38 = vmax.f32 %v286_v3, 0.0  ;;  %v1308_v58 = vsub.f32 %v5569_v13, %v1222_v24  ;;  %v2730_v3 = vpop.xlane.xlu0 %2729 }
 0x17c   :  { %v289_v28 = vpop.f32.mrf.mxu0 }
 0x17d   :  { %v5911_v32 = vpop.eup %5041  ;;  %846 = vmatprep.mubr.bf16.mxu1 %v612_v23  ;;  %v290_v34 = vadd.f32 %v289_v28, %v5810_v7  ;;  %v564_v61 = vmax.f32 %v288_v27, 0.0  ;;  %v1344_v23 = vmul.f32 1.442695, %v1308_v58  ;;  %v2814_v27 = vsub.f32 %v5586_v21, %v2730_v3  ;;  %v1225_v13 = vpop.xlane.xlu1 %1224 }
 0x17e   :  { %847 = vmatmul.mubr.bf16.gmra.mxu1 %v611_v18  ;;  %v291_v9 = vpop.f32.mrf.mxu0  ;;  %v1350_v18 = vmul.f32 1.442695, %v1311_v8 }
 0x17f   :  { %v565_v44 = vmax.f32 %v290_v34, 0.0  ;;  %v292_v51 = vadd.f32 %v291_v9, %v5813_v56 }
 0x180   :  { %5047 = vpow2.f32 %v1350_v18  ;;  %v295_v63 = vpop.f32.mrf.mxu0 }
 0x181   :  { %v613_v55 = vpack.c.bf16 %v565_v44, %v563_v38  ;;  %5049 = vpow2.f32 %v1344_v23  ;;  %v296_v34 = vadd.f32 %v295_v63, %v5810_v7  ;;  %v2745_v8 = vpop.xlane.xlu1 %2744 }
 0x182   :  { %v297_v17 = vpop.f32.mrf.mxu0  ;;  %v2819_v3 = vsub.f32 %v5596_v25, %v2745_v8 }
 0x183   :  { %v298_v44 = vadd.f32 %v297_v17, %v5813_v56  ;;  %v567_v47 = vmax.f32 %v296_v34, 0.0 }
 0x184   :  { %v299_v9 = vpop.f32.mrf.mxu0 }
 0x185   :  { %v5919_v6 = vpop.eup %5043  ;;  %v300_v24 = vadd.f32 %v299_v9, %v5810_v7 }
 0x186   :  { %2939 = vrot.lane.b32.xlu0 %v5887_v14, %s5281_s3  ;;  %8885 = vst [vmem:[#allocation23_spill] sm:$0xff] %v5919_v6 }
 0x187   :  { %v5924_v16 = vpop.eup %5045 }
 0x188   :  { %8886 = vst [vmem:[#allocation24_spill] sm:$0xff] %v5924_v16 }
 0x18a   :  { %2949 = vrot.lane.b32.xlu0 %v5892_v22, %s5281_s3 }
 0x18d   :  { %v5930_v28 = vpop.eup %5047 }
 0x18e   :  { %v1421_v38 = vsel %vm1207_vm2, %v5930_v28, 0.0 }
 0x19a   :  { %1410 = vadd.xlane.f32.xlu1 %v1409_v35  ;;  %v1418_v35 = vsel %vm1207_vm2, %v5911_v32, 0.0 }
 0x19e   :  { %1404 = vadd.xlane.f32.xlu1 %v1403_v52  ;;  %v566_v52 = vmax.f32 %v292_v51, 0.0  ;;  %v568_v51 = vmax.f32 %v298_v44, 0.0 }
 0x1a0   :  { %v614_v2 = vpack.c.bf16 %v566_v52, %v564_v61  ;;  %v301_v61 = vpop.f32.mrf.mxu0  ;;  %v569_v52 = vmax.f32 %v300_v24, 0.0 }
 0x1a2   :  { %854 = vmatprep.mubr.bf16.mxu1 %v614_v2  ;;  %v5938_v2 = vpop.eup %5049  ;;  %v615_v59 = vpack.c.bf16 %v569_v52, %v567_v47  ;;  %v305_v23 = vpop.f32.mrf.mxu0 }
 0x1a3   :  { %855 = vmatmul.mubr.bf16.gmra.mxu1 %v613_v55  ;;  %v302_v55 = vadd.f32 %v301_v61, %v5813_v56  ;;  %v1412_v58 = vsel %vm1207_vm2, %v5938_v2, 0.0 }
 0x1a4   :  { %v307_v63 = vpop.f32.mrf.mxu0 }
 0x1a5   :  { %v570_v1 = vmax.f32 %v302_v55, 0.0  ;;  %v308_v34 = vadd.f32 %v307_v63, %v5813_v56 }
 0x1a6   :  { %v309_v17 = vpop.f32.mrf.mxu0 }
 0x1a7   :  { %v616_v18 = vpack.c.bf16 %v570_v1, %v568_v51  ;;  %v572_v47 = vmax.f32 %v308_v34, 0.0  ;;  %v5015_v34 = vld [vmem:[%s8771_s5 + $0x38] sm:$0xff]  }
 0x1a8   :  { %v311_v9 = vpop.f32.mrf.mxu0  ;;  %4796 = vmatprep.subr.bf16.mxu0 %v5015_v34 }
 0x1a9   :  { %1419 = vadd.xlane.f32.xlu0 %v1418_v35  ;;  %v2851_v35 = vmul.f32 1.442695, %v2814_v27  ;;  %862 = vmatprep.mubr.bf16.mxu1 %v616_v18  ;;  %v306_v27 = vadd.f32 %v305_v23, %v5810_v7  ;;  %v312_v51 = vadd.f32 %v311_v9, %v5813_v56 }
 0x1aa   :  { %v315_v63 = vpop.f32.mrf.mxu0  ;;  %4797 = vmatpush3.bf16.msra.mxu0 %v5015_v34 }
 0x1ab   :  { %5051 = vpow2.f32 %v2851_v35  ;;  %863 = vmatmul.mubr.bf16.gmra.mxu1 %v615_v59  ;;  %v2861_v35 = vmul.f32 1.442695, %v2819_v3  ;;  %v571_v44 = vmax.f32 %v306_v27, 0.0  ;;  %v574_v52 = vmax.f32 %v312_v51, 0.0 }
 0x1ac   :  { %v1309_v59 = vsub.f32 %v5586_v21, %v1225_v13  ;;  %v5016_v21 = vld [vmem:[%s8771_s5 + $0x30] sm:$0xff]   ;;  %v316_v13 = vadd.f32 %v315_v63, %v5810_v7 }
 0x1ad   :  { %5053 = vpow2.f32 %v2861_v35  ;;  %v618_v1 = vpack.c.bf16 %v574_v52, %v572_v47  ;;  %4798 = vmatprep.subr.bf16.mxu0 %v5016_v21 }
 0x1ae   :  { %v1346_v18 = vmul.f32 1.442695, %v1309_v59  ;;  %v575_v9 = vmax.f32 %v316_v13, 0.0  ;;  %4799 = vmatpush3.bf16.msra.mxu0 %v5016_v21 }
 0x1af   :  { %2951 = vrot.lane.b32.xlu1 %v5919_v6, %s5281_s3  ;;  %870 = vmatprep.mubr.bf16.mxu1 %v618_v1  ;;  %v5017_v1 = vld [vmem:[%s8771_s5 + $0x28] sm:$0xff]   ;;  %v2739_v6 = vpop.xlane.xlu1 %2738 }
 0x1b0   :  { %5055 = vpow2.f32 %v1346_v18  ;;  %4800 = vmatprep.subr.bf16.mxu0 %v5017_v1 }
 0x1b2   :  { %4801 = vmatpush3.bf16.msra.mxu0 %v5017_v1 }
 0x1b8   :  { %v5946_v24 = vpop.eup %5051 }
 0x1b9   :  { %8887 = vst [vmem:[#allocation25_spill] sm:$0xff] %v5946_v24 }
 0x1ba   :  { %v5952_v8 = vpop.eup %5053 }
 0x1bb   :  { %8888 = vst [vmem:[#allocation26_spill] sm:$0xff] %v5952_v8 }
 0x1bd   :  { %v5973_v59 = vpop.eup %5055 }
 0x1be   :  { %v1415_v21 = vsel %vm1207_vm2, %v5973_v59, 0.0 }
 0x1bf   :  { %2945 = vrot.lane.b32.xlu0 %v5924_v16, %s5281_s3 }
 0x1d3   :  { %1422 = vadd.xlane.f32.xlu1 %v1421_v38  ;;  %v310_v38 = vadd.f32 %v309_v17, %v5810_v7  ;;  %v317_v17 = vpop.f32.mrf.mxu0 }
 0x1d4   :  { %v318_v35 = vadd.f32 %v317_v17, %v5813_v56 }
 0x1d5   :  { %v573_v61 = vmax.f32 %v310_v38, 0.0  ;;  %v319_v38 = vpop.f32.mrf.mxu0 }
 0x1d6   :  { %v576_v51 = vmax.f32 %v318_v35, 0.0 }
 0x1d7   :  { %v617_v55 = vpack.c.bf16 %v573_v61, %v571_v44  ;;  %v320_v44 = vadd.f32 %v319_v38, %v5810_v7  ;;  %v321_v47 = vpop.f32.mrf.mxu0 }
 0x1d9   :  { %871 = vmatmul.mubr.bf16.gmra.mxu1 %v617_v55  ;;  %v577_v52 = vmax.f32 %v320_v44, 0.0  ;;  %v322_v55 = vadd.f32 %v321_v47, %v5813_v56  ;;  %v325_v18 = vpop.f32.mrf.mxu0  ;;  %v5019_v44 = vld [vmem:[%s8771_s5 + $0x18] sm:$0xff]  }
 0x1da   :  { %v326_v63 = vadd.f32 %v325_v18, %v5810_v7 }
 0x1db   :  { %v327_v34 = vpop.f32.mrf.mxu0 }
 0x1dc   :  { %v328_v35 = vadd.f32 %v327_v34, %v5813_v56 }
 0x1dd   :  { %v329_v38 = vpop.f32.mrf.mxu0 }
 0x1de   :  { %1413 = vadd.xlane.f32.xlu0 %v1412_v58  ;;  %v1240_v58 = vpop.xlane.xlu0 %1239 }
 0x1df   :  { %v1314_v23 = vsub.f32 %v5596_v25, %v1240_v58  ;;  %v5018_v58 = vld [vmem:[%s8771_s5 + $0x20] sm:$0xff]  }
 0x1e0   :  { %4802 = vmatprep.subr.bf16.mxu0 %v5018_v58 }
 0x1e1   :  { %v1356_v27 = vmul.f32 1.442695, %v1314_v23  ;;  %v578_v23 = vmax.f32 %v322_v55, 0.0  ;;  %4803 = vmatpush3.bf16.msra.mxu0 %v5018_v58  ;;  %v5020_v58 = vld [vmem:[%s8771_s5 + $0x10] sm:$0xff]  }
 0x1e2   :  { %v5957_v3 = vpop.xlane.xlu0 %1233  ;;  %4804 = vmatprep.subr.bf16.mxu0 %v5019_v44 }
 0x1e3   :  { %5057 = vpow2.f32 %v1356_v27  ;;  %v619_v27 = vpack.c.bf16 %v577_v52, %v575_v9  ;;  %v620_v17 = vpack.c.bf16 %v578_v23, %v576_v51  ;;  %v330_v9 = vadd.f32 %v329_v38, %v5810_v7  ;;  %v331_v52 = vpop.f32.mrf.mxu0 }
 0x1e4   :  { %2947 = vrot.lane.b32.xlu1 %v5946_v24, %s5281_s3  ;;  %v580_v51 = vmax.f32 %v328_v35, 0.0  ;;  %v332_v18 = vadd.f32 %v331_v52, %v5813_v56 }
 0x1e5   :  { %878 = vmatprep.mubr.bf16.mxu1 %v620_v17  ;;  %v581_v55 = vmax.f32 %v330_v9, 0.0  ;;  %4805 = vmatpush3.bf16.msra.mxu0 %v5019_v44 }
 0x1e6   :  { %v2748_v25 = vpop.xlane.xlu0 %2747  ;;  %879 = vmatmul.mubr.bf16.gmra.mxu1 %v619_v27  ;;  %v582_v23 = vmax.f32 %v332_v18, 0.0  ;;  %v5992_v27 = vld [vmem:[%s8772_s4] ss:$0 sm:$0xff]  ;;  %4806 = vmatprep.subr.bf16.mxu0 %v5020_v58 }
 0x1e7   :  { %v2820_v61 = vsub.f32 %v5613_v33, %v2748_v25 }
 0x1e9   :  { %v2863_v13 = vmul.f32 1.442695, %v2820_v61  ;;  %v579_v61 = vmax.f32 %v326_v63, 0.0  ;;  %4807 = vmatpush3.bf16.msra.mxu0 %v5020_v58 }
 0x1eb   :  { %5059 = vpow2.f32 %v2863_v13  ;;  %v621_v54 = vpack.c.bf16 %v581_v55, %v579_v61 }
 0x1f4   :  { %2957 = vrot.lane.b32.xlu0 %v5952_v8, %s5281_s3  ;;  %v622_v8 = vpack.c.bf16 %v582_v23, %v580_v51  ;;  %v5021_v51 = vld [vmem:[%s8771_s5 + $0x8] sm:$0xff]  }
 0x1f5   :  { %4808 = vmatprep.subr.bf16.mxu0 %v5021_v51 }
 0x1f6   :  { %886 = vmatprep.mubr.bf16.mxu1 %v622_v8  ;;  %4809 = vmatpush3.bf16.msra.mxu0 %v5021_v51 }
 0x1f7   :  { %887 = vmatmul.mubr.bf16.gmra.mxu1 %v621_v54 }
 0x200   :  { %v4640_v25 = vpop.f32.mrf.mxu1 }
 0x202   :  { %v4641_v47 = vpop.f32.mrf.mxu1 }
 0x203   :  { %v4642_v38 = vadd.f32 %v4641_v47, %v4640_v25  ;;  %v2817_v25 = vsub.f32 %v5603_v29, %v2739_v6  ;;  %v5022_v6 = vld [vmem:[%s8771_s5] sm:$0xff]  }
 0x204   :  { %v4643_v1 = vpop.f32.mrf.mxu1  ;;  %4810 = vmatprep.subr.bf16.mxu0 %v5022_v6 }
 0x205   :  { %v801_v44 = vadd.f32 %v4642_v38, %v5992_v27  ;;  %v2857_v8 = vmul.f32 1.442695, %v2817_v25  ;;  %4811 = vmatpush3.bf16.msra.mxu0 %v5022_v6 }
 0x206   :  { %v4644_v34 = vpop.f32.mrf.mxu1 }
 0x207   :  { %v4645_v17 = vadd.f32 %v4644_v34, %v4643_v1  ;;  %v927_v18 = vmax.f32 %v801_v44, 0.0  ;;  %5061 = vpow2.f32 %v2857_v8 }
 0x208   :  { %1416 = vadd.xlane.f32.xlu1 %v1415_v21  ;;  %v5987_v21 = vpop.eup %5057  ;;  %v4646_v63 = vpop.f32.mrf.mxu1 }
 0x209   :  { %v1430_v13 = vsel %vm1207_vm2, %v5987_v21, 0.0  ;;  %v804_v47 = vadd.f32 %v4645_v17, %v5992_v27  ;;  %v6009_v23 = vpop.eup %5059 }
 0x20a   :  { %v4647_v35 = vpop.f32.mrf.mxu1  ;;  %8889 = vst [vmem:[#allocation27_spill] sm:$0xff] %v6009_v23 }
 0x20b   :  { %v4648_v9 = vadd.f32 %v4647_v35, %v4646_v63  ;;  %v928_v1 = vmax.f32 %v804_v47, 0.0  ;;  %v1243_v35 = vpop.xlane.xlu1 %1242 }
 0x20c   :  { %v4649_v61 = vpop.f32.mrf.mxu1  ;;  %v1315_v44 = vsub.f32 %v5613_v33, %v1243_v35 }
 0x20d   :  { %v809_v52 = vadd.f32 %v4648_v9, %v5992_v27  ;;  %v959_v63 = vpack.c.bf16 %v928_v1, %v927_v18 }
 0x20e   :  { %v4650_v55 = vpop.f32.mrf.mxu1 }
 0x20f   :  { %v4651_v54 = vadd.f32 %v4650_v55, %v4649_v61  ;;  %v929_v34 = vmax.f32 %v809_v52, 0.0  ;;  %4812 = vmatprep.mubr.bf16.mxu0 %v959_v63 }
 0x211   :  { %v812_v38 = vadd.f32 %v4651_v54, %v5992_v27  ;;  %v1358_v54 = vmul.f32 1.442695, %v1315_v44 }
 0x213   :  { %1431 = vadd.xlane.f32.xlu0 %v1430_v13  ;;  %v930_v17 = vmax.f32 %v812_v38, 0.0  ;;  %v335_v13 = vpop.f32.mrf.mxu0  ;;  %5063 = vpow2.f32 %v1358_v54 }
 0x214   :  { %v336_v52 = vadd.f32 %v335_v13, %v5810_v7  ;;  %v6016_v51 = vpop.eup %5061 }
 0x215   :  { %v960_v58 = vpack.c.bf16 %v930_v17, %v929_v34  ;;  %v337_v47 = vpop.f32.mrf.mxu0  ;;  %8890 = vst [vmem:[#allocation28_spill] sm:$0xff] %v6016_v51 }
 0x216   :  { %v338_v55 = vadd.f32 %v337_v47, %v5813_v56  ;;  %v583_v33 = vmax.f32 %v336_v52, 0.0 }
 0x217   :  { %4813 = vmatmul.mubr.bf16.vlgmr.msra.gmra.mxu0 %v960_v58  ;;  %v339_v6 = vpop.f32.mrf.mxu0 }
 0x218   :  { %v340_v34 = vadd.f32 %v339_v6, %v5810_v7  ;;  %v584_v63 = vmax.f32 %v338_v55, 0.0 }
 0x219   :  { %2959 = vrot.lane.b32.xlu1 %v6009_v23, %s5281_s3  ;;  %v341_v17 = vpop.f32.mrf.mxu0 }
 0x21a   :  { %v585_v58 = vmax.f32 %v340_v34, 0.0  ;;  %v342_v13 = vadd.f32 %v341_v17, %v5813_v56 }
 0x21b   :  { %v345_v23 = vpop.f32.mrf.mxu0 }
 0x21c   :  { %v586_v22 = vmax.f32 %v342_v13, 0.0  ;;  %v346_v55 = vadd.f32 %v345_v23, %v5810_v7 }
 0x21d   :  { %v4652_v25 = vpop.f32.mrf.mxu1 }
 0x21e   :  { %v624_v6 = vpack.c.bf16 %v586_v22, %v584_v63 }
 0x21f   :  { %v4653_v9 = vpop.f32.mrf.mxu1 }
 0x220   :  { %v4654_v18 = vadd.f32 %v4653_v9, %v4652_v25  ;;  %v1312_v9 = vsub.f32 %v5603_v29, %v5957_v3  ;;  %894 = vmatprep.mubr.bf16.mxu1 %v624_v6  ;;  %v587_v29 = vmax.f32 %v346_v55, 0.0  ;;  %v6038_v6 = vpop.xlane.xlu1 %1236 }
 0x221   :  { %v4655_v61 = vpop.f32.mrf.mxu1 }
 0x222   :  { %v817_v44 = vadd.f32 %v4654_v18, %v5992_v27  ;;  %v1352_v13 = vmul.f32 1.442695, %v1312_v9 }
 0x223   :  { %v4656_v8 = vpop.f32.mrf.mxu1 }
 0x224   :  { %v4657_v1 = vadd.f32 %v4656_v8, %v4655_v61  ;;  %v623_v61 = vpack.c.bf16 %v585_v58, %v583_v33  ;;  %v347_v8 = vpop.f32.mrf.mxu0  ;;  %v931_v18 = vmax.f32 %v817_v44, 0.0  ;;  %5065 = vpow2.f32 %v1352_v13 }
 0x225   :  { %v4658_v38 = vpop.f32.mrf.mxu1  ;;  %v348_v54 = vadd.f32 %v347_v8, %v5813_v56 }
 0x226   :  { %v349_v17 = vpop.f32.mrf.mxu0  ;;  %895 = vmatmul.mubr.bf16.gmra.mxu1 %v623_v61 }
 0x227   :  { %v4659_v35 = vpop.f32.mrf.mxu1  ;;  %v588_v23 = vmax.f32 %v348_v54, 0.0 }
 0x228   :  { %v4660_v47 = vadd.f32 %v4659_v35, %v4658_v38  ;;  %v351_v33 = vpop.f32.mrf.mxu0 }
 0x229   :  { %2953 = vrot.lane.b32.xlu0 %v6016_v51, %s5281_s3  ;;  %v820_v51 = vadd.f32 %v4657_v1, %v5992_v27  ;;  %v4661_v25 = vpop.f32.mrf.mxu1  ;;  %v350_v1 = vadd.f32 %v349_v17, %v5810_v7  ;;  %v352_v22 = vadd.f32 %v351_v33, %v5813_v56 }
 0x22a   :  { %v825_v52 = vadd.f32 %v4660_v47, %v5992_v27  ;;  %v2742_v47 = vpop.xlane.xlu0 %2741 }
 0x22b   :  { %v4662_v34 = vpop.f32.mrf.mxu1  ;;  %v932_v35 = vmax.f32 %v820_v51, 0.0  ;;  %v589_v58 = vmax.f32 %v350_v1, 0.0  ;;  %v2818_v9 = vsub.f32 %v5620_v37, %v2742_v47  ;;  %v355_v47 = vpop.f32.mrf.mxu0 }
 0x22c   :  { %v4663_v38 = vadd.f32 %v4662_v34, %v4661_v25  ;;  %v933_v24 = vmax.f32 %v825_v52, 0.0  ;;  %v590_v25 = vmax.f32 %v352_v22, 0.0  ;;  %v6034_v52 = vpop.eup %5063 }
 0x22d   :  { %v961_v8 = vpack.c.bf16 %v932_v35, %v931_v18  ;;  %v625_v51 = vpack.c.bf16 %v589_v58, %v587_v29  ;;  %v2859_v61 = vmul.f32 1.442695, %v2818_v9  ;;  %v1433_v55 = vsel %vm1207_vm2, %v6034_v52, 0.0  ;;  %v4664_v54 = vpop.f32.mrf.mxu1  ;;  %v2757_v18 = vpop.xlane.xlu1 %2756 }
 0x22e   :  { %v828_v3 = vadd.f32 %v4663_v38, %v5992_v27  ;;  %v626_v34 = vpack.c.bf16 %v590_v25, %v588_v23  ;;  %v357_v9 = vpop.f32.mrf.mxu0 }
 0x22f   :  { %4816 = vmatprep.mubr.bf16.mxu0 %v961_v8  ;;  %5067 = vpow2.f32 %v2859_v61  ;;  %v4665_v38 = vpop.f32.mrf.mxu1 }
 0x230   :  { %v934_v63 = vmax.f32 %v828_v3, 0.0  ;;  %902 = vmatprep.mubr.bf16.mxu1 %v626_v34  ;;  %v4666_v13 = vadd.f32 %v4665_v38, %v4664_v54  ;;  %v2823_v3 = vsub.f32 %v5629_v41, %v2757_v18  ;;  %v356_v54 = vadd.f32 %v355_v47, %v5810_v7 }
 0x231   :  { %903 = vmatmul.mubr.bf16.gmra.mxu1 %v625_v51  ;;  %v4667_v17 = vpop.f32.mrf.mxu1  ;;  %v358_v18 = vadd.f32 %v357_v9, %v5813_v56 }
 0x232   :  { %v962_v44 = vpack.c.bf16 %v934_v63, %v933_v24  ;;  %v6040_v24 = vpop.eup %5065  ;;  %v833_v58 = vadd.f32 %v4666_v13, %v5992_v27  ;;  %v2869_v25 = vmul.f32 1.442695, %v2823_v3  ;;  %v359_v13 = vpop.f32.mrf.mxu0  ;;  %v591_v3 = vmax.f32 %v356_v54, 0.0 }
 0x233   :  { %v4668_v35 = vpop.f32.mrf.mxu1  ;;  %v1424_v1 = vsel %vm1207_vm2, %v6040_v24, 0.0 }
 0x234   :  { %4817 = vmatmul.mubr.bf16.gmra.mxu0 %v962_v44  ;;  %v4669_v29 = vadd.f32 %v4668_v35, %v4667_v17  ;;  %v935_v61 = vmax.f32 %v833_v58, 0.0  ;;  %5069 = vpow2.f32 %v2869_v25  ;;  %v1252_v17 = vpop.xlane.xlu0 %1251 }
 0x236   :  { %v4670_v33 = vpop.f32.mrf.mxu1  ;;  %v836_v22 = vadd.f32 %v4669_v29, %v5992_v27  ;;  %v360_v29 = vadd.f32 %v359_v13, %v5810_v7 }
 0x238   :  { %v4671_v23 = vpop.f32.mrf.mxu1  ;;  %v593_v58 = vmax.f32 %v360_v29, 0.0 }
 0x239   :  { %v4672_v63 = vadd.f32 %v4671_v23, %v4670_v33  ;;  %v361_v23 = vpop.f32.mrf.mxu0 }
 0x23a   :  { %v4673_v8 = vpop.f32.mrf.mxu1 }
 0x23b   :  { %v841_v51 = vadd.f32 %v4672_v63, %v5992_v27  ;;  %v365_v47 = vpop.f32.mrf.mxu0 }
 0x23c   :  { %v6048_v44 = vpop.eup %5067  ;;  %v4674_v34 = vpop.f32.mrf.mxu1  ;;  %v366_v9 = vadd.f32 %v365_v47, %v5810_v7 }
 0x23d   :  { %1434 = vadd.xlane.f32.xlu1 %v1433_v55  ;;  %8891 = vst [vmem:[#allocation29_spill] sm:$0xff] %v6048_v44  ;;  %v936_v55 = vmax.f32 %v836_v22, 0.0  ;;  %v4675_v38 = vadd.f32 %v4674_v34, %v4673_v8  ;;  %v937_v35 = vmax.f32 %v841_v51, 0.0  ;;  %v362_v22 = vadd.f32 %v361_v23, %v5813_v56  ;;  %v6057_v8 = vpop.xlane.xlu0 %1245 }
 0x23e   :  { %v627_v51 = vpack.c.bf16 %v593_v58, %v591_v3 }
 0x23f   :  { %v963_v63 = vpack.c.bf16 %v936_v55, %v935_v61  ;;  %v594_v34 = vmax.f32 %v362_v22, 0.0  ;;  %v1313_v61 = vsub.f32 %v5620_v37, %v6038_v6 }
 0x241   :  { %4820 = vmatprep.mubr.bf16.mxu0 %v963_v63  ;;  %v2760_v3 = vpop.xlane.xlu0 %2759  ;;  %v1354_v58 = vmul.f32 1.442695, %v1313_v61 }
 0x242   :  { %v2824_v61 = vsub.f32 %v5643_v49, %v2760_v3 }
 0x243   :  { %5071 = vpow2.f32 %v1354_v58 }
 0x245   :  { %v6073_v47 = vpop.xlane.xlu0 %2753 }
 0x248   :  { %1425 = vadd.xlane.f32.xlu0 %v1424_v1  ;;  %v844_v1 = vadd.f32 %v4675_v38, %v5992_v27  ;;  %v367_v38 = vpop.f32.mrf.mxu0 }
 0x249   :  { %v368_v54 = vadd.f32 %v367_v38, %v5813_v56 }
 0x24a   :  { %v938_v33 = vmax.f32 %v844_v1, 0.0  ;;  %v369_v1 = vpop.f32.mrf.mxu0 }
 0x24b   :  { %v370_v55 = vadd.f32 %v369_v1, %v5810_v7 }
 0x24c   :  { %v964_v25 = vpack.c.bf16 %v938_v33, %v937_v35  ;;  %v595_v35 = vmax.f32 %v366_v9, 0.0  ;;  %v371_v29 = vpop.f32.mrf.mxu0  ;;  %v596_v33 = vmax.f32 %v368_v54, 0.0  ;;  %v6078_v9 = vpop.xlane.xlu0 %1263 }
 0x24d   :  { %v597_v23 = vmax.f32 %v370_v55, 0.0  ;;  %v372_v63 = vadd.f32 %v371_v29, %v5813_v56 }
 0x24e   :  { %2955 = vrot.lane.b32.xlu1 %v6048_v44, %s5281_s3  ;;  %v592_v44 = vmax.f32 %v358_v18, 0.0  ;;  %4821 = vmatmul.mubr.bf16.gmra.mxu0 %v964_v25  ;;  %v6064_v18 = vpop.xlane.xlu1 %2750  ;;  %v1318_v25 = vsub.f32 %v5629_v41, %v1252_v17 }
 0x24f   :  { %v598_v37 = vmax.f32 %v372_v63, 0.0  ;;  %v629_v6 = vpack.c.bf16 %v597_v23, %v595_v35 }
 0x250   :  { %v628_v13 = vpack.c.bf16 %v594_v34, %v592_v44  ;;  %v6067_v44 = vpop.eup %5069  ;;  %v4676_v34 = vpop.f32.mrf.mxu1 }
 0x251   :  { %8892 = vst [vmem:[#allocation30_spill] sm:$0xff] %v6067_v44  ;;  %v630_v7 = vpack.c.bf16 %v598_v37, %v596_v33  ;;  %v6083_v55 = vpop.xlane.xlu0 %1257  ;;  %v6085_v35 = vpop.eup %5071  ;;  %v2871_v33 = vmul.f32 1.442695, %v2824_v61 }
 0x252   :  { %910 = vmatprep.mubr.bf16.mxu1 %v628_v13  ;;  %v6071_v22 = vpop.xlane.xlu1 %1254  ;;  %v4677_v38 = vpop.f32.mrf.mxu1  ;;  %v1427_v23 = vsel %vm1207_vm2, %v6085_v35, 0.0 }
 0x253   :  { %911 = vmatmul.mubr.bf16.gmra.mxu1 %v627_v51  ;;  %v1364_v51 = vmul.f32 1.442695, %v1318_v25  ;;  %v4678_v29 = vadd.f32 %v4677_v38, %v4676_v34 }
 0x254   :  { %918 = vmatprep.mubr.bf16.mxu1 %v630_v7  ;;  %v4679_v13 = vpop.f32.mrf.mxu1 }
 0x255   :  { %5073 = vpow2.f32 %v1364_v51  ;;  %v849_v37 = vadd.f32 %v4678_v29, %v5992_v27  ;;  %v6093_v7 = vpop.xlane.xlu0 %2771 }
 0x256   :  { %v6076_v56 = vpop.xlane.xlu1 %1248  ;;  %v4680_v1 = vpop.f32.mrf.mxu1  ;;  %8895 = vst [vmem:[#allocation33_spill] sm:$0xff] %v6093_v7  ;;  %5075 = vpow2.f32 %v2871_v33  ;;  %v2821_v33 = vsub.f32 %v5636_v45, %v6064_v18 }
 0x257   :  { %v4681_v41 = vadd.f32 %v4680_v1, %v4679_v13  ;;  %v939_v38 = vmax.f32 %v849_v37, 0.0 }
 0x259   :  { %v6101_v16 = vpop.xlane.xlu0 %2765 }
 0x25a   :  { %v6080_v54 = vpop.xlane.xlu1 %2768  ;;  %8896 = vst [vmem:[#allocation34_spill] sm:$0xff] %v6101_v16 }
 0x25b   :  { %919 = vmatmul.mubr.bf16.gmra.mxu1 %v629_v6  ;;  %8893 = vst [vmem:[#allocation31_spill] sm:$0xff] %v6080_v54  ;;  %v852_v6 = vadd.f32 %v4681_v41, %v5992_v27 }
 0x25d   :  { %v940_v13 = vmax.f32 %v852_v6, 0.0 }
 0x25e   :  { %2965 = vrot.lane.b32.xlu0 %v6067_v44, %s5281_s3  ;;  %v6089_v58 = vpop.xlane.xlu1 %2762 }
 0x25f   :  { %8894 = vst [vmem:[#allocation32_spill] sm:$0xff] %v6089_v58 }
 0x262   :  { %v6096_v61 = vpop.eup %5073  ;;  %v6098_v44 = vpop.xlane.xlu1 %1266 }
 0x263   :  { %v4682_v17 = vpop.f32.mrf.mxu1 }
 0x265   :  { %v4683_v63 = vpop.f32.mrf.mxu1 }
 0x266   :  { %v4684_v3 = vadd.f32 %v4683_v63, %v4682_v17  ;;  %v965_v17 = vpack.c.bf16 %v940_v13, %v939_v38  ;;  %v1442_v63 = vsel %vm1207_vm2, %v6096_v61, 0.0  ;;  %v6107_v6 = vpop.xlane.xlu1 %1260 }
 0x267   :  { %v4685_v25 = vpop.f32.mrf.mxu1 }
 0x268   :  { %v857_v34 = vadd.f32 %v4684_v3, %v5992_v27  ;;  %4824 = vmatprep.mubr.bf16.mxu0 %v965_v17  ;;  %v1276_v3 = vpop.xlane.xlu0 %1275 }
 0x269   :  { %v4686_v51 = vpop.f32.mrf.mxu1 }
 0x26a   :  { %v4687_v1 = vadd.f32 %v4686_v51, %v4685_v25  ;;  %v2865_v25 = vmul.f32 1.442695, %v2821_v33  ;;  %v6113_v51 = vpop.xlane.xlu1 %2780 }
 0x26b   :  { %8898 = vst [vmem:[#allocation36_spill] sm:$0xff] %v6113_v51 }
 0x26c   :  { %v860_v29 = vadd.f32 %v4687_v1, %v5992_v27  ;;  %5077 = vpow2.f32 %v2865_v25  ;;  %v1270_v38 = vpop.xlane.xlu0 %1269  ;;  %v1319_v1 = vsub.f32 %v5643_v49, %v6071_v22  ;;  %v1322_v49 = vsub.f32 %v5657_v62, %v6078_v9 }
 0x26e   :  { %v942_v41 = vmax.f32 %v860_v29, 0.0  ;;  %v6115_v13 = vpop.xlane.xlu1 %2774  ;;  %v1366_v17 = vmul.f32 1.442695, %v1319_v1  ;;  %v1372_v14 = vmul.f32 1.442695, %v1322_v49  ;;  %v1320_v1 = vsub.f32 %v5664_v4, %v6083_v55 }
 0x26f   :  { %8899 = vst [vmem:[#allocation37_spill] sm:$0xff] %v6115_v13 }
 0x270   :  { %v6117_v18 = vpop.xlane.xlu0 %2783  ;;  %5079 = vpow2.f32 %v1366_v17  ;;  %v2822_v17 = vsub.f32 %v5650_v53, %v6073_v47  ;;  %v1368_v9 = vmul.f32 1.442695, %v1320_v1  ;;  %v1324_v47 = vsub.f32 %v5692_v26, %v1270_v38 }
 0x271   :  { %8900 = vst [vmem:[#allocation38_spill] sm:$0xff] %v6117_v18 }
 0x272   :  { %1428 = vadd.xlane.f32.xlu1 %v1427_v23  ;;  %v941_v23 = vmax.f32 %v857_v34, 0.0  ;;  %v6109_v34 = vpop.eup %5075 }
 0x273   :  { %8897 = vst [vmem:[#allocation35_spill] sm:$0xff] %v6109_v34 }
 0x274   :  { %v966_v37 = vpack.c.bf16 %v942_v41, %v941_v23  ;;  %v6121_v23 = vpop.xlane.xlu1 %1278  ;;  %v6125_v41 = vpop.xlane.xlu0 %2777 }
 0x275   :  { %8902 = vst [vmem:[#allocation40_spill] sm:$0xff] %v6125_v41 }
 0x276   :  { %4825 = vmatmul.mubr.bf16.gmra.mxu0 %v966_v37  ;;  %v1316_v37 = vsub.f32 %v5636_v45, %v6057_v8 }
 0x278   :  { %v1288_v33 = vpop.xlane.xlu0 %1287  ;;  %v1360_v25 = vmul.f32 1.442695, %v1316_v37  ;;  %v1326_v37 = vsub.f32 %v5685_v20, %v1276_v3  ;;  %v1376_v3 = vmul.f32 1.442695, %v1324_v47 }
 0x279   :  { %v6123_v29 = vpop.eup %5077 }
 0x27a   :  { %8901 = vst [vmem:[#allocation39_spill] sm:$0xff] %v6123_v29  ;;  %5081 = vpow2.f32 %v1360_v25  ;;  %v2867_v25 = vmul.f32 1.442695, %v2822_v17  ;;  %v1380_v60 = vmul.f32 1.442695, %v1326_v37  ;;  %v1330_v17 = vsub.f32 %v5713_v42, %v1288_v33 }
 0x27b   :  { %5083 = vpow2.f32 %v1372_v14 }
 0x27c   :  { %5085 = vpow2.f32 %v1368_v9 }
 0x27d   :  { %1443 = vadd.xlane.f32.xlu0 %v1442_v63  ;;  %v6129_v63 = vpop.xlane.xlu1 %1272  ;;  %v6143_v39 = vpop.eup %5079  ;;  %5087 = vpow2.f32 %v2867_v25 }
 0x27e   :  { %v1445_v49 = vsel %vm1207_vm2, %v6143_v39, 0.0  ;;  %5089 = vpow2.f32 %v1380_v60 }
 0x27f   :  { %5091 = vpow2.f32 %v1376_v3 }
 0x281   :  { %v6135_v22 = vpop.xlane.xlu1 %2792 }
 0x282   :  { %8903 = vst [vmem:[#allocation41_spill] sm:$0xff] %v6135_v22 }
 0x283   :  { %2967 = vrot.lane.b32.xlu1 %v6109_v34, %s5281_s3  ;;  %v1282_v34 = vpop.xlane.xlu0 %1281 }
 0x284   :  { %v1328_v60 = vsub.f32 %v5725_v50, %v1282_v34 }
 0x285   :  { %v6141_v12 = vpop.xlane.xlu1 %2786 }
 0x286   :  { %8904 = vst [vmem:[#allocation42_spill] sm:$0xff] %v6141_v12 }
 0x287   :  { %v6145_v45 = vpop.xlane.xlu0 %2795  ;;  %v6156_v22 = vpop.eup %5081 }
 0x288   :  { %8905 = vst [vmem:[#allocation43_spill] sm:$0xff] %v6145_v45  ;;  %v1436_v33 = vsel %vm1207_vm2, %v6156_v22, 0.0  ;;  %v6166_v25 = vpop.eup %5083 }
 0x289   :  { %v6151_v41 = vpop.xlane.xlu1 %1290  ;;  %v1454_v34 = vsel %vm1207_vm2, %v6166_v25, 0.0 }
 0x28b   :  { %v6153_v7 = vpop.xlane.xlu0 %2789 }
 0x28c   :  { %8906 = vst [vmem:[#allocation44_spill] sm:$0xff] %v6153_v7 }
 0x28d   :  { %v6160_v12 = vpop.xlane.xlu1 %1284 }
 0x28f   :  { %v1300_v7 = vpop.xlane.xlu0 %1299 }
 0x290   :  { %v1334_v3 = vsub.f32 %v5762_v19, %v1300_v7 }
 0x293   :  { %2961 = vrot.lane.b32.xlu0 %v6123_v29, %s5281_s3  ;;  %v4688_v29 = vpop.f32.mrf.mxu1  ;;  %v1294_v42 = vpop.xlane.xlu0 %1293 }
 0x295   :  { %v4689_v8 = vpop.f32.mrf.mxu1 }
 0x296   :  { %v4690_v45 = vadd.f32 %v4689_v8, %v4688_v29  ;;  %v1388_v29 = vmul.f32 1.442695, %v1330_v17  ;;  %v6172_v17 = vpop.eup %5085 }
 0x297   :  { %v4691_v55 = vpop.f32.mrf.mxu1  ;;  %v1448_v7 = vsel %vm1207_vm2, %v6172_v17, 0.0 }
 0x298   :  { %v865_v9 = vadd.f32 %v4690_v45, %v5992_v27  ;;  %5093 = vpow2.f32 %v1388_v29  ;;  %v1332_v29 = vsub.f32 %v5775_v30, %v1294_v42 }
 0x299   :  { %v4692_v18 = vpop.f32.mrf.mxu1 }
 0x29a   :  { %v4693_v14 = vadd.f32 %v4692_v18, %v4691_v55  ;;  %v943_v45 = vmax.f32 %v865_v9, 0.0 }
 0x29b   :  { %v4694_v1 = vpop.f32.mrf.mxu1 }
 0x29c   :  { %v868_v38 = vadd.f32 %v4693_v14, %v5992_v27 }
 0x29d   :  { %v4695_v16 = vpop.f32.mrf.mxu1 }
 0x29e   :  { %v4696_v37 = vadd.f32 %v4695_v16, %v4694_v1  ;;  %v944_v55 = vmax.f32 %v868_v38, 0.0  ;;  %v1384_v1 = vmul.f32 1.442695, %v1328_v60  ;;  %v6176_v38 = vpop.eup %5087 }
 0x29f   :  { %8908 = vst [vmem:[#allocation46_spill] sm:$0xff] %v6176_v38  ;;  %v6183_v60 = vpop.eup %5089 }
 0x2a0   :  { %v873_v18 = vadd.f32 %v4696_v37, %v5992_v27  ;;  %v6174_v37 = vpop.xlane.xlu1 %2804  ;;  %v967_v9 = vpack.c.bf16 %v944_v55, %v943_v45  ;;  %5095 = vpow2.f32 %v1384_v1  ;;  %v1392_v45 = vmul.f32 1.442695, %v1332_v29 }
 0x2a1   :  { %8907 = vst [vmem:[#allocation45_spill] sm:$0xff] %v6174_v37  ;;  %v1466_v55 = vsel %vm1207_vm2, %v6183_v60, 0.0  ;;  %v1317_v1 = vsub.f32 %v5650_v53, %v6076_v56 }
 0x2a2   :  { %v945_v47 = vmax.f32 %v873_v18, 0.0  ;;  %4828 = vmatprep.mubr.bf16.mxu0 %v967_v9  ;;  %v1396_v18 = vmul.f32 1.442695, %v1334_v3  ;;  %v6199_v3 = vpop.xlane.xlu0 %2807 }
 0x2a3   :  { %8910 = vst [vmem:[#allocation48_spill] sm:$0xff] %v6199_v3  ;;  %v1362_v9 = vmul.f32 1.442695, %v1317_v1 }
 0x2a4   :  { %5097 = vpow2.f32 %v1396_v18 }
 0x2a5   :  { %5099 = vpow2.f32 %v1392_v45 }
 0x2a6   :  { %v6209_v29 = vpop.xlane.xlu0 %2801  ;;  %5101 = vpow2.f32 %v1362_v9  ;;  %v1327_v9 = vsub.f32 %v5699_v31, %v6121_v23 }
 0x2a7   :  { %1446 = vadd.xlane.f32.xlu1 %v1445_v49  ;;  %v4697_v49 = vpop.f32.mrf.mxu1  ;;  %8911 = vst [vmem:[#allocation49_spill] sm:$0xff] %v6209_v29 }
 0x2a8   :  { %v1382_v37 = vmul.f32 1.442695, %v1327_v9 }
 0x2a9   :  { %v4698_v8 = vpop.f32.mrf.mxu1 }
 0x2aa   :  { %v4699_v16 = vadd.f32 %v4698_v8, %v4697_v49  ;;  %v6185_v8 = vpop.xlane.xlu1 %2798  ;;  %v6219_v1 = vpop.xlane.xlu0 %1407 }
 0x2ab   :  { %8909 = vst [vmem:[#allocation47_spill] sm:$0xff] %v6185_v8  ;;  %v4700_v56 = vpop.f32.mrf.mxu1 }
 0x2ac   :  { %v876_v14 = vadd.f32 %v4699_v16, %v5992_v27  ;;  %v6189_v16 = vpop.eup %5091 }
 0x2ad   :  { %v1460_v42 = vsel %vm1207_vm2, %v6189_v16, 0.0 }
 0x2b2   :  { %1437 = vadd.xlane.f32.xlu0 %v1436_v33  ;;  %v946_v33 = vmax.f32 %v876_v14, 0.0  ;;  %v6195_v14 = vpop.xlane.xlu1 %1302 }
 0x2b4   :  { %v968_v49 = vpack.c.bf16 %v946_v33, %v945_v47  ;;  %v6193_v47 = vpop.eup %5093 }
 0x2b5   :  { %v6203_v33 = vpop.eup %5095 }
 0x2b6   :  { %1455 = vadd.xlane.f32.xlu0 %v1454_v34  ;;  %4829 = vmatmul.mubr.bf16.gmra.mxu0 %v968_v49  ;;  %v1478_v34 = vsel %vm1207_vm2, %v6193_v47, 0.0  ;;  %v1323_v49 = vsub.f32 %v5671_v10, %v6098_v44  ;;  %v6207_v18 = vpop.xlane.xlu1 %1296  ;;  %v6213_v53 = vpop.eup %5097 }
 0x2b7   :  { %v1490_v44 = vsel %vm1207_vm2, %v6213_v53, 0.0 }
 0x2b8   :  { %2963 = vrot.lane.b32.xlu1 %v6176_v38, %s5281_s3  ;;  %v1374_v45 = vmul.f32 1.442695, %v1323_v49  ;;  %v6223_v38 = vpop.eup %5099 }
 0x2ba   :  { %1449 = vadd.xlane.f32.xlu0 %v1448_v7  ;;  %v1472_v7 = vsel %vm1207_vm2, %v6203_v33, 0.0  ;;  %5103 = vpow2.f32 %v1374_v45  ;;  %v1325_v45 = vsub.f32 %v5706_v36, %v6129_v63 }
 0x2be   :  { %1467 = vadd.xlane.f32.xlu0 %v1466_v55  ;;  %v1321_v55 = vsub.f32 %v5678_v15, %v6107_v6  ;;  %v1484_v6 = vsel %vm1207_vm2, %v6223_v38, 0.0  ;;  %v1402_v15 = vpop.xlane.xlu0 %1401 }
 0x2c2   :  { %1461 = vadd.xlane.f32.xlu0 %v1460_v42  ;;  %v6217_v42 = vpop.permute.xlu1 %2941 }
 0x2c3   :  { %8912 = vst [vmem:[#allocation50_spill] sm:$0xff] %v6217_v42 }
 0x2c6   :  { %1479 = vadd.xlane.f32.xlu0 %v1478_v34  ;;  %v4701_v34 = vpop.f32.mrf.mxu1  ;;  %v6227_v49 = vpop.permute.xlu1 %2937 }
 0x2c7   :  { %8913 = vst [vmem:[#allocation51_spill] sm:$0xff] %v6227_v49  ;;  %v4702_v42 = vadd.f32 %v4701_v34, %v4700_v56 }
 0x2c8   :  { %v4703_v3 = vpop.f32.mrf.mxu1 }
 0x2c9   :  { %v881_v23 = vadd.f32 %v4702_v42, %v5992_v27 }
 0x2ca   :  { %1473 = vadd.xlane.f32.xlu0 %v1472_v7  ;;  %v1370_v7 = vmul.f32 1.442695, %v1321_v55  ;;  %v4704_v29 = vpop.f32.mrf.mxu1  ;;  %v6235_v49 = vpop.permute.xlu1 %2943 }
 0x2cb   :  { %v4705_v10 = vadd.f32 %v4704_v29, %v4703_v3  ;;  %8914 = vst [vmem:[#allocation52_spill] sm:$0xff] %v6235_v49  ;;  %v1378_v3 = vmul.f32 1.442695, %v1325_v45  ;;  %v1331_v29 = vsub.f32 %v5738_v0, %v6151_v41  ;;  %v947_v34 = vmax.f32 %v881_v23, 0.0 }
 0x2cc   :  { %v4706_v19 = vpop.f32.mrf.mxu1  ;;  %5105 = vpow2.f32 %v1370_v7 }
 0x2cd   :  { %5107 = vrcp.f32 %v1402_v15  ;;  %v1390_v9 = vmul.f32 1.442695, %v1331_v29  ;;  %v6255_v29 = vpop.permute.xlu0 %2939 }
 0x2ce   :  { %1491 = vadd.xlane.f32.xlu0 %v1490_v44  ;;  %v4707_v55 = vpop.f32.mrf.mxu1  ;;  %v884_v44 = vadd.f32 %v4705_v10, %v5992_v27  ;;  %5109 = vpow2.f32 %v1382_v37  ;;  %v1329_v10 = vsub.f32 %v5751_v11, %v6160_v12  ;;  %8915 = vst [vmem:[#allocation53_spill] sm:$0xff] %v6255_v29 }
 0x2cf   :  { %v4708_v31 = vadd.f32 %v4707_v55, %v4706_v19  ;;  %v1411_v19 = vpop.xlane.xlu1 %1410  ;;  %5111 = vpow2.f32 %v1378_v3 }
 0x2d0   :  { %v4709_v30 = vpop.f32.mrf.mxu1  ;;  %v948_v15 = vmax.f32 %v884_v44, 0.0  ;;  %v1386_v23 = vmul.f32 1.442695, %v1329_v10  ;;  %5113 = vrcp.f32 %v1411_v19 }
 0x2d1   :  { %v889_v56 = vadd.f32 %v4708_v31, %v5992_v27  ;;  %5115 = vpow2.f32 %v1390_v9  ;;  %v6266_v19 = vpop.permute.xlu0 %2949 }
 0x2d2   :  { %1485 = vadd.xlane.f32.xlu0 %v1484_v6  ;;  %v6237_v6 = vpop.eup %5101  ;;  %v4710_v63 = vpop.f32.mrf.mxu1  ;;  %v969_v41 = vpack.c.bf16 %v948_v15, %v947_v34  ;;  %5117 = vpow2.f32 %v1386_v23  ;;  %v1333_v15 = vsub.f32 %v5800_v57, %v6207_v18  ;;  %8916 = vst [vmem:[#allocation54_spill] sm:$0xff] %v6266_v19 }
 0x2d3   :  { %v4711_v7 = vadd.f32 %v4710_v63, %v4709_v30  ;;  %v1439_v42 = vsel %vm1207_vm2, %v6237_v6, 0.0  ;;  %v949_v37 = vmax.f32 %v889_v56, 0.0  ;;  %v6247_v55 = vpop.eup %5103  ;;  %v1335_v30 = vsub.f32 %v5788_v43, %v6195_v14  ;;  %v1405_v56 = vpop.xlane.xlu1 %1404 }
 0x2d4   :  { %v1457_v12 = vsel %vm1207_vm2, %v6247_v55, 0.0  ;;  %4832 = vmatprep.mubr.bf16.mxu0 %v969_v41  ;;  %5119 = vrcp.f32 %v1405_v56 }
 0x2d5   :  { %v892_v45 = vadd.f32 %v4711_v7, %v5992_v27  ;;  %v1398_v34 = vmul.f32 1.442695, %v1335_v30 }
 0x2d7   :  { %v950_v31 = vmax.f32 %v892_v45, 0.0  ;;  %5121 = vpow2.f32 %v1398_v34  ;;  %v6289_v34 = vpop.permute.xlu1 %2951  ;;  %v4814_v58 = vpop.f32.mrf.mxu0 }
 0x2d8   :  { %8918 = vst [vmem:[#allocation56_spill] sm:$0xff] %v6289_v34 }
 0x2d9   :  { %v970_v44 = vpack.c.bf16 %v950_v31, %v949_v37  ;;  %v6253_v3 = vpop.eup %5105  ;;  %v1420_v37 = vpop.xlane.xlu0 %1419  ;;  %v8799_v31 = vmov 2  }
 0x2da   :  { %v5108_v63 = vpop.eup %5107  ;;  %v1451_v14 = vsel %vm1207_vm2, %v6253_v3, 0.0 }
 0x2db   :  { %4833 = vmatmul.mubr.bf16.gmra.mxu0 %v970_v44  ;;  %v6261_v7 = vpop.eup %5109  ;;  %v6264_v10 = vmul.f32 %v5108_v63, %v5863_v48 }
 0x2dc   :  { %1440 = vadd.xlane.f32.xlu1 %v1439_v42  ;;  %v1394_v42 = vmul.f32 1.442695, %v1333_v15  ;;  %v1469_v9 = vsel %vm1207_vm2, %v6261_v7, 0.0  ;;  %v6271_v18 = vpop.eup %5111 }
 0x2dd   :  { %v5114_v45 = vpop.eup %5113  ;;  %v1463_v48 = vsel %vm1207_vm2, %v6271_v18, 0.0  ;;  %v6286_v56 = vpop.permute.xlu0 %2945 }
 0x2de   :  { %5123 = vpow2.f32 %v1394_v42  ;;  %v6276_v41 = vpop.eup %5115  ;;  %v6280_v23 = vmul.f32 %v5114_v45, %v5897_v5  ;;  %8917 = vst [vmem:[#allocation55_spill] sm:$0xff] %v6286_v56 }
 0x2df   :  { %5125 = vrcp.f32 %v1420_v37  ;;  %v6282_v30 = vpop.eup %5117 }
 0x2e0   :  { %1458 = vadd.xlane.f32.xlu1 %v1457_v12  ;;  %v1481_v12 = vsel %vm1207_vm2, %v6276_v41, 0.0  ;;  %v1475_v15 = vsel %vm1207_vm2, %v6282_v30, 0.0 }
 0x2e1   :  { %v5120_v44 = vpop.eup %5119  ;;  %v1414_v42 = vpop.xlane.xlu0 %1413 }
 0x2e2   :  { %v6294_v5 = vmul.f32 %v5120_v44, %v5903_v46  ;;  %5127 = vrcp.f32 %v1414_v42  ;;  %v8804_v44 = vmov 3  }
 0x2e3   :  { %5129 = vrcp.f32 %v6219_v1 }
 0x2e4   :  { %1452 = vadd.xlane.f32.xlu1 %v1451_v14  ;;  %v6296_v14 = vpop.eup %5121 }
 0x2e6   :  { %v4712_v63 = vpop.f32.mrf.mxu1 }
 0x2e8   :  { %1562 = vperm.xlu0 %4861, %v6264_v10   ;;  %1470 = vadd.xlane.f32.xlu1 %v1469_v9  ;;  %v8801_v9 = vmov 1   ;;  %v4713_v37 = vpop.f32.mrf.mxu1 }
 0x2ea   :  { %v4715_v45 = vpop.f32.mrf.mxu1 }
 0x2ec   :  { %4863 = vset.pattern.permute.xlu0 %v8799_v31  ;;  %1464 = vadd.xlane.f32.xlu1 %v1463_v48  ;;  %v1493_v48 = vsel %vm1207_vm2, %v6296_v14, 0.0  ;;  %v1423_v31 = vpop.xlane.xlu1 %1422  ;;  %v4716_v46 = vpop.f32.mrf.mxu1 }
 0x2ed   :  { %2073 = vperm.xlu0 %4863, %v6264_v10   ;;  %v4717_v19 = vadd.f32 %v4716_v46, %v4715_v45  ;;  %5131 = vrcp.f32 %v1423_v31 }
 0x2f0   :  { %1482 = vadd.xlane.f32.xlu1 %v1481_v12  ;;  %v6302_v12 = vpop.eup %5123  ;;  %v6312_v34 = vpop.permute.xlu1 %2947 }
 0x2f1   :  { %2085 = vperm.xlu0 %4863, %v6280_v23   ;;  %v4718_v56 = vpop.f32.mrf.mxu1  ;;  %v1487_v42 = vsel %vm1207_vm2, %v6302_v12, 0.0  ;;  %8919 = vst [vmem:[#allocation57_spill] sm:$0xff] %v6312_v34 }
 0x2f3   :  { %v4719_v29 = vpop.f32.mrf.mxu1 }
 0x2f4   :  { %1476 = vadd.xlane.f32.xlu1 %v1475_v15  ;;  %v5126_v15 = vpop.eup %5125 }
 0x2f5   :  { %4869 = vset.pattern.permute.xlu0 %v8801_v9  ;;  %v4714_v9 = vadd.f32 %v4713_v37, %v4712_v63  ;;  %v6310_v43 = vmul.f32 %v5126_v15, %v5911_v32  ;;  %v900_v63 = vadd.f32 %v4717_v19, %v5992_v27  ;;  %v4721_v37 = vpop.f32.mrf.mxu1  ;;  %v5128_v0 = vpop.eup %5127 }
 0x2f6   :  { %1757 = vperm.xlu0 %4869, %v6294_v5   ;;  %v6325_v31 = vmul.f32 %v5128_v0, %v5938_v2 }
 0x2f7   :  { %v897_v57 = vadd.f32 %v4714_v9, %v5992_v27  ;;  %v4722_v45 = vpop.f32.mrf.mxu1  ;;  %v952_v15 = vmax.f32 %v900_v63, 0.0 }
 0x2f8   :  { %1494 = vadd.xlane.f32.xlu1 %v1493_v48  ;;  %v4720_v48 = vadd.f32 %v4719_v29, %v4718_v56  ;;  %v4723_v46 = vadd.f32 %v4722_v45, %v4721_v37  ;;  %v6319_v29 = vpop.permute.xlu0 %2957  ;;  %v8922_v56 = vmov 3  }
 0x2f9   :  { %v951_v32 = vmax.f32 %v897_v57, 0.0  ;;  %8921 = vst [vmem:[#allocation58_spill] sm:$0xff] %v6319_v29  ;;  %v5130_v57 = vpop.eup %5129 }
 0x2fa   :  { %4871 = vset.pattern.permute.xlu0 %v8804_v44  ;;  %v8920_v44 = vmov 1   ;;  %v905_v1 = vadd.f32 %v4720_v48, %v5992_v27  ;;  %v908_v9 = vadd.f32 %v4723_v46, %v5992_v27  ;;  %v1530_v27 = vmul.f32 %v5130_v57, %v5857_v40 }
 0x2fb   :  { %2397 = vperm.xlu0 %4871, %v6294_v5   ;;  %v971_v49 = vpack.c.bf16 %v952_v15, %v951_v32 }
 0x2fc   :  { %1488 = vadd.xlane.f32.xlu1 %v1487_v42  ;;  %v1417_v42 = vpop.xlane.xlu1 %1416  ;;  %v953_v34 = vmax.f32 %v905_v1, 0.0  ;;  %v954_v19 = vmax.f32 %v908_v9, 0.0  ;;  %v1432_v48 = vpop.xlane.xlu0 %1431 }
 0x2fd   :  { %5133 = vrcp.f32 %v1417_v42  ;;  %4836 = vmatprep.mubr.bf16.mxu0 %v971_v49  ;;  %v5132_v1 = vpop.eup %5131 }
 0x2fe   :  { %v972_v37 = vpack.c.bf16 %v954_v19, %v953_v34  ;;  %5135 = vrcp.f32 %v1432_v48  ;;  %v6336_v2 = vmul.f32 %v5132_v1, %v5930_v28  ;;  %v8924_v34 = vmov 2  }
 0x2ff   :  { %4873 = vset.pattern.permute.xlu0 %v8920_v44 }
 0x300   :  { %1777 = vperm.xlu0 %4873, %v6310_v43   ;;  %4837 = vmatmul.mubr.bf16.gmra.mxu0 %v972_v37  ;;  %v6330_v63 = vpop.permute.xlu0 %2953  ;;  %v6344_v46 = vpop.permute.xlu1 %2959 }
 0x301   :  { %8923 = vst [vmem:[#allocation59_spill] sm:$0xff] %v6330_v63  ;;  %8925 = vst [vmem:[#allocation60_spill] sm:$0xff] %v6344_v46 }
 0x304   :  { %4875 = vset.pattern.permute.xlu0 %v8922_v56  ;;  %v1426_v0 = vpop.xlane.xlu0 %1425  ;;  %v1435_v32 = vpop.xlane.xlu1 %1434 }
 0x305   :  { %2417 = vperm.xlu0 %4875, %v6310_v43   ;;  %5137 = vrcp.f32 %v1426_v0 }
 0x306   :  { %5139 = vrcp.f32 %v1435_v32 }
 0x308   :  { %v6371_v29 = vpop.permute.xlu0 %2965 }
 0x309   :  { %4877 = vset.pattern.permute.xlu0 %v8920_v44  ;;  %8928 = vst [vmem:[#allocation62_spill] sm:$0xff] %v6371_v29 }
 0x30a   :  { %1769 = vperm.xlu0 %4877, %v6325_v31   ;;  %v5134_v49 = vpop.eup %5133 }
 0x30b   :  { %v6341_v40 = vmul.f32 %v5134_v49, %v5973_v59  ;;  %v5136_v45 = vpop.eup %5135 }
 0x30c   :  { %v6348_v28 = vmul.f32 %v5136_v45, %v5987_v21  ;;  %v6355_v21 = vpop.permute.xlu1 %2955  ;;  %v5279_v45 = vld [vmem:[%s8772_s4] ss:$0 sm:$0xff] }
 0x30d   :  { %1572 = vperm.xlu1 %4857, %v1530_v27   ;;  %8926 = vst [vmem:[#allocation61_spill] sm:$0xff] %v6355_v21 }
 0x30e   :  { %4879 = vset.pattern.permute.xlu0 %v8922_v56 }
 0x30f   :  { %2409 = vperm.xlu0 %4879, %v6325_v31  }
 0x310   :  { %v1429_v0 = vpop.xlane.xlu1 %1428 }
 0x311   :  { %4858 = vset.pattern.permute.xlu1 %v8920_v44  ;;  %5141 = vrcp.f32 %v1429_v0 }
 0x312   :  { %1761 = vperm.xlu1 %4858, %v1530_v27   ;;  %v5138_v19 = vpop.eup %5137 }
 0x313   :  { %4882 = vset.pattern.permute.xlu0 %v8924_v34  ;;  %v4724_v42 = vpop.f32.mrf.mxu1 }
 0x314   :  { %2101 = vperm.xlu0 %4882, %v6336_v2  }
 0x315   :  { %v4725_v59 = vpop.f32.mrf.mxu1 }
 0x316   :  { %4859 = vset.pattern.permute.xlu1 %v8924_v34  ;;  %v4726_v48 = vadd.f32 %v4725_v59, %v4724_v42 }
 0x317   :  { %2081 = vperm.xlu1 %4859, %v1530_v27   ;;  %v4727_v15 = vpop.f32.mrf.mxu1 }
 0x318   :  { %2093 = vperm.xlu0 %4882, %v6341_v40   ;;  %v913_v42 = vadd.f32 %v5279_v45, %v4726_v48 }
 0x319   :  { %v4728_v9 = vpop.f32.mrf.mxu1 }
 0x31a   :  { %v4729_v37 = vadd.f32 %v4728_v9, %v4727_v15 }
 0x31b   :  { %4860 = vset.pattern.permute.xlu1 %v8922_v56  ;;  %v4730_v57 = vpop.f32.mrf.mxu1 }
 0x31c   :  { %4888 = vset.pattern.permute.xlu0 %v8920_v44  ;;  %2401 = vperm.xlu1 %4860, %v1530_v27   ;;  %v6360_v27 = vmul.f32 %v5138_v19, %v6040_v24  ;;  %v916_v32 = vadd.f32 %v5279_v45, %v4729_v37  ;;  %v8927_v19 = vmov 0  }
 0x31d   :  { %1793 = vperm.xlu0 %4888, %v6348_v28   ;;  %v4731_v1 = vpop.f32.mrf.mxu1 }
 0x31e   :  { %v4732_v49 = vadd.f32 %v4731_v1, %v4730_v57  ;;  %v955_v57 = vmax.f32 %v913_v42, 0.0  ;;  %v956_v1 = vmax.f32 %v916_v32, 0.0 }
 0x31f   :  { %v4733_v59 = vpop.f32.mrf.mxu1 }
 0x320   :  { %4862 = vset.pattern.permute.xlu1 %v8920_v44  ;;  %v921_v24 = vadd.f32 %v5279_v45, %v4732_v49  ;;  %v973_v49 = vpack.c.bf16 %v956_v1, %v955_v57 }
 0x321   :  { %4890 = vset.pattern.permute.xlu0 %v8922_v56  ;;  %1753 = vperm.xlu1 %4862, %v6264_v10   ;;  %v4734_v15 = vpop.f32.mrf.mxu1 }
 0x322   :  { %2433 = vperm.xlu0 %4890, %v6348_v28   ;;  %v4735_v9 = vadd.f32 %v4734_v15, %v4733_v59  ;;  %v957_v48 = vmax.f32 %v921_v24, 0.0  ;;  %v1444_v59 = vpop.xlane.xlu0 %1443  ;;  %4840 = vmatprep.mubr.bf16.mxu0 %v973_v49  ;;  %v6397_v15 = vpop.permute.xlu1 %2967 }
 0x323   :  { %5143 = vrcp.f32 %v1444_v59  ;;  %8930 = vst [vmem:[#allocation64_spill] sm:$0xff] %v6397_v15 }
 0x324   :  { %v924_v37 = vadd.f32 %v5279_v45, %v4735_v9 }
 0x325   :  { %4864 = vset.pattern.permute.xlu1 %v8922_v56 }
 0x326   :  { %4892 = vset.pattern.permute.xlu0 %v8920_v44  ;;  %2393 = vperm.xlu1 %4864, %v6264_v10   ;;  %v5140_v10 = vpop.eup %5139  ;;  %v958_v63 = vmax.f32 %v924_v37, 0.0  ;;  %v6386_v45 = vpop.permute.xlu0 %2961 }
 0x327   :  { %1785 = vperm.xlu0 %4892, %v6360_v27   ;;  %v6376_v0 = vmul.f32 %v5140_v10, %v6034_v52  ;;  %v5142_v52 = vpop.eup %5141  ;;  %8929 = vst [vmem:[#allocation63_spill] sm:$0xff] %v6386_v45 }
 0x328   :  { %v974_v42 = vpack.c.bf16 %v958_v63, %v957_v48  ;;  %v6389_v63 = vmul.f32 %v5142_v52, %v6085_v35 }
 0x32a   :  { %4865 = vset.pattern.permute.xlu1 %v8927_v19  ;;  %4841 = vmatmul.mubr.bf16.gmra.mxu0 %v974_v42 }
 0x32b   :  { %4894 = vset.pattern.permute.xlu0 %v8922_v56  ;;  %1577 = vperm.xlu1 %4865, %v6280_v23  }
 0x32c   :  { %2425 = vperm.xlu0 %4894, %v6360_v27  }
 0x32f   :  { %4866 = vset.pattern.permute.xlu1 %v8920_v44 }
 0x330   :  { %4895 = vset.pattern.permute.xlu0 %v8927_v19  ;;  %1765 = vperm.xlu1 %4866, %v6280_v23   ;;  %v5144_v24 = vpop.eup %5143  ;;  %v1447_v57 = vpop.xlane.xlu1 %1446 }
 0x331   :  { %1617 = vperm.xlu0 %4895, %v6376_v0   ;;  %v6404_v9 = vmul.f32 %v5144_v24, %v6096_v61 }
 0x334   :  { %4867 = vset.pattern.permute.xlu1 %v8922_v56 }
 0x335   :  { %4897 = vset.pattern.permute.xlu0 %v8924_v34  ;;  %2405 = vperm.xlu1 %4867, %v6280_v23  }
 0x336   :  { %2117 = vperm.xlu0 %4897, %v6376_v0  }
 0x339   :  { %4868 = vset.pattern.permute.xlu1 %v8927_v19 }
 0x33a   :  { %4899 = vset.pattern.permute.xlu0 %v8927_v19  ;;  %1567 = vperm.xlu1 %4868, %v6294_v5  }
 0x33b   :  { %1607 = vperm.xlu0 %4899, %v6389_v63   ;;  %v1438_v32 = vpop.xlane.xlu0 %1437 }
 0x33c   :  { %5145 = vrcp.f32 %v1438_v32 }
 0x33d   :  { %5147 = vrcp.f32 %v1447_v57 }
 0x33e   :  { %4870 = vset.pattern.permute.xlu1 %v8924_v34 }
 0x33f   :  { %4901 = vset.pattern.permute.xlu0 %v8924_v34  ;;  %v1456_v23 = vpop.xlane.xlu0 %1455  ;;  %2077 = vperm.xlu1 %4870, %v6294_v5  }
 0x340   :  { %2109 = vperm.xlu0 %4901, %v6389_v63  }
 0x343   :  { %v6401_v35 = vpop.xlane.xlu0 %1449  ;;  %4872 = vset.pattern.permute.xlu1 %v8927_v19 }
 0x344   :  { %4904 = vset.pattern.permute.xlu0 %v8920_v44  ;;  %1592 = vperm.xlu1 %4872, %v6310_v43  }
 0x345   :  { %1809 = vperm.xlu0 %4904, %v6404_v9  }
 0x347   :  { %v6410_v1 = vpop.xlane.xlu0 %1467 }
 0x348   :  { %4874 = vset.pattern.permute.xlu1 %v8924_v34 }
 0x349   :  { %4906 = vset.pattern.permute.xlu0 %v8922_v56  ;;  %v5146_v5 = vpop.eup %5145  ;;  %2097 = vperm.xlu1 %4874, %v6310_v43  }
 0x34a   :  { %2449 = vperm.xlu0 %4906, %v6404_v9   ;;  %v6419_v10 = vmul.f32 %v5146_v5, %v6156_v22  ;;  %v5148_v37 = vpop.eup %5147 }
 0x34b   :  { %v6416_v61 = vpop.xlane.xlu0 %1461  ;;  %v6434_v22 = vmul.f32 %v5148_v37, %v6143_v39 }
 0x34d   :  { %4876 = vset.pattern.permute.xlu1 %v8927_v19 }
 0x34e   :  { %4908 = vset.pattern.permute.xlu0 %v8920_v44  ;;  %1582 = vperm.xlu1 %4876, %v6325_v31  }
 0x34f   :  { %1801 = vperm.xlu0 %4908, %v6419_v10   ;;  %v6425_v48 = vpop.xlane.xlu0 %1479 }
 0x352   :  { %4878 = vset.pattern.permute.xlu1 %v8924_v34 }
 0x353   :  { %4910 = vset.pattern.permute.xlu0 %v8922_v56  ;;  %v6429_v43 = vpop.xlane.xlu0 %1473  ;;  %2089 = vperm.xlu1 %4878, %v6325_v31   ;;  %v6448_v31 = vpop.permute.xlu1 %2963 }
 0x354   :  { %2441 = vperm.xlu0 %4910, %v6419_v10   ;;  %8931 = vst [vmem:[#allocation65_spill] sm:$0xff] %v6448_v31 }
 0x357   :  { %4880 = vset.pattern.permute.xlu1 %v8927_v19  ;;  %v6438_v49 = vpop.xlane.xlu0 %1491 }
 0x358   :  { %4911 = vset.pattern.permute.xlu0 %v8927_v19  ;;  %1597 = vperm.xlu1 %4880, %v6336_v2  }
 0x359   :  { %1637 = vperm.xlu0 %4911, %v6434_v22  }
 0x35b   :  { %v6446_v39 = vpop.xlane.xlu0 %1485 }
 0x35c   :  { %4881 = vset.pattern.permute.xlu1 %v8920_v44 }
 0x35d   :  { %4913 = vset.pattern.permute.xlu0 %v8924_v34  ;;  %1781 = vperm.xlu1 %4881, %v6336_v2  }
 0x35e   :  { %2133 = vperm.xlu0 %4913, %v6434_v22  }
 0x361   :  { %4883 = vset.pattern.permute.xlu1 %v8922_v56 }
 0x362   :  { %4915 = vset.pattern.permute.xlu0 %v8927_v19  ;;  %2421 = vperm.xlu1 %4883, %v6336_v2  }
 0x363   :  { %v6453_v59 = vpop.permute.xlu0 %1562 }
 0x364   :  { %8932 = vst [vmem:[#allocation66_spill] sm:$0xff] %v6453_v59 }
 0x365   :  { %v1441_v42 = vpop.xlane.xlu1 %1440 }
 0x366   :  { %5149 = vrcp.f32 %v1441_v42  ;;  %4884 = vset.pattern.permute.xlu1 %v8927_v19 }
 0x367   :  { %1587 = vperm.xlu1 %4884, %v6341_v40   ;;  %5151 = vrcp.f32 %v1456_v23 }
 0x368   :  { %v6457_v52 = vpop.permute.xlu0 %2073  ;;  %5153 = vrcp.f32 %v6401_v35 }
 0x369   :  { %v1459_v32 = vpop.xlane.xlu1 %1458 }
 0x36a   :  { %5155 = vrcp.f32 %v1459_v32 }
 0x36b   :  { %4885 = vset.pattern.permute.xlu1 %v8920_v44 }
 0x36c   :  { %v6460_v24 = vpop.permute.xlu0 %2085  ;;  %1773 = vperm.xlu1 %4885, %v6341_v40  }
 0x36d   :  { %v1453_v57 = vpop.xlane.xlu1 %1452 }
 0x36e   :  { %5157 = vrcp.f32 %v1453_v57 }
 0x36f   :  { %5159 = vrcp.f32 %v6410_v1 }
 0x370   :  { %4886 = vset.pattern.permute.xlu1 %v8922_v56  ;;  %5161 = vrcp.f32 %v6416_v61 }
 0x371   :  { %v6464_v2 = vpop.permute.xlu0 %1757  ;;  %v6466_v5 = vpop.xlane.xlu1 %1470  ;;  %2413 = vperm.xlu1 %4886, %v6341_v40  }
 0x372   :  { %5163 = vrcp.f32 %v6466_v5 }
 0x373   :  { %v5150_v37 = vpop.eup %5149 }
 0x374   :  { %v6470_v42 = vmul.f32 %v5150_v37, %v6237_v6  ;;  %v5152_v6 = vpop.eup %5151 }
 0x375   :  { %v6472_v59 = vpop.xlane.xlu1 %1464  ;;  %4887 = vset.pattern.permute.xlu1 %v8927_v19  ;;  %v6491_v45 = vmul.f32 %v5152_v6, %v6166_v25 }
 0x376   :  { %v6475_v29 = vpop.permute.xlu0 %2397  ;;  %1612 = vperm.xlu1 %4887, %v6348_v28   ;;  %1627 = vperm.xlu0 %4915, %v6470_v42   ;;  %5165 = vrcp.f32 %v6472_v59 }
 0x377   :  { %5167 = vrcp.f32 %v6425_v48 }
 0x378   :  { %5169 = vrcp.f32 %v6429_v43 }
 0x379   :  { %v6480_v23 = vpop.xlane.xlu1 %1482 }
 0x37a   :  { %4889 = vset.pattern.permute.xlu1 %v8924_v34  ;;  %4917 = vset.pattern.permute.xlu0 %v8924_v34  ;;  %5171 = vrcp.f32 %v6480_v23 }
 0x37b   :  { %v6484_v40 = vpop.permute.xlu0 %1777  ;;  %2113 = vperm.xlu1 %4889, %v6348_v28   ;;  %2125 = vperm.xlu0 %4917, %v6470_v42   ;;  %v5154_v28 = vpop.eup %5153 }
 0x37c   :  { %v6510_v31 = vmul.f32 %v5154_v28, %v6172_v17  ;;  %v5156_v17 = vpop.eup %5155 }
 0x37d   :  { %v6488_v37 = vpop.xlane.xlu1 %1476 }
 0x37e   :  { %5173 = vrcp.f32 %v6488_v37 }
 0x37f   :  { %4891 = vset.pattern.permute.xlu1 %v8927_v19  ;;  %4920 = vset.pattern.permute.xlu0 %v8920_v44  ;;  %5175 = vrcp.f32 %v6438_v49 }
 0x380   :  { %1602 = vperm.xlu1 %4891, %v6360_v27   ;;  %1825 = vperm.xlu0 %4920, %v6491_v45   ;;  %v6497_v35 = vpop.permute.xlu0 %2417  ;;  %5177 = vrcp.f32 %v6446_v39 }
 0x381   :  { %v6499_v15 = vpop.xlane.xlu1 %1494 }
 0x382   :  { %5179 = vrcp.f32 %v6499_v15 }
 0x384   :  { %4893 = vset.pattern.permute.xlu1 %v8924_v34  ;;  %4922 = vset.pattern.permute.xlu0 %v8922_v56 }
 0x385   :  { %v6503_v25 = vpop.xlane.xlu1 %1488  ;;  %2105 = vperm.xlu1 %4893, %v6360_v27   ;;  %2465 = vperm.xlu0 %4922, %v6491_v45   ;;  %v6507_v6 = vpop.permute.xlu0 %1769 }
 0x386   :  { %5181 = vrcp.f32 %v6503_v25 }
 0x389   :  { %v6512_v46 = vpop.permute.xlu1 %1572  ;;  %4896 = vset.pattern.permute.xlu1 %v8920_v44  ;;  %4924 = vset.pattern.permute.xlu0 %v8920_v44 }
 0x38a   :  { %8933 = vst [vmem:[#allocation67_spill] sm:$0xff] %v6512_v46  ;;  %1797 = vperm.xlu1 %4896, %v6376_v0   ;;  %1817 = vperm.xlu0 %4924, %v6510_v31   ;;  %v6518_v32 = vpop.permute.xlu0 %2409  ;;  %v6529_v46 = vmul.f32 %v5156_v17, %v6247_v55  ;;  %v5158_v55 = vpop.eup %5157 }
 0x38b   :  { %v6549_v11 = vmul.f32 %v5158_v55, %v6253_v3  ;;  %v5160_v3 = vpop.eup %5159 }
 0x38c   :  { %v6569_v8 = vmul.f32 %v5160_v3, %v6183_v60  ;;  %v5162_v60 = vpop.eup %5161 }
 0x38d   :  { %v6520_v27 = vpop.permute.xlu1 %1761 }
 0x38e   :  { %4898 = vset.pattern.permute.xlu1 %v8922_v56  ;;  %4926 = vset.pattern.permute.xlu0 %v8922_v56 }
 0x38f   :  { %2437 = vperm.xlu1 %4898, %v6376_v0   ;;  %2457 = vperm.xlu0 %4926, %v6510_v31   ;;  %v6531_v21 = vpop.permute.xlu0 %2101 }
 0x392   :  { %v6526_v28 = vpop.permute.xlu1 %2081 }
 0x393   :  { %4900 = vset.pattern.permute.xlu1 %v8920_v44  ;;  %4927 = vset.pattern.permute.xlu0 %v8927_v19  ;;  %v6542_v57 = vpop.permute.xlu0 %2093 }
 0x394   :  { %1789 = vperm.xlu1 %4900, %v6389_v63   ;;  %1657 = vperm.xlu0 %4927, %v6529_v46  }
 0x397   :  { %v6538_v0 = vpop.permute.xlu1 %2401 }
 0x398   :  { %4902 = vset.pattern.permute.xlu1 %v8922_v56  ;;  %4929 = vset.pattern.permute.xlu0 %v8924_v34  ;;  %v6555_v1 = vpop.permute.xlu0 %1793 }
 0x399   :  { %2429 = vperm.xlu1 %4902, %v6389_v63   ;;  %2149 = vperm.xlu0 %4929, %v6529_v46  }
 0x39c   :  { %v6546_v17 = vpop.permute.xlu1 %1753 }
 0x39d   :  { %4903 = vset.pattern.permute.xlu1 %v8927_v19  ;;  %4931 = vset.pattern.permute.xlu0 %v8927_v19  ;;  %v6564_v55 = vpop.permute.xlu0 %2433 }
 0x39e   :  { %1632 = vperm.xlu1 %4903, %v6404_v9   ;;  %1647 = vperm.xlu0 %4931, %v6549_v11  }
 0x3a1   :  { %v6558_v63 = vpop.permute.xlu1 %2393 }
 0x3a2   :  { %4905 = vset.pattern.permute.xlu1 %v8924_v34  ;;  %4933 = vset.pattern.permute.xlu0 %v8924_v34 }
 0x3a3   :  { %2129 = vperm.xlu1 %4905, %v6404_v9   ;;  %2141 = vperm.xlu0 %4933, %v6549_v11   ;;  %v6576_v9 = vpop.permute.xlu0 %1785 }
 0x3a6   :  { %v6566_v36 = vpop.permute.xlu1 %1577 }
 0x3a7   :  { %8934 = vst [vmem:[#allocation68_spill] sm:$0xff] %v6566_v36  ;;  %4907 = vset.pattern.permute.xlu1 %v8927_v19  ;;  %4936 = vset.pattern.permute.xlu0 %v8920_v44  ;;  %v6587_v36 = vmul.f32 %v5162_v60, %v6189_v16  ;;  %v6589_v50 = vpop.permute.xlu0 %2425  ;;  %v5164_v16 = vpop.eup %5163 }
 0x3a8   :  { %1622 = vperm.xlu1 %4907, %v6419_v10   ;;  %1841 = vperm.xlu0 %4936, %v6569_v8   ;;  %v6607_v20 = vmul.f32 %v5164_v16, %v6261_v7  ;;  %v5166_v7 = vpop.eup %5165 }
 0x3ab   :  { %v6578_v61 = vpop.permute.xlu1 %1765 }
 0x3ac   :  { %4909 = vset.pattern.permute.xlu1 %v8924_v34  ;;  %4938 = vset.pattern.permute.xlu0 %v8922_v56  ;;  %v6600_v5 = vpop.permute.xlu0 %1617 }
 0x3ad   :  { %2121 = vperm.xlu1 %4909, %v6419_v10   ;;  %2481 = vperm.xlu0 %4938, %v6569_v8   ;;  %8936 = vst [vmem:[#allocation70_spill] sm:$0xff] %v6600_v5 }
 0x3b0   :  { %v6584_v3 = vpop.permute.xlu1 %2405 }
 0x3b1   :  { %4912 = vset.pattern.permute.xlu1 %v8920_v44  ;;  %4940 = vset.pattern.permute.xlu0 %v8920_v44  ;;  %v6613_v59 = vpop.permute.xlu0 %2117 }
 0x3b2   :  { %1813 = vperm.xlu1 %4912, %v6434_v22   ;;  %1833 = vperm.xlu0 %4940, %v6587_v36  }
 0x3b5   :  { %v6596_v10 = vpop.permute.xlu1 %1567 }
 0x3b6   :  { %8935 = vst [vmem:[#allocation69_spill] sm:$0xff] %v6596_v10  ;;  %4914 = vset.pattern.permute.xlu1 %v8922_v56  ;;  %4942 = vset.pattern.permute.xlu0 %v8922_v56  ;;  %v6622_v16 = vpop.permute.xlu0 %1607  ;;  %v6627_v10 = vmul.f32 %v5166_v7, %v6271_v18  ;;  %v5168_v18 = vpop.eup %5167 }
 0x3b7   :  { %2453 = vperm.xlu1 %4914, %v6434_v22   ;;  %2473 = vperm.xlu0 %4942, %v6587_v36   ;;  %8938 = vst [vmem:[#allocation72_spill] sm:$0xff] %v6622_v16  ;;  %v6645_v16 = vmul.f32 %v5168_v18, %v6193_v47  ;;  %v5170_v47 = vpop.eup %5169 }
 0x3ba   :  { %v6604_v60 = vpop.permute.xlu1 %2077 }
 0x3bb   :  { %4916 = vset.pattern.permute.xlu1 %v8920_v44  ;;  %4943 = vset.pattern.permute.xlu0 %v8927_v19  ;;  %v6634_v48 = vpop.permute.xlu0 %2109 }
 0x3bc   :  { %1805 = vperm.xlu1 %4916, %v6470_v42   ;;  %1677 = vperm.xlu0 %4943, %v6607_v20  }
 0x3bf   :  { %v6616_v22 = vpop.permute.xlu1 %1592 }
 0x3c0   :  { %8937 = vst [vmem:[#allocation71_spill] sm:$0xff] %v6616_v22  ;;  %4918 = vset.pattern.permute.xlu1 %v8922_v56  ;;  %4945 = vset.pattern.permute.xlu0 %v8924_v34  ;;  %v6647_v22 = vpop.permute.xlu0 %1809 }
 0x3c1   :  { %2445 = vperm.xlu1 %4918, %v6470_v42   ;;  %2165 = vperm.xlu0 %4945, %v6607_v20  }
 0x3c4   :  { %v6624_v5 = vpop.permute.xlu1 %2097 }
 0x3c5   :  { %4919 = vset.pattern.permute.xlu1 %v8927_v19  ;;  %4947 = vset.pattern.permute.xlu0 %v8927_v19  ;;  %v6658_v43 = vpop.permute.xlu0 %2449 }
 0x3c6   :  { %1652 = vperm.xlu1 %4919, %v6491_v45   ;;  %1667 = vperm.xlu0 %4947, %v6627_v10  }
 0x3c9   :  { %v6636_v42 = vpop.permute.xlu1 %1582 }
 0x3ca   :  { %8939 = vst [vmem:[#allocation73_spill] sm:$0xff] %v6636_v42  ;;  %4921 = vset.pattern.permute.xlu1 %v8924_v34  ;;  %4949 = vset.pattern.permute.xlu0 %v8924_v34  ;;  %v6665_v42 = vmul.f32 %v5170_v47, %v6203_v33  ;;  %v6671_v23 = vpop.permute.xlu0 %1801  ;;  %v5172_v33 = vpop.eup %5171 }
 0x3cb   :  { %2145 = vperm.xlu1 %4921, %v6491_v45   ;;  %2157 = vperm.xlu0 %4949, %v6627_v10   ;;  %v6685_v51 = vmul.f32 %v5172_v33, %v6276_v41  ;;  %v5174_v41 = vpop.eup %5173 }
 0x3ce   :  { %v6642_v7 = vpop.permute.xlu1 %2089 }
 0x3cf   :  { %4923 = vset.pattern.permute.xlu1 %v8927_v19  ;;  %4952 = vset.pattern.permute.xlu0 %v8920_v44  ;;  %v6680_v47 = vpop.permute.xlu0 %2441 }
 0x3d0   :  { %1642 = vperm.xlu1 %4923, %v6510_v31   ;;  %1857 = vperm.xlu0 %4952, %v6645_v16  }
 0x3d3   :  { %v6654_v45 = vpop.permute.xlu1 %1597 }
 0x3d4   :  { %8940 = vst [vmem:[#allocation74_spill] sm:$0xff] %v6654_v45  ;;  %4925 = vset.pattern.permute.xlu1 %v8924_v34  ;;  %4954 = vset.pattern.permute.xlu0 %v8922_v56 }
 0x3d5   :  { %2137 = vperm.xlu1 %4925, %v6510_v31   ;;  %2497 = vperm.xlu0 %4954, %v6645_v16  }
 0x3d8   :  { %v6662_v18 = vpop.permute.xlu1 %1781 }
 0x3d9   :  { %4928 = vset.pattern.permute.xlu1 %v8920_v44  ;;  %4956 = vset.pattern.permute.xlu0 %v8920_v44 }
 0x3da   :  { %1829 = vperm.xlu1 %4928, %v6529_v46   ;;  %1849 = vperm.xlu0 %4956, %v6665_v42  }
 0x3dd   :  { %v6674_v31 = vpop.permute.xlu1 %2421 }
 0x3de   :  { %4930 = vset.pattern.permute.xlu1 %v8922_v56  ;;  %4958 = vset.pattern.permute.xlu0 %v8922_v56 }
 0x3df   :  { %2469 = vperm.xlu1 %4930, %v6529_v46   ;;  %2489 = vperm.xlu0 %4958, %v6665_v42   ;;  %v6692_v46 = vpop.permute.xlu0 %1637 }
 0x3e0   :  { %8942 = vst [vmem:[#allocation76_spill] sm:$0xff] %v6692_v46 }
 0x3e2   :  { %v6682_v45 = vpop.permute.xlu1 %1587 }
 0x3e3   :  { %8941 = vst [vmem:[#allocation75_spill] sm:$0xff] %v6682_v45  ;;  %4932 = vset.pattern.permute.xlu1 %v8920_v44  ;;  %4959 = vset.pattern.permute.xlu0 %v8927_v19  ;;  %v6703_v45 = vmul.f32 %v5174_v41, %v6282_v30  ;;  %v6705_v26 = vpop.permute.xlu0 %2133  ;;  %v5176_v30 = vpop.eup %5175 }
 0x3e4   :  { %1821 = vperm.xlu1 %4932, %v6549_v11   ;;  %1697 = vperm.xlu0 %4959, %v6685_v51   ;;  %v6725_v13 = vmul.f32 %v5176_v30, %v6213_v53  ;;  %v5178_v53 = vpop.eup %5177 }
 0x3e7   :  { %v6694_v37 = vpop.permute.xlu1 %1773 }
 0x3e8   :  { %4934 = vset.pattern.permute.xlu1 %v8922_v56  ;;  %4961 = vset.pattern.permute.xlu0 %v8924_v34 }
 0x3e9   :  { %2461 = vperm.xlu1 %4934, %v6549_v11   ;;  %2181 = vperm.xlu0 %4961, %v6685_v51  }
 0x3ec   :  { %v6700_v33 = vpop.permute.xlu1 %2413 }
 0x3ed   :  { %4935 = vset.pattern.permute.xlu1 %v8927_v19  ;;  %4963 = vset.pattern.permute.xlu0 %v8927_v19 }
 0x3ee   :  { %1672 = vperm.xlu1 %4935, %v6569_v8   ;;  %1687 = vperm.xlu0 %4963, %v6703_v45  }
 0x3f1   :  { %v6712_v11 = vpop.permute.xlu1 %1612  ;;  %v6714_v49 = vpop.permute.xlu0 %1627 }
 0x3f2   :  { %8943 = vst [vmem:[#allocation77_spill] sm:$0xff] %v6712_v11  ;;  %8944 = vst [vmem:[#allocation78_spill] sm:$0xff] %v6714_v49  ;;  %4937 = vset.pattern.permute.xlu1 %v8924_v34  ;;  %4965 = vset.pattern.permute.xlu0 %v8924_v34  ;;  %v6745_v11 = vmul.f32 %v5178_v53, %v6223_v38  ;;  %v5180_v38 = vpop.eup %5179 }
 0x3f3   :  { %2161 = vperm.xlu1 %4937, %v6569_v8   ;;  %2173 = vperm.xlu0 %4965, %v6703_v45   ;;  %v6765_v62 = vmul.f32 %v5180_v38, %v6296_v14  ;;  %v5182_v54 = vpop.eup %5181 }
 0x3f4   :  { %v6784_v4 = vmul.f32 %v5182_v54, %v6302_v12 }
 0x3f6   :  { %v6720_v41 = vpop.permute.xlu1 %2113  ;;  %v6722_v46 = vpop.permute.xlu0 %2125 }
 0x3f7   :  { %4939 = vset.pattern.permute.xlu1 %v8927_v19  ;;  %4968 = vset.pattern.permute.xlu0 %v8920_v44 }
 0x3f8   :  { %1662 = vperm.xlu1 %4939, %v6587_v36   ;;  %1873 = vperm.xlu0 %4968, %v6725_v13  }
 0x3fb   :  { %v6732_v8 = vpop.permute.xlu1 %1602  ;;  %v6734_v39 = vpop.permute.xlu0 %1825 }
 0x3fc   :  { %8945 = vst [vmem:[#allocation79_spill] sm:$0xff] %v6732_v8  ;;  %4941 = vset.pattern.permute.xlu1 %v8924_v34  ;;  %4970 = vset.pattern.permute.xlu0 %v8922_v56 }
 0x3fd   :  { %2153 = vperm.xlu1 %4941, %v6587_v36   ;;  %2513 = vperm.xlu0 %4970, %v6725_v13  }
 0x400   :  { %v6740_v30 = vpop.permute.xlu1 %2105  ;;  %v6742_v49 = vpop.permute.xlu0 %2465 }
 0x401   :  { %4944 = vset.pattern.permute.xlu1 %v8920_v44  ;;  %4972 = vset.pattern.permute.xlu0 %v8920_v44 }
 0x402   :  { %1845 = vperm.xlu1 %4944, %v6607_v20   ;;  %1865 = vperm.xlu0 %4972, %v6745_v11  }
 0x405   :  { %v6752_v36 = vpop.permute.xlu1 %1797  ;;  %v6754_v15 = vpop.permute.xlu0 %1817 }
 0x406   :  { %8946 = vst [vmem:[#allocation80_spill] sm:$0xff] %v6752_v36  ;;  %4946 = vset.pattern.permute.xlu1 %v8922_v56  ;;  %4974 = vset.pattern.permute.xlu0 %v8922_v56 }
 0x407   :  { %2485 = vperm.xlu1 %4946, %v6607_v20   ;;  %2505 = vperm.xlu0 %4974, %v6745_v11  }
 0x40a   :  { %v6760_v53 = vpop.permute.xlu1 %2437  ;;  %v6762_v8 = vpop.permute.xlu0 %2457 }
 0x40b   :  { %8947 = vst [vmem:[#allocation81_spill] sm:$0xff] %v6760_v53  ;;  %4948 = vset.pattern.permute.xlu1 %v8920_v44  ;;  %4975 = vset.pattern.permute.xlu0 %v8927_v19 }
 0x40c   :  { %1837 = vperm.xlu1 %4948, %v6627_v10   ;;  %1717 = vperm.xlu0 %4975, %v6765_v62  }
 0x40f   :  { %v6771_v25 = vpop.permute.xlu1 %1789  ;;  %v6773_v20 = vpop.permute.xlu0 %1657 }
 0x410   :  { %8948 = vst [vmem:[#allocation82_spill] sm:$0xff] %v6771_v25  ;;  %8949 = vst [vmem:[#allocation83_spill] sm:$0xff] %v6773_v20  ;;  %4950 = vset.pattern.permute.xlu1 %v8922_v56  ;;  %4977 = vset.pattern.permute.xlu0 %v8924_v34  ;;  %v1080_v25 = vpop.f32.mrf.mxu0 }
 0x411   :  { %2477 = vperm.xlu1 %4950, %v6627_v10   ;;  %2197 = vperm.xlu0 %4977, %v6765_v62  }
 0x414   :  { %v6779_v14 = vpop.permute.xlu1 %2429  ;;  %v6781_v38 = vpop.permute.xlu0 %2149 }
 0x415   :  { %8950 = vst [vmem:[#allocation84_spill] sm:$0xff] %v6779_v14  ;;  %4951 = vset.pattern.permute.xlu1 %v8927_v19  ;;  %4979 = vset.pattern.permute.xlu0 %v8927_v19  ;;  %v6797_v14 = vld [vmem:[%s8773_s6] ss:$0 sm:$0xff]  ;;  %s5285_s6 = smov 112  }
 0x416   :  { %1692 = vperm.xlu1 %4951, %v6645_v16   ;;  %1707 = vperm.xlu0 %4979, %v6784_v4   ;;  %v6802_v54 = vadd.f32 %v4814_v58, %v6797_v14 }
 0x418   :  { %8953 = vst [vmem:[#allocation87_spill] sm:$0xff] %v6802_v54  ;;  %v1882_v12 = vmul.f32 %v6520_v27, %v6802_v54  ;;  %v2522_v58 = vmul.f32 %v6538_v0, %v6802_v54 }
 0x419   :  { %v6790_v20 = vpop.permute.xlu1 %1632  ;;  %v6792_v10 = vpop.permute.xlu0 %1647 }
 0x41a   :  { %8951 = vst [vmem:[#allocation85_spill] sm:$0xff] %v6790_v20  ;;  %8952 = vst [vmem:[#allocation86_spill] sm:$0xff] %v6792_v10  ;;  %4953 = vset.pattern.permute.xlu1 %v8924_v34  ;;  %4981 = vset.pattern.permute.xlu0 %v8924_v34 }
 0x41b   :  { %2177 = vperm.xlu1 %4953, %v6645_v16   ;;  %2189 = vperm.xlu0 %4981, %v6784_v4   ;;  %v6818_v16 = vadd.f32 %v6797_v14, %v1080_v25 }
 0x41d   :  { %8955 = vst [vmem:[#allocation89_spill] sm:$0xff] %v6818_v16 }
 0x41e   :  { %v6808_v10 = vpop.permute.xlu1 %2129  ;;  %v6810_v20 = vpop.permute.xlu0 %2141 }
 0x41f   :  { %8954 = vst [vmem:[#allocation88_spill] sm:$0xff] %v6808_v10  ;;  %4955 = vset.pattern.permute.xlu1 %v8927_v19  ;;  %1948 = vrot.lane.b32.xlu0 %v1882_v12, %s5285_s6  ;;  %v1880_v12 = vmul.f32 %v6546_v17, %v6818_v16  ;;  %v4815_v10 = vpop.f32.mrf.mxu0 }
 0x420   :  { %1682 = vperm.xlu1 %4955, %v6665_v42  }
 0x421   :  { %v1083_v17 = vpop.f32.mrf.mxu0 }
 0x423   :  { %v6820_v53 = vpop.permute.xlu1 %1622  ;;  %v6822_v27 = vpop.permute.xlu0 %1841  ;;  %2588 = vrot.lane.b32.xlu0 %v2522_v58, %s5286_s2  ;;  %v2520_v58 = vmul.f32 %v6558_v63, %v6818_v16 }
 0x424   :  { %8956 = vst [vmem:[#allocation90_spill] sm:$0xff] %v6820_v53  ;;  %4957 = vset.pattern.permute.xlu1 %v8924_v34  ;;  %v6835_v53 = vadd.f32 %v4815_v10, %v6797_v14  ;;  %v4818_v36 = vpop.f32.mrf.mxu0  ;;  %v6850_v10 = vadd.f32 %v6797_v14, %v1083_v17 }
 0x425   :  { %2169 = vperm.xlu1 %4957, %v6665_v42   ;;  %v6855_v63 = vadd.f32 %v4818_v36, %v6797_v14 }
 0x426   :  { %v2203_v42 = vmul.f32 %v6460_v24, %v6835_v53  ;;  %v2201_v24 = vmul.f32 %v6604_v60, %v6850_v10  ;;  %v1096_v17 = vpop.f32.mrf.mxu0 }
 0x427   :  { %1944 = vrot.lane.b32.xlu0 %v1880_v12, %s5285_s6  ;;  %v2526_v60 = vmul.f32 %v6497_v35, %v6855_v63 }
 0x428   :  { %v6830_v0 = vpop.permute.xlu1 %2121  ;;  %v6832_v25 = vpop.permute.xlu0 %2481 }
 0x429   :  { %8957 = vst [vmem:[#allocation91_spill] sm:$0xff] %v6830_v0  ;;  %4960 = vset.pattern.permute.xlu1 %v8920_v44 }
 0x42a   :  { %1861 = vperm.xlu1 %4960, %v6685_v51  }
 0x42b   :  { %2584 = vrot.lane.b32.xlu0 %v2520_v58, %s5286_s2 }
 0x42d   :  { %v6844_v12 = vpop.permute.xlu1 %1813  ;;  %v6846_v0 = vpop.permute.xlu0 %1833 }
 0x42e   :  { %8958 = vst [vmem:[#allocation92_spill] sm:$0xff] %v6844_v12  ;;  %4962 = vset.pattern.permute.xlu1 %v8922_v56 }
 0x42f   :  { %2501 = vperm.xlu1 %4962, %v6685_v51   ;;  %2270 = vrot.lane.b32.xlu0 %v2203_v42, %s5287_s8  ;;  %v1886_v51 = vmul.f32 %v6484_v40, %v6855_v63 }
 0x432   :  { %v6859_v58 = vpop.permute.xlu1 %2453  ;;  %v6861_v12 = vpop.permute.xlu0 %2473 }
 0x433   :  { %8959 = vst [vmem:[#allocation93_spill] sm:$0xff] %v6859_v58  ;;  %4964 = vset.pattern.permute.xlu1 %v8920_v44  ;;  %2266 = vrot.lane.b32.xlu0 %v2201_v24, %s5287_s8  ;;  %v6877_v58 = vadd.f32 %v6797_v14, %v1096_v17 }
 0x434   :  { %1853 = vperm.xlu1 %4964, %v6703_v45  }
 0x435   :  { %v2524_v35 = vmul.f32 %v6518_v32, %v6877_v58 }
 0x437   :  { %v6868_v42 = vpop.permute.xlu1 %1805  ;;  %v6870_v36 = vpop.permute.xlu0 %1677  ;;  %1956 = vrot.lane.b32.xlu0 %v1886_v51, %s5285_s6 }
 0x438   :  { %8960 = vst [vmem:[#allocation94_spill] sm:$0xff] %v6868_v42  ;;  %8961 = vst [vmem:[#allocation95_spill] sm:$0xff] %v6870_v36  ;;  %4966 = vset.pattern.permute.xlu1 %v8922_v56  ;;  %v1884_v36 = vmul.f32 %v6507_v6, %v6877_v58  ;;  %v4819_v51 = vpop.f32.mrf.mxu0 }
 0x439   :  { %2493 = vperm.xlu1 %4966, %v6703_v45   ;;  %v6893_v45 = vadd.f32 %v4819_v51, %v6797_v14 }
 0x43b   :  { %2596 = vrot.lane.b32.xlu0 %v2526_v60, %s5286_s2  ;;  %v2207_v6 = vmul.f32 %v6531_v21, %v6893_v45 }
 0x43c   :  { %v6881_v40 = vpop.permute.xlu1 %2445  ;;  %v6883_v24 = vpop.permute.xlu0 %2165 }
 0x43d   :  { %8962 = vst [vmem:[#allocation96_spill] sm:$0xff] %v6881_v40  ;;  %4967 = vset.pattern.permute.xlu1 %v8927_v19  ;;  %v1099_v40 = vpop.f32.mrf.mxu0 }
 0x43e   :  { %1712 = vperm.xlu1 %4967, %v6725_v13  }
 0x43f   :  { %1952 = vrot.lane.b32.xlu0 %v1884_v36, %s5285_s6  ;;  %v6905_v36 = vadd.f32 %v6797_v14, %v1099_v40  ;;  %v4822_v32 = vpop.f32.mrf.mxu0 }
 0x441   :  { %v6895_v17 = vpop.permute.xlu1 %1652  ;;  %v6897_v60 = vpop.permute.xlu0 %1667 }
 0x442   :  { %8963 = vst [vmem:[#allocation97_spill] sm:$0xff] %v6895_v17  ;;  %8964 = vst [vmem:[#allocation98_spill] sm:$0xff] %v6897_v60  ;;  %4969 = vset.pattern.permute.xlu1 %v8924_v34 }
 0x443   :  { %2193 = vperm.xlu1 %4969, %v6725_v13   ;;  %2592 = vrot.lane.b32.xlu0 %v2524_v35, %s5286_s2  ;;  %v2205_v13 = vmul.f32 %v6542_v57, %v6905_v36  ;;  %v6917_v35 = vadd.f32 %v4822_v32, %v6797_v14 }
 0x445   :  { %v2530_v60 = vmul.f32 %v6564_v55, %v6917_v35 }
 0x446   :  { %v6907_v51 = vpop.permute.xlu1 %2145  ;;  %v6909_v42 = vpop.permute.xlu0 %2157 }
 0x447   :  { %4971 = vset.pattern.permute.xlu1 %v8927_v19  ;;  %2278 = vrot.lane.b32.xlu0 %v2207_v6, %s5287_s8  ;;  %v1890_v19 = vmul.f32 %v6555_v1, %v6917_v35  ;;  %v1112_v6 = vpop.f32.mrf.mxu0 }
 0x448   :  { %1702 = vperm.xlu1 %4971, %v6745_v11   ;;  %v6936_v17 = vadd.f32 %v6797_v14, %v1112_v6 }
 0x449   :  { %v4823_v55 = vpop.f32.mrf.mxu0 }
 0x44b   :  { %v6919_v21 = vpop.permute.xlu1 %1642  ;;  %v6921_v40 = vpop.permute.xlu0 %1857  ;;  %2274 = vrot.lane.b32.xlu0 %v2205_v13, %s5287_s8  ;;  %v2528_v13 = vmul.f32 %v6589_v50, %v6936_v17 }
 0x44c   :  { %8965 = vst [vmem:[#allocation99_spill] sm:$0xff] %v6919_v21  ;;  %4973 = vset.pattern.permute.xlu1 %v8924_v34  ;;  %v1888_v34 = vmul.f32 %v6576_v9, %v6936_v17  ;;  %v6957_v9 = vadd.f32 %v4823_v55, %v6797_v14  ;;  %v1115_v6 = vpop.f32.mrf.mxu0 }
 0x44d   :  { %2185 = vperm.xlu1 %4973, %v6745_v11   ;;  %v6965_v50 = vadd.f32 %v6797_v14, %v1115_v6 }
 0x44f   :  { %1964 = vrot.lane.b32.xlu0 %v1890_v19, %s5285_s6 }
 0x450   :  { %v6929_v57 = vpop.permute.xlu1 %2137  ;;  %v6931_v32 = vpop.permute.xlu0 %2497 }
 0x451   :  { %4976 = vset.pattern.permute.xlu1 %v8920_v44 }
 0x452   :  { %1877 = vperm.xlu1 %4976, %v6765_v62  }
 0x453   :  { %2604 = vrot.lane.b32.xlu0 %v2530_v60, %s5286_s2 }
 0x455   :  { %v6943_v1 = vpop.permute.xlu1 %1829  ;;  %v6945_v11 = vpop.permute.xlu0 %1849 }
 0x456   :  { %4978 = vset.pattern.permute.xlu1 %v8922_v56 }
 0x457   :  { %2517 = vperm.xlu1 %4978, %v6765_v62   ;;  %1960 = vrot.lane.b32.xlu0 %v1888_v34, %s5285_s6  ;;  %v2211_v62 = vmul.f32 %v6613_v59, %v6957_v9  ;;  %v4826_v34 = vpop.f32.mrf.mxu0  ;;  %v2202_v59 = vmul.f32 %v6526_v28, %v6802_v54 }
 0x458   :  { %v6976_v55 = vadd.f32 %v4826_v34, %v6797_v14 }
 0x45a   :  { %v6952_v19 = vpop.permute.xlu1 %2469  ;;  %v6954_v60 = vpop.permute.xlu0 %2489 }
 0x45b   :  { %8966 = vst [vmem:[#allocation100_spill] sm:$0xff] %v6952_v19  ;;  %4980 = vset.pattern.permute.xlu1 %v8920_v44  ;;  %2600 = vrot.lane.b32.xlu0 %v2528_v13, %s5286_s2  ;;  %v2209_v44 = vmul.f32 %v6634_v48, %v6965_v50  ;;  %v1128_v48 = vpop.f32.mrf.mxu0 }
 0x45c   :  { %1869 = vperm.xlu1 %4980, %v6784_v4   ;;  %v6995_v28 = vadd.f32 %v6797_v14, %v1128_v48 }
 0x45d   :  { %v4827_v48 = vpop.f32.mrf.mxu0 }
 0x45f   :  { %v6967_v21 = vpop.permute.xlu1 %1821  ;;  %v6969_v19 = vpop.permute.xlu0 %1697  ;;  %2286 = vrot.lane.b32.xlu0 %v2211_v62, %s5287_s8  ;;  %v2200_v62 = vmul.f32 %v6457_v52, %v6818_v16  ;;  %v1892_v52 = vmul.f32 %v6671_v23, %v6995_v28  ;;  %v1881_v23 = vmul.f32 %v6464_v2, %v6850_v10 }
 0x460   :  { %8967 = vst [vmem:[#allocation101_spill] sm:$0xff] %v6969_v19  ;;  %4982 = vset.pattern.permute.xlu1 %v8922_v56  ;;  %v1894_v56 = vmul.f32 %v6647_v22, %v6976_v55  ;;  %v1883_v22 = vmul.f32 %v6578_v61, %v6835_v53  ;;  %v2532_v61 = vmul.f32 %v6680_v47, %v6995_v28 }
 0x461   :  { %2509 = vperm.xlu1 %4982, %v6784_v4   ;;  %v2534_v4 = vmul.f32 %v6658_v43, %v6976_v55 }
 0x463   :  { %2282 = vrot.lane.b32.xlu0 %v2209_v44, %s5287_s8 }
 0x464   :  { %v6982_v13 = vpop.permute.xlu1 %2461  ;;  %v6984_v6 = vpop.permute.xlu0 %2181 }
 0x465   :  { %2268 = vrot.lane.b32.xlu1 %v2202_v59, %s5287_s8 }
 0x467   :  { %1972 = vrot.lane.b32.xlu0 %v1894_v56, %s5285_s6  ;;  %v2523_v56 = vmul.f32 %v6584_v3, %v6835_v53  ;;  %v1131_v3 = vpop.f32.mrf.mxu0 }
 0x468   :  { %v7034_v2 = vadd.f32 %v6797_v14, %v1131_v3 }
 0x469   :  { %v6997_v34 = vpop.permute.xlu1 %1672  ;;  %v6999_v44 = vpop.permute.xlu0 %1687  ;;  %2264 = vrot.lane.b32.xlu1 %v2200_v62, %s5287_s8  ;;  %v7021_v62 = vadd.f32 %v4827_v48, %v6797_v14 }
 0x46a   :  { %8968 = vst [vmem:[#allocation102_spill] sm:$0xff] %v6997_v34  ;;  %8969 = vst [vmem:[#allocation103_spill] sm:$0xff] %v6999_v44  ;;  %v4830_v47 = vpop.f32.mrf.mxu0 }
 0x46b   :  { %2612 = vrot.lane.b32.xlu0 %v2534_v4, %s5286_s2 }
 0x46d   :  { %1950 = vrot.lane.b32.xlu1 %v1883_v22, %s5285_s6 }
 0x46e   :  { %v7008_v43 = vpop.permute.xlu1 %2161  ;;  %v7010_v59 = vpop.permute.xlu0 %2173 }
 0x46f   :  { %1968 = vrot.lane.b32.xlu0 %v1892_v52, %s5285_s6  ;;  %v2215_v52 = vmul.f32 %v6705_v26, %v7021_v62  ;;  %v7044_v26 = vadd.f32 %v4830_v47, %v6797_v14  ;;  %v2204_v47 = vmul.f32 %v6642_v7, %v6877_v58 }
 0x471   :  { %2590 = vrot.lane.b32.xlu1 %v2523_v56, %s5286_s2  ;;  %v2521_v56 = vmul.f32 %v6475_v29, %v6850_v10  ;;  %8971 = vst [vmem:[#allocation105_spill] sm:$0xff] %v7044_v26  ;;  %v2206_v29 = vmul.f32 %v6624_v5, %v6855_v63  ;;  %v2538_v5 = vmul.f32 %v6742_v49, %v7044_v26 }
 0x472   :  { %v2527_v49 = vmul.f32 %v6674_v31, %v6893_v45 }
 0x473   :  { %v7023_v4 = vpop.permute.xlu1 %1662  ;;  %v7025_v22 = vpop.permute.xlu0 %1873  ;;  %2608 = vrot.lane.b32.xlu0 %v2532_v61, %s5286_s2  ;;  %v2213_v61 = vmul.f32 %v6722_v46, %v7034_v2 }
 0x474   :  { %8970 = vst [vmem:[#allocation104_spill] sm:$0xff] %v7023_v4  ;;  %v1144_v46 = vpop.f32.mrf.mxu0  ;;  %v8988_v4 = vld [vmem:[#allocation84_spill] sm:$0xff] }
 0x475   :  { %1946 = vrot.lane.b32.xlu1 %v1881_v23, %s5285_s6  ;;  %v1898_v23 = vmul.f32 %v6734_v39, %v7044_v26 }
 0x477   :  { %2294 = vrot.lane.b32.xlu0 %v2215_v52, %s5287_s8 }
 0x478   :  { %v7037_v48 = vpop.permute.xlu1 %2153  ;;  %v7039_v19 = vpop.permute.xlu0 %2513 }
 0x479   :  { %2586 = vrot.lane.b32.xlu1 %v2521_v56, %s5286_s2  ;;  %v7063_v56 = vadd.f32 %v6797_v14, %v1144_v46 }
 0x47b   :  { %2290 = vrot.lane.b32.xlu0 %v2213_v61, %s5287_s8  ;;  %8972 = vst [vmem:[#allocation106_spill] sm:$0xff] %v7063_v56  ;;  %v1896_v7 = vmul.f32 %v6754_v15, %v7063_v56  ;;  %v1885_v15 = vmul.f32 %v6694_v37, %v6905_v36 }
 0x47d   :  { %v7052_v3 = vpop.permute.xlu1 %1845  ;;  %v7054_v52 = vpop.permute.xlu0 %1865  ;;  %2276 = vrot.lane.b32.xlu1 %v2206_v29, %s5287_s8  ;;  %v1887_v29 = vmul.f32 %v6662_v18, %v6893_v45  ;;  %v2536_v18 = vmul.f32 %v6762_v8, %v7063_v56 }
 0x47f   :  { %1980 = vrot.lane.b32.xlu0 %v1898_v23, %s5285_s6 }
 0x481   :  { %2272 = vrot.lane.b32.xlu1 %v2204_v47, %s5287_s8  ;;  %v4831_v47 = vpop.f32.mrf.mxu0 }
 0x482   :  { %v7066_v39 = vpop.permute.xlu1 %2485  ;;  %v7068_v61 = vpop.permute.xlu0 %2505 }
 0x483   :  { %2620 = vrot.lane.b32.xlu0 %v2538_v5, %s5286_s2  ;;  %v7089_v5 = vadd.f32 %v4831_v47, %v6797_v14 }
 0x485   :  { %1958 = vrot.lane.b32.xlu1 %v1887_v29, %s5285_s6  ;;  %v1147_v29 = vpop.f32.mrf.mxu0 }
 0x486   :  { %v7102_v37 = vadd.f32 %v6797_v14, %v1147_v29 }
 0x487   :  { %v7078_v23 = vpop.permute.xlu1 %1837  ;;  %v7080_v46 = vpop.permute.xlu0 %1717  ;;  %1976 = vrot.lane.b32.xlu0 %v1896_v7, %s5285_s6  ;;  %v2219_v7 = vmul.f32 %v6781_v38, %v7089_v5 }
 0x488   :  { %8973 = vst [vmem:[#allocation107_spill] sm:$0xff] %v7080_v46  ;;  %v4834_v8 = vpop.f32.mrf.mxu0  ;;  %8974 = vst [vmem:[#allocation108_spill] sm:$0xff] %v7102_v37  ;;  %v2217_v47 = vmul.f32 %v6810_v20, %v7102_v37 }
 0x489   :  { %2598 = vrot.lane.b32.xlu1 %v2527_v49, %s5286_s2  ;;  %v2525_v49 = vmul.f32 %v6700_v33, %v6905_v36  ;;  %v2210_v33 = vmul.f32 %v6720_v41, %v6917_v35 }
 0x48a   :  { %v1160_v29 = vpop.f32.mrf.mxu0 }
 0x48b   :  { %2616 = vrot.lane.b32.xlu0 %v2536_v18, %s5286_s2  ;;  %v7108_v18 = vadd.f32 %v4834_v8, %v6797_v14  ;;  %v2208_v8 = vmul.f32 %v6740_v30, %v6936_v17 }
 0x48c   :  { %v7092_v31 = vpop.permute.xlu1 %2477  ;;  %v7094_v46 = vpop.permute.xlu0 %2197 }
 0x48d   :  { %1954 = vrot.lane.b32.xlu1 %v1885_v15, %s5285_s6  ;;  %8975 = vst [vmem:[#allocation109_spill] sm:$0xff] %v7108_v18  ;;  %v1902_v15 = vmul.f32 %v6822_v27, %v7108_v18  ;;  %v2542_v41 = vmul.f32 %v6832_v25, %v7108_v18 }
 0x48f   :  { %2302 = vrot.lane.b32.xlu0 %v2219_v7, %s5287_s8 }
 0x491   :  { %v7110_v44 = vpop.permute.xlu1 %1692  ;;  %v7112_v38 = vpop.permute.xlu0 %1707  ;;  %2594 = vrot.lane.b32.xlu1 %v2525_v49, %s5286_s2  ;;  %v7131_v49 = vadd.f32 %v6797_v14, %v1160_v29 }
 0x492   :  { %8976 = vst [vmem:[#allocation110_spill] sm:$0xff] %v7110_v44  ;;  %8977 = vst [vmem:[#allocation111_spill] sm:$0xff] %v7112_v38 }
 0x493   :  { %2298 = vrot.lane.b32.xlu0 %v2217_v47, %s5287_s8  ;;  %8978 = vst [vmem:[#allocation112_spill] sm:$0xff] %v7131_v49  ;;  %v8980_v47 = vld [vmem:[#allocation80_spill] sm:$0xff]  ;;  %v1900_v30 = vmul.f32 %v6846_v0, %v7131_v49  ;;  %v8985_v0 = vld [vmem:[#allocation82_spill] sm:$0xff] }
 0x495   :  { %2284 = vrot.lane.b32.xlu1 %v2210_v33, %s5287_s8  ;;  %v1891_v33 = vmul.f32 %v8980_v47, %v6957_v9  ;;  %v2540_v47 = vmul.f32 %v6861_v12, %v7131_v49 }
 0x496   :  { %v7121_v20 = vpop.permute.xlu1 %2177  ;;  %v7123_v7 = vpop.permute.xlu0 %2189 }
 0x497   :  { %1988 = vrot.lane.b32.xlu0 %v1902_v15, %s5285_s6  ;;  %v8983_v15 = vld [vmem:[#allocation81_spill] sm:$0xff] }
 0x498   :  { %v2531_v29 = vmul.f32 %v8983_v15, %v6957_v9 }
 0x499   :  { %2280 = vrot.lane.b32.xlu1 %v2208_v8, %s5287_s8  ;;  %v4835_v8 = vpop.f32.mrf.mxu0 }
 0x49a   :  { %v7134_v27 = vpop.permute.xlu0 %1948 }
 0x49b   :  { %8979 = vst [vmem:[#allocation113_spill] sm:$0xff] %v7134_v27  ;;  %v7138_v38 = vpop.permute.xlu1 %1682  ;;  %2628 = vrot.lane.b32.xlu0 %v2542_v41, %s5286_s2  ;;  %v1163_v15 = vpop.f32.mrf.mxu0  ;;  %v8992_v27 = vld [vmem:[#allocation88_spill] sm:$0xff] }
 0x49c   :  { %8981 = vst [vmem:[#allocation80_spill] sm:$0xff] %v7138_v38  ;;  %v7159_v38 = vadd.f32 %v4835_v8, %v6797_v14 }
 0x49d   :  { %1966 = vrot.lane.b32.xlu1 %v1891_v33, %s5285_s6  ;;  %v1889_v33 = vmul.f32 %v8985_v0, %v6965_v50  ;;  %v4838_v12 = vpop.f32.mrf.mxu0  ;;  %v7172_v0 = vadd.f32 %v6797_v14, %v1163_v15 }
 0x49e   :  { %v7144_v25 = vpop.permute.xlu0 %2588  ;;  %8986 = vst [vmem:[#allocation82_spill] sm:$0xff] %v7159_v38 }
 0x49f   :  { %8982 = vst [vmem:[#allocation114_spill] sm:$0xff] %v7144_v25  ;;  %1984 = vrot.lane.b32.xlu0 %v1900_v30, %s5285_s6  ;;  %v2223_v30 = vmul.f32 %v6883_v24, %v7159_v38  ;;  %v2529_v25 = vmul.f32 %v8988_v4, %v6965_v50  ;;  %8989 = vst [vmem:[#allocation84_spill] sm:$0xff] %v7172_v0  ;;  %v2221_v8 = vmul.f32 %v6909_v42, %v7172_v0  ;;  %v1176_v42 = vpop.f32.mrf.mxu0 }
 0x4a0   :  { %v7149_v44 = vpop.permute.xlu1 %2169  ;;  %v7178_v24 = vadd.f32 %v4838_v12, %v6797_v14  ;;  %v2214_v4 = vmul.f32 %v8992_v27, %v6976_v55  ;;  %v8994_v12 = vld [vmem:[#allocation91_spill] sm:$0xff] }
 0x4a1   :  { %2606 = vrot.lane.b32.xlu1 %v2531_v29, %s5286_s2 }
 0x4a2   :  { %v7154_v41 = vpop.permute.xlu0 %1944  ;;  %8990 = vst [vmem:[#allocation116_spill] sm:$0xff] %v7178_v24  ;;  %v1906_v15 = vmul.f32 %v6921_v40, %v7178_v24  ;;  %v2546_v27 = vmul.f32 %v6931_v32, %v7178_v24 }
 0x4a3   :  { %8984 = vst [vmem:[#allocation81_spill] sm:$0xff] %v7154_v41  ;;  %2624 = vrot.lane.b32.xlu0 %v2540_v47, %s5286_s2 }
 0x4a5   :  { %v7164_v34 = vpop.permute.xlu1 %1861  ;;  %1962 = vrot.lane.b32.xlu1 %v1889_v33, %s5285_s6 }
 0x4a6   :  { %v7167_v29 = vpop.permute.xlu0 %2584 }
 0x4a7   :  { %8987 = vst [vmem:[#allocation115_spill] sm:$0xff] %v7167_v29  ;;  %2310 = vrot.lane.b32.xlu0 %v2223_v30, %s5287_s8 }
 0x4a9   :  { %2602 = vrot.lane.b32.xlu1 %v2529_v25, %s5286_s2  ;;  %v2212_v25 = vmul.f32 %v8994_v12, %v6995_v28 }
 0x4aa   :  { %v7181_v47 = vpop.permute.xlu1 %2501  ;;  %v7183_v33 = vpop.permute.xlu0 %2270 }
 0x4ab   :  { %8991 = vst [vmem:[#allocation117_spill] sm:$0xff] %v7183_v33  ;;  %2306 = vrot.lane.b32.xlu0 %v2221_v8, %s5287_s8  ;;  %v7201_v8 = vadd.f32 %v6797_v14, %v1176_v42  ;;  %v8999_v42 = vld [vmem:[#allocation93_spill] sm:$0xff] }
 0x4ad   :  { %2292 = vrot.lane.b32.xlu1 %v2214_v4, %s5287_s8  ;;  %8995 = vst [vmem:[#allocation91_spill] sm:$0xff] %v7201_v8  ;;  %v8997_v4 = vld [vmem:[#allocation92_spill] sm:$0xff] }
 0x4ae   :  { %v7191_v30 = vpop.permute.xlu0 %2266  ;;  %v1895_v33 = vmul.f32 %v8997_v4, %v7021_v62  ;;  %v2544_v4 = vmul.f32 %v6954_v60, %v7201_v8 }
 0x4af   :  { %8993 = vst [vmem:[#allocation88_spill] sm:$0xff] %v7191_v30  ;;  %v7195_v29 = vpop.permute.xlu1 %1853  ;;  %1996 = vrot.lane.b32.xlu0 %v1906_v15, %s5285_s6  ;;  %v1904_v15 = vmul.f32 %v6945_v11, %v7201_v8  ;;  %v2535_v30 = vmul.f32 %v8999_v42, %v7021_v62  ;;  %v9002_v11 = vld [vmem:[#allocation94_spill] sm:$0xff] }
 0x4b1   :  { %2288 = vrot.lane.b32.xlu1 %v2212_v25, %s5287_s8  ;;  %v4839_v25 = vpop.f32.mrf.mxu0 }
 0x4b2   :  { %v7204_v40 = vpop.permute.xlu0 %1956 }
 0x4b3   :  { %8996 = vst [vmem:[#allocation118_spill] sm:$0xff] %v7204_v40  ;;  %2636 = vrot.lane.b32.xlu0 %v2546_v27, %s5286_s2  ;;  %v1179_v41 = vpop.f32.mrf.mxu0 }
 0x4b4   :  { %v7209_v12 = vpop.permute.xlu1 %2493 }
 0x4b5   :  { %1974 = vrot.lane.b32.xlu1 %v1895_v33, %s5285_s6  ;;  %v1893_v33 = vmul.f32 %v9002_v11, %v7034_v2  ;;  %v4842_v42 = vpop.f32.mrf.mxu0  ;;  %v7242_v11 = vadd.f32 %v6797_v14, %v1179_v41 }
 0x4b6   :  { %v7214_v32 = vpop.permute.xlu0 %2596 }
 0x4b7   :  { %8998 = vst [vmem:[#allocation92_spill] sm:$0xff] %v7214_v32  ;;  %1992 = vrot.lane.b32.xlu0 %v1904_v15, %s5285_s6  ;;  %v7229_v32 = vadd.f32 %v4839_v25, %v6797_v14  ;;  %v2225_v25 = vmul.f32 %v7010_v59, %v7242_v11  ;;  %v1192_v59 = vpop.f32.mrf.mxu0 }
 0x4b9   :  { %v7221_v40 = vpop.permute.xlu1 %1712  ;;  %2614 = vrot.lane.b32.xlu1 %v2535_v30, %s5286_s2  ;;  %9003 = vst [vmem:[#allocation94_spill] sm:$0xff] %v7229_v32  ;;  %v2227_v15 = vmul.f32 %v6984_v6, %v7229_v32  ;;  %v7248_v6 = vadd.f32 %v4842_v42, %v6797_v14  ;;  %v9012_v42 = vld [vmem:[#allocation3_spill] sm:$0xff] }
 0x4ba   :  { %9000 = vst [vmem:[#allocation93_spill] sm:$0xff] %v7221_v40  ;;  %v7224_v27 = vpop.permute.xlu0 %1952  ;;  %v9005_v40 = vld [vmem:[#allocation96_spill] sm:$0xff] }
 0x4bb   :  { %9001 = vst [vmem:[#allocation119_spill] sm:$0xff] %v7224_v27  ;;  %2632 = vrot.lane.b32.xlu0 %v2544_v4, %s5286_s2  ;;  %v2533_v27 = vmul.f32 %v9005_v40, %v7034_v2  ;;  %9006 = vst [vmem:[#allocation96_spill] sm:$0xff] %v7242_v11  ;;  %v1910_v41 = vmul.f32 %v7025_v22, %v7248_v6  ;;  %v7273_v22 = vadd.f32 %v6797_v14, %v1192_v59 }
 0x4bc   :  { %9007 = vst [vmem:[#allocation121_spill] sm:$0xff] %v7248_v6 }
 0x4bd   :  { %1970 = vrot.lane.b32.xlu1 %v1893_v33, %s5285_s6  ;;  %v2218_v33 = vmul.f32 %v6907_v51, %v7044_v26  ;;  %v9011_v51 = vld [vmem:[#allocation32_spill] sm:$0xff] }
 0x4be   :  { %v7235_v60 = vpop.permute.xlu1 %2193  ;;  %v7237_v30 = vpop.permute.xlu0 %2592  ;;  %9013 = vst [vmem:[#allocation32_spill] sm:$0xff] %v7273_v22 }
 0x4bf   :  { %9004 = vst [vmem:[#allocation120_spill] sm:$0xff] %v7237_v30  ;;  %2318 = vrot.lane.b32.xlu0 %v2227_v15, %s5287_s8 }
 0x4c1   :  { %2610 = vrot.lane.b32.xlu1 %v2533_v27, %s5286_s2  ;;  %v2216_v27 = vmul.f32 %v6929_v57, %v7063_v56  ;;  %v1899_v57 = vmul.f32 %v6943_v1, %v7089_v5  ;;  %v4843_v1 = vpop.f32.mrf.mxu0 }
 0x4c2   :  { %v7251_v4 = vpop.permute.xlu0 %2278 }
 0x4c3   :  { %9008 = vst [vmem:[#allocation122_spill] sm:$0xff] %v7251_v4  ;;  %v7255_v30 = vpop.permute.xlu1 %1702  ;;  %2314 = vrot.lane.b32.xlu0 %v2225_v25, %s5287_s8  ;;  %v2550_v25 = vmul.f32 %v7039_v19, %v7248_v6  ;;  %v9016_v4 = vld [vmem:[#allocation2_spill] sm:$0xff] }
 0x4c4   :  { %9009 = vst [vmem:[#allocation123_spill] sm:$0xff] %v7255_v30  ;;  %v2825_v30 = vsub.f32 %v9012_v42, %v9011_v51  ;;  %v1908_v51 = vmul.f32 %v7054_v52, %v7273_v22  ;;  %v2548_v52 = vmul.f32 %v7068_v61, %v7273_v22 }
 0x4c5   :  { %2300 = vrot.lane.b32.xlu1 %v2218_v33, %s5287_s8 }
 0x4c6   :  { %v7261_v40 = vpop.permute.xlu0 %2274  ;;  %v2873_v26 = vmul.f32 1.442695, %v2825_v30 }
 0x4c7   :  { %9010 = vst [vmem:[#allocation124_spill] sm:$0xff] %v7261_v40  ;;  %2004 = vrot.lane.b32.xlu0 %v1910_v41, %s5285_s6  ;;  %v9015_v41 = vld [vmem:[#allocation31_spill] sm:$0xff] }
 0x4c8   :  { %v7266_v15 = vpop.permute.xlu1 %2185  ;;  %v2827_v40 = vsub.f32 %v9016_v4, %v9015_v41  ;;  %5183 = vpow2.f32 %v2873_v26  ;;  %v9020_v4 = vld [vmem:[#allocation7_spill] sm:$0xff]  ;;  %v1195_v26 = vpop.f32.mrf.mxu0 }
 0x4c9   :  { %2296 = vrot.lane.b32.xlu1 %v2216_v27, %s5287_s8  ;;  %v9018_v27 = vld [vmem:[#allocation100_spill] sm:$0xff] }
 0x4ca   :  { %v7276_v33 = vpop.permute.xlu0 %1964  ;;  %v2539_v42 = vmul.f32 %v9018_v27, %v7089_v5  ;;  %v1897_v27 = vmul.f32 %v6967_v21, %v7102_v37  ;;  %v2537_v21 = vmul.f32 %v6982_v13, %v7102_v37 }
 0x4cb   :  { %9014 = vst [vmem:[#allocation3_spill] sm:$0xff] %v7276_v33  ;;  %2644 = vrot.lane.b32.xlu0 %v2550_v25, %s5286_s2  ;;  %v2877_v25 = vmul.f32 1.442695, %v2827_v40  ;;  %v9019_v33 = vld [vmem:[#allocation37_spill] sm:$0xff]  ;;  %v9023_v40 = vld [vmem:[#allocation36_spill] sm:$0xff] }
 0x4cc   :  { %v2829_v30 = vsub.f32 %v9020_v4, %v9019_v33  ;;  %v9024_v33 = vld [vmem:[#allocation6_spill] sm:$0xff] }
 0x4cd   :  { %v7285_v19 = vpop.permute.xlu1 %1877  ;;  %1982 = vrot.lane.b32.xlu1 %v1899_v57, %s5285_s6  ;;  %5185 = vpow2.f32 %v2877_v25  ;;  %v2831_v4 = vsub.f32 %v9024_v33, %v9023_v40  ;;  %v9028_v40 = vld [vmem:[#allocation11_spill] sm:$0xff] }
 0x4ce   :  { %v7288_v59 = vpop.permute.xlu0 %2604  ;;  %v2881_v61 = vmul.f32 1.442695, %v2829_v30  ;;  %v9027_v30 = vld [vmem:[#allocation42_spill] sm:$0xff] }
 0x4cf   :  { %9017 = vst [vmem:[#allocation31_spill] sm:$0xff] %v7288_v59  ;;  %2000 = vrot.lane.b32.xlu0 %v1908_v51, %s5285_s6  ;;  %v7305_v51 = vadd.f32 %v4843_v1, %v6797_v14  ;;  %v7318_v1 = vadd.f32 %v6797_v14, %v1195_v26  ;;  %v2885_v25 = vmul.f32 1.442695, %v2831_v4  ;;  %v2833_v33 = vsub.f32 %v9028_v40, %v9027_v30  ;;  %v9030_v26 = vld [vmem:[#allocation41_spill] sm:$0xff]  ;;  %v9031_v4 = vld [vmem:[#allocation10_spill] sm:$0xff] }
 0x4d0   :  { %5187 = vpow2.f32 %v2881_v61  ;;  %v2222_v14 = vmul.f32 %v7008_v43, %v7108_v18  ;;  %v2835_v61 = vsub.f32 %v9031_v4, %v9030_v26  ;;  %v1903_v4 = vmul.f32 %v7052_v3, %v7159_v38 }
 0x4d1   :  { %2622 = vrot.lane.b32.xlu1 %v2539_v42, %s5286_s2  ;;  %9022 = vst [vmem:[#allocation100_spill] sm:$0xff] %v7305_v51  ;;  %v2231_v42 = vmul.f32 %v7094_v46, %v7305_v51  ;;  %9026 = vst [vmem:[#allocation7_spill] sm:$0xff] %v7318_v1  ;;  %v2229_v46 = vmul.f32 %v7123_v7, %v7318_v1  ;;  %5189 = vpow2.f32 %v2885_v25  ;;  %v9034_v25 = vld [vmem:[#allocation47_spill] sm:$0xff] }
 0x4d2   :  { %v7298_v41 = vpop.permute.xlu1 %2517  ;;  %v7300_v57 = vpop.permute.xlu0 %1960  ;;  %v2893_v40 = vmul.f32 1.442695, %v2835_v61  ;;  %v9038_v61 = vld [vmem:[#allocation45_spill] sm:$0xff] }
 0x4d3   :  { %9021 = vst [vmem:[#allocation2_spill] sm:$0xff] %v7300_v57  ;;  %2640 = vrot.lane.b32.xlu0 %v2548_v52, %s5286_s2 }
 0x4d5   :  { %1978 = vrot.lane.b32.xlu1 %v1897_v27, %s5285_s6  ;;  %v7338_v30 = vpop.eup %5183 }
 0x4d6   :  { %v7313_v59 = vpop.permute.xlu0 %2600 }
 0x4d7   :  { %9025 = vst [vmem:[#allocation37_spill] sm:$0xff] %v7313_v59  ;;  %v7320_v52 = vpop.permute.xlu1 %1869  ;;  %2326 = vrot.lane.b32.xlu0 %v2231_v42, %s5287_s8  ;;  %v2889_v42 = vmul.f32 1.442695, %v2833_v33 }
 0x4d9   :  { %2618 = vrot.lane.b32.xlu1 %v2537_v21, %s5286_s2  ;;  %v2220_v21 = vmul.f32 %v7037_v48, %v7131_v49  ;;  %5191 = vpow2.f32 %v2889_v42  ;;  %v9039_v42 = vld [vmem:[#allocation14_spill] sm:$0xff] }
 0x4da   :  { %v7328_v27 = vpop.permute.xlu0 %2286  ;;  %v7351_v33 = vpop.eup %5185  ;;  %5193 = vpow2.f32 %v2893_v40 }
 0x4db   :  { %9029 = vst [vmem:[#allocation36_spill] sm:$0xff] %v7328_v27  ;;  %2322 = vrot.lane.b32.xlu0 %v2229_v46, %s5287_s8  ;;  %v9035_v46 = vld [vmem:[#allocation15_spill] sm:$0xff]  ;;  %v2839_v27 = vsub.f32 %v9039_v42, %v9038_v61 }
 0x4dc   :  { %v7333_v13 = vpop.permute.xlu1 %2509  ;;  %v2837_v26 = vsub.f32 %v9035_v46, %v9034_v25  ;;  %v2543_v46 = vmul.f32 %v7066_v39, %v7159_v38 }
 0x4dd   :  { %2308 = vrot.lane.b32.xlu1 %v2222_v14, %s5287_s8 }
 0x4de   :  { %v7340_v7 = vpop.permute.xlu0 %2282  ;;  %v2897_v59 = vmul.f32 1.442695, %v2837_v26 }
 0x4df   :  { %9032 = vst [vmem:[#allocation6_spill] sm:$0xff] %v7340_v7  ;;  %2969 = vrot.lane.b32.xlu0 %v7338_v30, %s5281_s3 }
 0x4e0   :  { %v7346_v43 = vpop.permute.xlu1 %2268  ;;  %5195 = vpow2.f32 %v2897_v59 }
 0x4e1   :  { %9033 = vst [vmem:[#allocation42_spill] sm:$0xff] %v7346_v43  ;;  %2304 = vrot.lane.b32.xlu1 %v2220_v21, %s5287_s8  ;;  %v7364_v21 = vpop.eup %5187 }
 0x4e2   :  { %v7353_v14 = vpop.permute.xlu0 %1972  ;;  %v7375_v40 = vpop.eup %5189 }
 0x4e3   :  { %9036 = vst [vmem:[#allocation11_spill] sm:$0xff] %v7353_v14  ;;  %2973 = vrot.lane.b32.xlu0 %v7351_v33, %s5281_s3  ;;  %v2901_v14 = vmul.f32 1.442695, %v2839_v27  ;;  %v2541_v27 = vmul.f32 %v7092_v31, %v7172_v0 }
 0x4e4   :  { %v7359_v48 = vpop.permute.xlu1 %2264 }
 0x4e5   :  { %9037 = vst [vmem:[#allocation41_spill] sm:$0xff] %v7359_v48  ;;  %1990 = vrot.lane.b32.xlu1 %v1903_v4, %s5285_s6  ;;  %v1901_v4 = vmul.f32 %v7078_v23, %v7172_v0  ;;  %5197 = vpow2.f32 %v2901_v14  ;;  %v2226_v14 = vmul.f32 %v7121_v20, %v7178_v24  ;;  %v9159_v24 = vld [vmem:[#allocation29_spill] sm:$0xff] }
 0x4e6   :  { %v7366_v25 = vpop.permute.xlu0 %2612  ;;  %v7386_v61 = vpop.eup %5191 }
 0x4e7   :  { %9040 = vst [vmem:[#allocation10_spill] sm:$0xff] %v7366_v25  ;;  %2977 = vrot.lane.b32.xlu0 %v7364_v21, %s5281_s3  ;;  %v7397_v23 = vpop.eup %5193 }
 0x4e8   :  { %v7372_v3 = vpop.permute.xlu1 %1950 }
 0x4e9   :  { %9041 = vst [vmem:[#allocation47_spill] sm:$0xff] %v7372_v3  ;;  %2630 = vrot.lane.b32.xlu1 %v2543_v46, %s5286_s2 }
 0x4ea   :  { %v7377_v26 = vpop.permute.xlu0 %1968 }
 0x4eb   :  { %9042 = vst [vmem:[#allocation15_spill] sm:$0xff] %v7377_v26  ;;  %2981 = vrot.lane.b32.xlu0 %v7375_v40, %s5281_s3  ;;  %v2547_v26 = vmul.f32 %v7181_v47, %v7229_v32 }
 0x4ec   :  { %v7383_v39 = vpop.permute.xlu1 %2590 }
 0x4ed   :  { %9043 = vst [vmem:[#allocation45_spill] sm:$0xff] %v7383_v39  ;;  %1986 = vrot.lane.b32.xlu1 %v1901_v4, %s5285_s6  ;;  %v7408_v31 = vpop.eup %5195 }
 0x4ee   :  { %v7388_v59 = vpop.permute.xlu0 %2608 }
 0x4ef   :  { %9044 = vst [vmem:[#allocation14_spill] sm:$0xff] %v7388_v59  ;;  %2985 = vrot.lane.b32.xlu0 %v7386_v61, %s5281_s3 }
 0x4f0   :  { %v7394_v42 = vpop.permute.xlu1 %1946 }
 0x4f1   :  { %9045 = vst [vmem:[#allocation125_spill] sm:$0xff] %v7394_v42  ;;  %2626 = vrot.lane.b32.xlu1 %v2541_v27, %s5286_s2  ;;  %v2224_v27 = vmul.f32 %v7149_v44, %v7201_v8 }
 0x4f2   :  { %v7399_v46 = vpop.permute.xlu0 %2294  ;;  %v7419_v20 = vpop.eup %5197 }
 0x4f3   :  { %9046 = vst [vmem:[#allocation126_spill] sm:$0xff] %v7399_v46  ;;  %2989 = vrot.lane.b32.xlu0 %v7397_v23, %s5281_s3 }
 0x4f4   :  { %v7405_v4 = vpop.permute.xlu1 %2586 }
 0x4f5   :  { %9047 = vst [vmem:[#allocation127_spill] sm:$0xff] %v7405_v4  ;;  %2316 = vrot.lane.b32.xlu1 %v2226_v14, %s5287_s8  ;;  %v1907_v14 = vmul.f32 %v7164_v34, %v7229_v32  ;;  %v1905_v34 = vmul.f32 %v7195_v29, %v7242_v11 }
 0x4f6   :  { %v7410_v25 = vpop.permute.xlu0 %2290 }
 0x4f7   :  { %9048 = vst [vmem:[#allocation128_spill] sm:$0xff] %v7410_v25  ;;  %2993 = vrot.lane.b32.xlu0 %v7408_v31, %s5281_s3 }
 0x4f8   :  { %v7416_v46 = vpop.permute.xlu1 %2276 }
 0x4f9   :  { %9049 = vst [vmem:[#allocation129_spill] sm:$0xff] %v7416_v46  ;;  %2312 = vrot.lane.b32.xlu1 %v2224_v27, %s5287_s8 }
 0x4fa   :  { %v7421_v59 = vpop.permute.xlu0 %1980 }
 0x4fb   :  { %9050 = vst [vmem:[#allocation130_spill] sm:$0xff] %v7421_v59  ;;  %2997 = vrot.lane.b32.xlu0 %v7419_v20, %s5281_s3 }
 0x4fc   :  { %v7427_v25 = vpop.permute.xlu1 %2272 }
 0x4fd   :  { %9051 = vst [vmem:[#allocation131_spill] sm:$0xff] %v7427_v25  ;;  %1998 = vrot.lane.b32.xlu1 %v1907_v14, %s5285_s6  ;;  %v2545_v14 = vmul.f32 %v7209_v12, %v7242_v11  ;;  %v2228_v12 = vmul.f32 %v7266_v15, %v7273_v22 }
 0x4fe   :  { %v7430_v44 = vpop.permute.xlu0 %2620 }
 0x4ff   :  { %9052 = vst [vmem:[#allocation132_spill] sm:$0xff] %v7430_v44 }
 0x500   :  { %v7434_v27 = vpop.permute.xlu1 %1958 }
 0x501   :  { %9053 = vst [vmem:[#allocation133_spill] sm:$0xff] %v7434_v27  ;;  %2638 = vrot.lane.b32.xlu1 %v2547_v26, %s5286_s2  ;;  %v2230_v26 = vmul.f32 %v7235_v60, %v7248_v6  ;;  %v9066_v60 = vld [vmem:[#allocation4_spill] sm:$0xff] }
 0x502   :  { %v7437_v59 = vpop.permute.xlu0 %1976 }
 0x503   :  { %9054 = vst [vmem:[#allocation134_spill] sm:$0xff] %v7437_v59 }
 0x504   :  { %v7441_v7 = vpop.permute.xlu1 %2598 }
 0x505   :  { %9055 = vst [vmem:[#allocation135_spill] sm:$0xff] %v7441_v7  ;;  %1994 = vrot.lane.b32.xlu1 %v1905_v34, %s5285_s6  ;;  %v9061_v34 = vld [vmem:[#allocation34_spill] sm:$0xff] }
 0x506   :  { %v7444_v57 = vpop.permute.xlu0 %2616 }
 0x507   :  { %9056 = vst [vmem:[#allocation136_spill] sm:$0xff] %v7444_v57  ;;  %v9062_v57 = vld [vmem:[#allocation5_spill] sm:$0xff] }
 0x508   :  { %v7448_v44 = vpop.permute.xlu1 %1954  ;;  %v2826_v7 = vsub.f32 %v9062_v57, %v9061_v34  ;;  %v9069_v34 = vld [vmem:[#allocation40_spill] sm:$0xff] }
 0x509   :  { %9057 = vst [vmem:[#allocation137_spill] sm:$0xff] %v7448_v44  ;;  %2634 = vrot.lane.b32.xlu1 %v2545_v14, %s5286_s2  ;;  %v9132_v44 = vld [vmem:[#allocation59_spill] sm:$0xff] }
 0x50a   :  { %v7451_v47 = vpop.permute.xlu0 %2302 }
 0x50b   :  { %9058 = vst [vmem:[#allocation138_spill] sm:$0xff] %v7451_v47  ;;  %v9065_v47 = vld [vmem:[#allocation33_spill] sm:$0xff] }
 0x50c   :  { %v7455_v59 = vpop.permute.xlu1 %2594  ;;  %v2828_v27 = vsub.f32 %v9066_v60, %v9065_v47  ;;  %v9074_v60 = vld [vmem:[#allocation38_spill] sm:$0xff] }
 0x50d   :  { %9059 = vst [vmem:[#allocation139_spill] sm:$0xff] %v7455_v59  ;;  %2324 = vrot.lane.b32.xlu1 %v2230_v26, %s5287_s8  ;;  %v2875_v59 = vmul.f32 1.442695, %v2826_v7  ;;  %v1911_v26 = vmul.f32 %v7285_v19, %v7305_v51  ;;  %v9072_v7 = vld [vmem:[#allocation51_spill] sm:$0xff] }
 0x50e   :  { %v7458_v29 = vpop.permute.xlu0 %2298  ;;  %v2879_v15 = vmul.f32 1.442695, %v2828_v27  ;;  %v3033_v19 = vsel %vm1207_vm2, %v9072_v7, 0.0  ;;  %v9075_v27 = vld [vmem:[#allocation8_spill] sm:$0xff] }
 0x50f   :  { %9060 = vst [vmem:[#allocation140_spill] sm:$0xff] %v7458_v29  ;;  %5199 = vpow2.f32 %v2875_v59  ;;  %v2832_v59 = vsub.f32 %v9075_v27, %v9074_v60 }
 0x510   :  { %v7464_v46 = vpop.permute.xlu1 %2284  ;;  %5201 = vpow2.f32 %v2879_v15  ;;  %v9079_v15 = vld [vmem:[#allocation44_spill] sm:$0xff] }
 0x511   :  { %9063 = vst [vmem:[#allocation34_spill] sm:$0xff] %v7464_v46  ;;  %2320 = vrot.lane.b32.xlu1 %v2228_v12, %s5287_s8  ;;  %v9070_v46 = vld [vmem:[#allocation9_spill] sm:$0xff] }
 0x512   :  { %v7467_v14 = vpop.permute.xlu0 %1988  ;;  %v2830_v12 = vsub.f32 %v9070_v46, %v9069_v34  ;;  %v1909_v46 = vmul.f32 %v7320_v52, %v7318_v1  ;;  %v9082_v52 = vld [vmem:[#allocation52_spill] sm:$0xff] }
 0x513   :  { %9064 = vst [vmem:[#allocation5_spill] sm:$0xff] %v7467_v14  ;;  %v2551_v14 = vmul.f32 %v7298_v41, %v7305_v51  ;;  %v9077_v41 = vld [vmem:[#allocation50_spill] sm:$0xff]  ;;  %v3042_v27 = vsel %vm1207_vm2, %v9082_v52, 0.0 }
 0x514   :  { %v7473_v29 = vpop.permute.xlu1 %2280 }
 0x515   :  { %9067 = vst [vmem:[#allocation33_spill] sm:$0xff] %v7473_v29  ;;  %2006 = vrot.lane.b32.xlu1 %v1911_v26, %s5285_s6  ;;  %v2883_v26 = vmul.f32 1.442695, %v2830_v12  ;;  %v2549_v12 = vmul.f32 %v7333_v13, %v7318_v1  ;;  %v9087_v13 = vld [vmem:[#allocation57_spill] sm:$0xff] }
 0x516   :  { %v7476_v57 = vpop.permute.xlu0 %2628 }
 0x517   :  { %9068 = vst [vmem:[#allocation4_spill] sm:$0xff] %v7476_v57  ;;  %5203 = vpow2.f32 %v2883_v26  ;;  %v9080_v57 = vld [vmem:[#allocation13_spill] sm:$0xff] }
 0x518   :  { %v7482_v25 = vpop.permute.xlu1 %1966 }
 0x519   :  { %9071 = vst [vmem:[#allocation40_spill] sm:$0xff] %v7482_v25  ;;  %2646 = vrot.lane.b32.xlu1 %v2551_v14, %s5286_s2  ;;  %v3039_v14 = vsel %vm1207_vm2, %v9077_v41, 0.0  ;;  %v9084_v41 = vld [vmem:[#allocation43_spill] sm:$0xff] }
 0x51a   :  { %3034 = vadd.xlane.f32.xlu0 %v3033_v19  ;;  %v7487_v47 = vpop.permute.xlu0 %1984  ;;  %v2887_v19 = vmul.f32 1.442695, %v2832_v59  ;;  %v9085_v59 = vld [vmem:[#allocation12_spill] sm:$0xff] }
 0x51b   :  { %9073 = vst [vmem:[#allocation9_spill] sm:$0xff] %v7487_v47  ;;  %v2834_v47 = vsub.f32 %v9080_v57, %v9079_v15  ;;  %v2836_v26 = vsub.f32 %v9085_v59, %v9084_v41  ;;  %v3048_v15 = vsel %vm1207_vm2, %v9087_v13, 0.0  ;;  %v9092_v59 = vld [vmem:[#allocation56_spill] sm:$0xff] }
 0x51c   :  { %v7493_v34 = vpop.permute.xlu1 %2606  ;;  %5205 = vpow2.f32 %v2887_v19  ;;  %v9089_v19 = vld [vmem:[#allocation49_spill] sm:$0xff] }
 0x51d   :  { %9076 = vst [vmem:[#allocation51_spill] sm:$0xff] %v7493_v34  ;;  %2002 = vrot.lane.b32.xlu1 %v1909_v46, %s5285_s6  ;;  %v2895_v52 = vmul.f32 1.442695, %v2836_v26  ;;  %v3054_v34 = vsel %vm1207_vm2, %v9092_v59, 0.0  ;;  %v9095_v26 = vld [vmem:[#allocation16_spill] sm:$0xff] }
 0x51e   :  { %3040 = vadd.xlane.f32.xlu0 %v3039_v14  ;;  %v7498_v7 = vpop.permute.xlu0 %2624  ;;  %v2891_v14 = vmul.f32 1.442695, %v2834_v47 }
 0x51f   :  { %9078 = vst [vmem:[#allocation38_spill] sm:$0xff] %v7498_v7  ;;  %v7513_v7 = vpop.eup %5199 }
 0x520   :  { %v7504_v60 = vpop.permute.xlu1 %1962  ;;  %5207 = vpow2.f32 %v2891_v14  ;;  %v7525_v41 = vpop.eup %5201 }
 0x521   :  { %9081 = vst [vmem:[#allocation8_spill] sm:$0xff] %v7504_v60  ;;  %2642 = vrot.lane.b32.xlu1 %v2549_v12, %s5286_s2  ;;  %5209 = vpow2.f32 %v2895_v52 }
 0x522   :  { %3043 = vadd.xlane.f32.xlu0 %v3042_v27  ;;  %v7509_v46 = vpop.permute.xlu0 %2310  ;;  %v9090_v27 = vld [vmem:[#allocation17_spill] sm:$0xff] }
 0x523   :  { %9083 = vst [vmem:[#allocation50_spill] sm:$0xff] %v7509_v46  ;;  %v2838_v46 = vsub.f32 %v9090_v27, %v9089_v19  ;;  %v9097_v27 = vld [vmem:[#allocation61_spill] sm:$0xff] }
 0x524   :  { %v7515_v57 = vpop.permute.xlu1 %2602 }
 0x525   :  { %9086 = vst [vmem:[#allocation44_spill] sm:$0xff] %v7515_v57  ;;  %2971 = vrot.lane.b32.xlu1 %v7513_v7, %s5281_s3  ;;  %v7537_v57 = vpop.eup %5203 }
 0x526   :  { %3049 = vadd.xlane.f32.xlu0 %v3048_v15  ;;  %v7521_v12 = vpop.permute.xlu0 %2306  ;;  %v9094_v15 = vld [vmem:[#allocation48_spill] sm:$0xff] }
 0x527   :  { %9088 = vst [vmem:[#allocation13_spill] sm:$0xff] %v7521_v12  ;;  %v2840_v14 = vsub.f32 %v9095_v26, %v9094_v15  ;;  %v2899_v12 = vmul.f32 1.442695, %v2838_v46  ;;  %v9100_v46 = vld [vmem:[#allocation60_spill] sm:$0xff] }
 0x528   :  { %v7527_v47 = vpop.permute.xlu1 %2292  ;;  %v3066_v15 = vsel %vm1207_vm2, %v9100_v46, 0.0 }
 0x529   :  { %9091 = vst [vmem:[#allocation52_spill] sm:$0xff] %v7527_v47  ;;  %2975 = vrot.lane.b32.xlu1 %v7525_v41, %s5281_s3  ;;  %v3060_v47 = vsel %vm1207_vm2, %v9097_v27, 0.0  ;;  %5211 = vpow2.f32 %v2899_v12  ;;  %v7547_v52 = vpop.eup %5205  ;;  %v5288_v27 = vmov 4  }
 0x52a   :  { %3055 = vadd.xlane.f32.xlu0 %v3054_v34  ;;  %v7533_v13 = vpop.permute.xlu0 %1996  ;;  %v2903_v34 = vmul.f32 1.442695, %v2840_v14  ;;  %4983 = vset.pattern.permute.xlu1 %v5288_v27  ;;  %v9103_v14 = vld [vmem:[#allocation65_spill] sm:$0xff] }
 0x52b   :  { %9093 = vst [vmem:[#allocation43_spill] sm:$0xff] %v7533_v13  ;;  %4984 = vset.pattern.permute.xlu0 %v5288_v27 }
 0x52c   :  { %v7539_v19 = vpop.permute.xlu1 %2288  ;;  %5213 = vpow2.f32 %v2903_v34 }
 0x52d   :  { %9096 = vst [vmem:[#allocation12_spill] sm:$0xff] %v7539_v19  ;;  %2979 = vrot.lane.b32.xlu1 %v7537_v57, %s5281_s3 }
 0x52e   :  { %3061 = vadd.xlane.f32.xlu0 %v3060_v47  ;;  %v7545_v59 = vpop.permute.xlu0 %2636  ;;  %v7557_v47 = vpop.eup %5207 }
 0x52f   :  { %9098 = vst [vmem:[#allocation57_spill] sm:$0xff] %v7545_v59  ;;  %v3072_v59 = vsel %vm1207_vm2, %v9103_v14, 0.0 }
 0x530   :  { %v7549_v13 = vpop.permute.xlu1 %1974 }
 0x531   :  { %9099 = vst [vmem:[#allocation49_spill] sm:$0xff] %v7549_v13  ;;  %2983 = vrot.lane.b32.xlu1 %v7547_v52, %s5281_s3  ;;  %v7565_v13 = vpop.eup %5209 }
 0x532   :  { %3067 = vadd.xlane.f32.xlu0 %v3066_v15  ;;  %v7555_v26 = vpop.permute.xlu0 %1992  ;;  %v9106_v15 = vld [vmem:[#allocation64_spill] sm:$0xff] }
 0x533   :  { %9101 = vst [vmem:[#allocation17_spill] sm:$0xff] %v7555_v26  ;;  %v3078_v27 = vsel %vm1207_vm2, %v9106_v15, 0.0 }
 0x534   :  { %v7559_v12 = vpop.permute.xlu1 %2614 }
 0x535   :  { %9102 = vst [vmem:[#allocation56_spill] sm:$0xff] %v7559_v12  ;;  %2987 = vrot.lane.b32.xlu1 %v7557_v47, %s5281_s3 }
 0x536   :  { %3073 = vadd.xlane.f32.xlu0 %v3072_v59  ;;  %v7569_v34 = vpop.permute.xlu0 %2632  ;;  %v7575_v26 = vpop.eup %5211 }
 0x537   :  { %9105 = vst [vmem:[#allocation16_spill] sm:$0xff] %v7569_v34 }
 0x538   :  { %v7567_v46 = vpop.permute.xlu1 %1970 }
 0x539   :  { %9104 = vst [vmem:[#allocation48_spill] sm:$0xff] %v7567_v46  ;;  %2991 = vrot.lane.b32.xlu1 %v7565_v13, %s5281_s3  ;;  %v7583_v14 = vpop.eup %5213 }
 0x53a   :  { %3079 = vadd.xlane.f32.xlu0 %v3078_v27  ;;  %v7581_v59 = vpop.permute.xlu0 %2318 }
 0x53b   :  { %9108 = vst [vmem:[#allocation60_spill] sm:$0xff] %v7581_v59 }
 0x53c   :  { %v7577_v12 = vpop.permute.xlu1 %2610 }
 0x53d   :  { %9107 = vst [vmem:[#allocation61_spill] sm:$0xff] %v7577_v12  ;;  %2995 = vrot.lane.b32.xlu1 %v7575_v26, %s5281_s3 }
 0x53e   :  { %v7591_v15 = vpop.permute.xlu0 %2314 }
 0x53f   :  { %9111 = vst [vmem:[#allocation141_spill] sm:$0xff] %v7591_v15 }
 0x540   :  { %v7585_v19 = vpop.permute.xlu1 %2300 }
 0x541   :  { %9109 = vst [vmem:[#allocation65_spill] sm:$0xff] %v7585_v19  ;;  %2999 = vrot.lane.b32.xlu1 %v7583_v14, %s5281_s3 }
 0x542   :  { %v7595_v46 = vpop.permute.xlu0 %2004 }
 0x543   :  { %9113 = vst [vmem:[#allocation143_spill] sm:$0xff] %v7595_v46 }
 0x544   :  { %v7589_v34 = vpop.permute.xlu1 %2296 }
 0x545   :  { %9110 = vst [vmem:[#allocation64_spill] sm:$0xff] %v7589_v34 }
 0x546   :  { %v7601_v59 = vpop.permute.xlu0 %2644 }
 0x547   :  { %9116 = vst [vmem:[#allocation146_spill] sm:$0xff] %v7601_v59 }
 0x548   :  { %v7593_v27 = vpop.permute.xlu1 %1982 }
 0x549   :  { %9112 = vst [vmem:[#allocation142_spill] sm:$0xff] %v7593_v27 }
 0x54a   :  { %v7605_v19 = vpop.permute.xlu0 %2000 }
 0x54b   :  { %9118 = vst [vmem:[#allocation148_spill] sm:$0xff] %v7605_v19 }
 0x54c   :  { %v7597_v12 = vpop.permute.xlu1 %2622 }
 0x54d   :  { %9114 = vst [vmem:[#allocation144_spill] sm:$0xff] %v7597_v12  ;;  %v9125_v12 = vld [vmem:[#allocation53_spill] sm:$0xff] }
 0x54e   :  { %v7611_v34 = vpop.permute.xlu0 %2640 }
 0x54f   :  { %9121 = vst [vmem:[#allocation151_spill] sm:$0xff] %v7611_v34  ;;  %v9130_v34 = vld [vmem:[#allocation54_spill] sm:$0xff] }
 0x550   :  { %v7599_v25 = vpop.permute.xlu1 %1978 }
 0x551   :  { %9115 = vst [vmem:[#allocation145_spill] sm:$0xff] %v7599_v25  ;;  %v3036_v25 = vsel %vm1207_vm2, %v9125_v12, 0.0 }
 0x552   :  { %v7615_v27 = vpop.permute.xlu0 %2326 }
 0x553   :  { %9123 = vst [vmem:[#allocation153_spill] sm:$0xff] %v7615_v27 }
 0x554   :  { %v7603_v29 = vpop.permute.xlu1 %2618 }
 0x555   :  { %9117 = vst [vmem:[#allocation147_spill] sm:$0xff] %v7603_v29  ;;  %v9127_v29 = vld [vmem:[#allocation55_spill] sm:$0xff] }
 0x556   :  { %v3045_v19 = vsel %vm1207_vm2, %v9127_v29, 0.0 }
 0x558   :  { %v7607_v60 = vpop.permute.xlu1 %2308 }
 0x559   :  { %9119 = vst [vmem:[#allocation149_spill] sm:$0xff] %v7607_v60  ;;  %v7625_v60 = vpop.permute.xlu0 %2322 }
 0x55a   :  { %9128 = vst [vmem:[#allocation55_spill] sm:$0xff] %v7625_v60 }
 0x55c   :  { %v7609_v39 = vpop.permute.xlu1 %2304 }
 0x55d   :  { %9120 = vst [vmem:[#allocation150_spill] sm:$0xff] %v7609_v39  ;;  %v2970_v27 = vpop.permute.xlu0 %2969 }
 0x560   :  { %v7613_v15 = vpop.permute.xlu1 %1990 }
 0x561   :  { %9122 = vst [vmem:[#allocation152_spill] sm:$0xff] %v7613_v15  ;;  %v3051_v15 = vsel %vm1207_vm2, %v9130_v34, 0.0  ;;  %v2974_v60 = vpop.permute.xlu0 %2973 }
 0x564   :  { %v7617_v46 = vpop.permute.xlu1 %2630 }
 0x565   :  { %9124 = vst [vmem:[#allocation154_spill] sm:$0xff] %v7617_v46  ;;  %3037 = vadd.xlane.f32.xlu1 %v3036_v25  ;;  %v3057_v25 = vsel %vm1207_vm2, %v9132_v44, 0.0 }
 0x568   :  { %v7621_v59 = vpop.permute.xlu1 %1986 }
 0x569   :  { %9126 = vst [vmem:[#allocation53_spill] sm:$0xff] %v7621_v59  ;;  %3046 = vadd.xlane.f32.xlu1 %v3045_v19  ;;  %v9134_v59 = vld [vmem:[#allocation58_spill] sm:$0xff] }
 0x56a   :  { %v3063_v29 = vsel %vm1207_vm2, %v9134_v59, 0.0 }
 0x56c   :  { %v7627_v39 = vpop.permute.xlu1 %2626 }
 0x56d   :  { %9129 = vst [vmem:[#allocation155_spill] sm:$0xff] %v7627_v39  ;;  %3052 = vadd.xlane.f32.xlu1 %v3051_v15  ;;  %v9136_v39 = vld [vmem:[#allocation63_spill] sm:$0xff]  ;;  %v2978_v15 = vpop.permute.xlu0 %2977 }
 0x56e   :  { %v3069_v34 = vsel %vm1207_vm2, %v9136_v39, 0.0 }
 0x570   :  { %v7631_v46 = vpop.permute.xlu1 %2316 }
 0x571   :  { %9131 = vst [vmem:[#allocation54_spill] sm:$0xff] %v7631_v46  ;;  %3058 = vadd.xlane.f32.xlu1 %v3057_v25  ;;  %v9138_v46 = vld [vmem:[#allocation62_spill] sm:$0xff]  ;;  %v2982_v59 = vpop.permute.xlu0 %2981 }
 0x572   :  { %v3075_v44 = vsel %vm1207_vm2, %v9138_v46, 0.0  ;;  %v3099_v46 = vsel %vm1207_vm2, %v2982_v59, 0.0 }
 0x574   :  { %v7635_v12 = vpop.permute.xlu1 %2312 }
 0x575   :  { %9133 = vst [vmem:[#allocation59_spill] sm:$0xff] %v7635_v12  ;;  %3064 = vadd.xlane.f32.xlu1 %v3063_v29  ;;  %v3081_v12 = vsel %vm1207_vm2, %v2970_v27, 0.0  ;;  %v2986_v39 = vpop.permute.xlu0 %2985 }
 0x578   :  { %v7639_v19 = vpop.permute.xlu1 %1998 }
 0x579   :  { %9135 = vst [vmem:[#allocation58_spill] sm:$0xff] %v7639_v19  ;;  %3070 = vadd.xlane.f32.xlu1 %v3069_v34  ;;  %v3087_v19 = vsel %vm1207_vm2, %v2974_v60, 0.0 }
 0x57c   :  { %v7643_v4 = vpop.permute.xlu1 %2638 }
 0x57d   :  { %9137 = vst [vmem:[#allocation63_spill] sm:$0xff] %v7643_v4  ;;  %3076 = vadd.xlane.f32.xlu1 %v3075_v44  ;;  %v3093_v4 = vsel %vm1207_vm2, %v2978_v15, 0.0  ;;  %v2990_v44 = vpop.permute.xlu0 %2989 }
 0x580   :  { %v7647_v25 = vpop.permute.xlu1 %1994 }
 0x581   :  { %9139 = vst [vmem:[#allocation62_spill] sm:$0xff] %v7647_v25  ;;  %3082 = vadd.xlane.f32.xlu1 %v3081_v12  ;;  %v3105_v12 = vsel %vm1207_vm2, %v2986_v39, 0.0 }
 0x584   :  { %v7650_v29 = vpop.permute.xlu1 %2634 }
 0x585   :  { %9140 = vst [vmem:[#allocation156_spill] sm:$0xff] %v7650_v29  ;;  %3088 = vadd.xlane.f32.xlu1 %v3087_v19  ;;  %v2994_v29 = vpop.permute.xlu0 %2993  ;;  %v3111_v19 = vsel %vm1207_vm2, %v2990_v44, 0.0 }
 0x588   :  { %v7653_v34 = vpop.permute.xlu1 %2324 }
 0x589   :  { %9141 = vst [vmem:[#allocation157_spill] sm:$0xff] %v7653_v34  ;;  %3094 = vadd.xlane.f32.xlu1 %v3093_v4  ;;  %v3117_v4 = vsel %vm1207_vm2, %v2994_v29, 0.0  ;;  %v2998_v15 = vpop.permute.xlu0 %2997 }
 0x58c   :  { %v7656_v43 = vpop.permute.xlu1 %2320 }
 0x58d   :  { %9142 = vst [vmem:[#allocation158_spill] sm:$0xff] %v7656_v43  ;;  %3100 = vadd.xlane.f32.xlu1 %v3099_v46  ;;  %v3123_v46 = vsel %vm1207_vm2, %v2998_v15, 0.0  ;;  %v9147_v43 = vld [vmem:[#allocation19_spill] sm:$0xff] }
 0x590   :  { %v7659_v27 = vpop.permute.xlu1 %2006 }
 0x591   :  { %9143 = vst [vmem:[#allocation159_spill] sm:$0xff] %v7659_v27  ;;  %3106 = vadd.xlane.f32.xlu1 %v3105_v12 }
 0x594   :  { %v7662_v60 = vpop.permute.xlu1 %2646 }
 0x595   :  { %9144 = vst [vmem:[#allocation160_spill] sm:$0xff] %v7662_v60  ;;  %3112 = vadd.xlane.f32.xlu1 %v3111_v19 }
 0x598   :  { %v7665_v34 = vpop.permute.xlu1 %2002 }
 0x599   :  { %9145 = vst [vmem:[#allocation161_spill] sm:$0xff] %v7665_v34  ;;  %3118 = vadd.xlane.f32.xlu1 %v3117_v4 }
 0x59c   :  { %v7668_v59 = vpop.permute.xlu1 %2642 }
 0x59d   :  { %9146 = vst [vmem:[#allocation162_spill] sm:$0xff] %v7668_v59  ;;  %3124 = vadd.xlane.f32.xlu1 %v3123_v46 }
 0x5a0   :  { %v2972_v27 = vpop.permute.xlu1 %2971 }
 0x5a1   :  { %v3084_v39 = vsel %vm1207_vm2, %v2972_v27, 0.0 }
 0x5a2   :  { %3085 = vadd.xlane.f32.xlu0 %v3084_v39 }
 0x5a3   :  { %v3035_v12 = vpop.xlane.xlu0 %3034 }
 0x5a4   :  { %5215 = vrcp.f32 %v3035_v12  ;;  %v2976_v60 = vpop.permute.xlu1 %2975 }
 0x5a5   :  { %v3090_v44 = vsel %vm1207_vm2, %v2976_v60, 0.0 }
 0x5a6   :  { %3091 = vadd.xlane.f32.xlu0 %v3090_v44 }
 0x5a7   :  { %v3041_v19 = vpop.xlane.xlu0 %3040 }
 0x5a8   :  { %5217 = vrcp.f32 %v3041_v19  ;;  %v2980_v29 = vpop.permute.xlu1 %2979 }
 0x5a9   :  { %v3096_v4 = vsel %vm1207_vm2, %v2980_v29, 0.0 }
 0x5aa   :  { %3097 = vadd.xlane.f32.xlu0 %v3096_v4 }
 0x5ab   :  { %v3044_v59 = vpop.xlane.xlu0 %3043 }
 0x5ac   :  { %5219 = vrcp.f32 %v3044_v59  ;;  %v2984_v15 = vpop.permute.xlu1 %2983  ;;  %v9148_v59 = vld [vmem:[#allocation18_spill] sm:$0xff] }
 0x5ad   :  { %v3102_v46 = vsel %vm1207_vm2, %v2984_v15, 0.0 }
 0x5ae   :  { %3103 = vadd.xlane.f32.xlu0 %v3102_v46 }
 0x5b0   :  { %v2988_v27 = vpop.permute.xlu1 %2987 }
 0x5b1   :  { %v5216_v39 = vpop.eup %5215  ;;  %v3108_v12 = vsel %vm1207_vm2, %v2988_v27, 0.0 }
 0x5b2   :  { %3109 = vadd.xlane.f32.xlu0 %v3108_v12  ;;  %v7677_v60 = vmul.f32 %v5216_v39, %v9147_v43  ;;  %v9149_v12 = vld [vmem:[#allocation20_spill] sm:$0xff] }
 0x5b4   :  { %v2992_v44 = vpop.permute.xlu1 %2991  ;;  %3195 = vperm.xlu1 %4983, %v7677_v60  }
 0x5b5   :  { %v5218_v19 = vpop.eup %5217  ;;  %v3114_v29 = vsel %vm1207_vm2, %v2992_v44, 0.0 }
 0x5b6   :  { %3115 = vadd.xlane.f32.xlu0 %v3114_v29  ;;  %v7682_v4 = vmul.f32 %v5218_v19, %v9148_v59  ;;  %v3050_v19 = vpop.xlane.xlu0 %3049 }
 0x5b8   :  { %v2996_v15 = vpop.permute.xlu1 %2995  ;;  %3205 = vperm.xlu1 %4983, %v7682_v4  }
 0x5b9   :  { %v5220_v46 = vpop.eup %5219  ;;  %v3120_v27 = vsel %vm1207_vm2, %v2996_v15, 0.0 }
 0x5ba   :  { %3121 = vadd.xlane.f32.xlu0 %v3120_v27  ;;  %v7687_v43 = vmul.f32 %v5220_v46, %v9149_v12  ;;  %v3056_v59 = vpop.xlane.xlu0 %3055  ;;  %v9150_v46 = vld [vmem:[#allocation21_spill] sm:$0xff] }
 0x5bc   :  { %v3000_v39 = vpop.permute.xlu1 %2999  ;;  %3210 = vperm.xlu1 %4983, %v7687_v43  }
 0x5bd   :  { %v3126_v34 = vsel %vm1207_vm2, %v3000_v39, 0.0  ;;  %v9151_v39 = vld [vmem:[#allocation24_spill] sm:$0xff] }
 0x5be   :  { %3127 = vadd.xlane.f32.xlu0 %v3126_v34  ;;  %v3062_v3 = vpop.xlane.xlu0 %3061 }
 0x5ee   :  { %v3038_v44 = vpop.xlane.xlu1 %3037 }
 0x5ef   :  { %5221 = vrcp.f32 %v3038_v44 }
 0x5f2   :  { %v3047_v29 = vpop.xlane.xlu1 %3046 }
 0x5f3   :  { %5223 = vrcp.f32 %v3047_v29  ;;  %v3068_v29 = vpop.xlane.xlu0 %3067 }
 0x5f4   :  { %5225 = vrcp.f32 %v3050_v19 }
 0x5f6   :  { %v3053_v25 = vpop.xlane.xlu1 %3052 }
 0x5f7   :  { %5227 = vrcp.f32 %v3053_v25  ;;  %v9152_v25 = vld [vmem:[#allocation25_spill] sm:$0xff] }
 0x5f8   :  { %5229 = vrcp.f32 %v3056_v59 }
 0x5fa   :  { %v3059_v15 = vpop.xlane.xlu1 %3058 }
 0x5fc   :  { %v5222_v27 = vpop.eup %5221 }
 0x5fd   :  { %v7692_v12 = vmul.f32 %v5222_v27, %v9150_v46 }
 0x5fe   :  { %v3065_v42 = vpop.xlane.xlu1 %3064 }
 0x5ff   :  { %5231 = vrcp.f32 %v3065_v42  ;;  %3200 = vperm.xlu0 %4984, %v7692_v12   ;;  %v3074_v42 = vpop.xlane.xlu0 %3073 }
 0x600   :  { %v5224_v34 = vpop.eup %5223  ;;  %5233 = vrcp.f32 %v3059_v15  ;;  %v9153_v15 = vld [vmem:[#allocation22_spill] sm:$0xff] }
 0x601   :  { %v7696_v44 = vmul.f32 %v5224_v34, %v9151_v39  ;;  %v5226_v19 = vpop.eup %5225 }
 0x602   :  { %v3071_v48 = vpop.xlane.xlu1 %3070  ;;  %v7700_v59 = vmul.f32 %v5226_v19, %v9152_v25  ;;  %v9155_v25 = vld [vmem:[#allocation23_spill] sm:$0xff] }
 0x603   :  { %5235 = vrcp.f32 %v3071_v48  ;;  %3215 = vperm.xlu1 %4983, %v7696_v44   ;;  %v3080_v22 = vpop.xlane.xlu0 %3079 }
 0x604   :  { %5237 = vrcp.f32 %v3062_v3  ;;  %v5228_v27 = vpop.eup %5227  ;;  %v9154_v3 = vld [vmem:[#allocation26_spill] sm:$0xff] }
 0x605   :  { %v7704_v34 = vmul.f32 %v5228_v27, %v9153_v15  ;;  %v5230_v39 = vpop.eup %5229 }
 0x606   :  { %v3077_v46 = vpop.xlane.xlu1 %3076  ;;  %v7711_v51 = vmul.f32 %v5230_v39, %v9155_v25  ;;  %v9158_v39 = vld [vmem:[#allocation30_spill] sm:$0xff] }
 0x607   :  { %5239 = vrcp.f32 %v3077_v46  ;;  %3220 = vperm.xlu1 %4983, %v7700_v59  }
 0x608   :  { %5241 = vrcp.f32 %v3068_v29 }
 0x60a   :  { %v3083_v6 = vpop.xlane.xlu1 %3082 }
 0x60b   :  { %5243 = vrcp.f32 %v3083_v6  ;;  %3225 = vperm.xlu1 %4983, %v7704_v34   ;;  %v9156_v6 = vld [vmem:[#allocation39_spill] sm:$0xff] }
 0x60c   :  { %v5232_v48 = vpop.eup %5231  ;;  %5245 = vrcp.f32 %v3074_v42  ;;  %v9157_v42 = vld [vmem:[#allocation28_spill] sm:$0xff] }
 0x60d   :  { %v7708_v19 = vmul.f32 %v5232_v48, %v9154_v3  ;;  %v5234_v46 = vpop.eup %5233 }
 0x60e   :  { %v3089_v1 = vpop.xlane.xlu1 %3088  ;;  %v7719_v15 = vmul.f32 %v5234_v46, %v9157_v42  ;;  %v9160_v42 = vld [vmem:[#allocation27_spill] sm:$0xff] }
 0x60f   :  { %5247 = vrcp.f32 %v3089_v1  ;;  %3245 = vperm.xlu0 %4984, %v7708_v19   ;;  %3230 = vperm.xlu1 %4983, %v7711_v51  }
 0x610   :  { %v5236_v29 = vpop.eup %5235  ;;  %5249 = vrcp.f32 %v3080_v22 }
 0x611   :  { %v7716_v27 = vmul.f32 %v5236_v29, %v9156_v6  ;;  %v5238_v48 = vpop.eup %5237 }
 0x612   :  { %v3095_v3 = vpop.xlane.xlu1 %3094  ;;  %v7727_v32 = vmul.f32 %v5238_v48, %v9159_v24 }
 0x613   :  { %5251 = vrcp.f32 %v3095_v3  ;;  %3255 = vperm.xlu0 %4984, %v7716_v27   ;;  %3235 = vperm.xlu1 %4983, %v7719_v15  }
 0x614   :  { %v5240_v1 = vpop.eup %5239 }
 0x615   :  { %v7724_v25 = vmul.f32 %v5240_v1, %v9158_v39  ;;  %v5242_v22 = vpop.eup %5241  ;;  %v9161_v39 = vld [vmem:[#allocation46_spill] sm:$0xff] }
 0x616   :  { %v3101_v29 = vpop.xlane.xlu1 %3100  ;;  %v7735_v3 = vmul.f32 %v5242_v22, %v9160_v42  ;;  %v9162_v42 = vld [vmem:[#allocation35_spill] sm:$0xff] }
 0x617   :  { %5253 = vrcp.f32 %v3101_v29  ;;  %3265 = vperm.xlu0 %4984, %v7724_v25   ;;  %3240 = vperm.xlu1 %4983, %v7727_v32  }
 0x618   :  { %v5244_v46 = vpop.eup %5243 }
 0x619   :  { %v7732_v6 = vmul.f32 %v5244_v46, %v7338_v30  ;;  %v5246_v8 = vpop.eup %5245 }
 0x61a   :  { %v3107_v1 = vpop.xlane.xlu1 %3106  ;;  %v7743_v29 = vmul.f32 %v5246_v8, %v9161_v39 }
 0x61b   :  { %5255 = vrcp.f32 %v3107_v1  ;;  %3275 = vperm.xlu0 %4984, %v7732_v6   ;;  %3250 = vperm.xlu1 %4983, %v7735_v3  }
 0x61c   :  { %v5248_v24 = vpop.eup %5247 }
 0x61d   :  { %v7740_v48 = vmul.f32 %v5248_v24, %v7351_v33  ;;  %v5250_v11 = vpop.eup %5249 }
 0x61e   :  { %v3113_v30 = vpop.xlane.xlu1 %3112  ;;  %v7751_v1 = vmul.f32 %v5250_v11, %v9162_v42 }
 0x61f   :  { %5257 = vrcp.f32 %v3113_v30  ;;  %3285 = vperm.xlu0 %4984, %v7740_v48   ;;  %3260 = vperm.xlu1 %4983, %v7743_v29  }
 0x620   :  { %v5252_v22 = vpop.eup %5251 }
 0x621   :  { %v7748_v46 = vmul.f32 %v5252_v22, %v7364_v21 }
 0x622   :  { %v3119_v18 = vpop.xlane.xlu1 %3118 }
 0x623   :  { %5259 = vrcp.f32 %v3119_v18  ;;  %3295 = vperm.xlu0 %4984, %v7748_v46   ;;  %3270 = vperm.xlu1 %4983, %v7751_v1  }
 0x624   :  { %v5254_v8 = vpop.eup %5253 }
 0x625   :  { %v7756_v33 = vmul.f32 %v5254_v8, %v7375_v40 }
 0x626   :  { %v3125_v24 = vpop.xlane.xlu1 %3124 }
 0x627   :  { %5261 = vrcp.f32 %v3125_v24  ;;  %3305 = vperm.xlu0 %4984, %v7756_v33  }
 0x628   :  { %v5256_v39 = vpop.eup %5255 }
 0x629   :  { %v7760_v21 = vmul.f32 %v5256_v39, %v7386_v61 }
 0x62b   :  { %3315 = vperm.xlu0 %4984, %v7760_v21   ;;  %v3086_v11 = vpop.xlane.xlu0 %3085 }
 0x62c   :  { %v5258_v18 = vpop.eup %5257  ;;  %5263 = vrcp.f32 %v3086_v11 }
 0x62d   :  { %v7764_v30 = vmul.f32 %v5258_v18, %v7397_v23  ;;  %v5289_v18 = vmov 5  }
 0x62f   :  { %9163 = vst [vmem:[#allocation19_spill] sm:$0xff] %v7764_v30  ;;  %3325 = vperm.xlu0 %4984, %v7764_v30   ;;  %v3092_v40 = vpop.xlane.xlu0 %3091 }
 0x630   :  { %v5260_v22 = vpop.eup %5259  ;;  %5265 = vrcp.f32 %v3092_v40 }
 0x631   :  { %v7768_v42 = vmul.f32 %v5260_v22, %v7408_v31 }
 0x633   :  { %9164 = vst [vmem:[#allocation18_spill] sm:$0xff] %v7768_v42  ;;  %3335 = vperm.xlu0 %4984, %v7768_v42   ;;  %v3098_v61 = vpop.xlane.xlu0 %3097 }
 0x634   :  { %v5262_v8 = vpop.eup %5261  ;;  %5267 = vrcp.f32 %v3098_v61 }
 0x635   :  { %v7772_v24 = vmul.f32 %v5262_v8, %v7419_v20 }
 0x637   :  { %9165 = vst [vmem:[#allocation20_spill] sm:$0xff] %v7772_v24  ;;  %3345 = vperm.xlu0 %4984, %v7772_v24   ;;  %v3104_v23 = vpop.xlane.xlu0 %3103 }
 0x638   :  { %5269 = vrcp.f32 %v3104_v23 }
 0x639   :  { %v5264_v39 = vpop.eup %5263 }
 0x63a   :  { %v7776_v11 = vmul.f32 %v5264_v39, %v7513_v7 }
 0x63b   :  { %4985 = vset.pattern.permute.xlu0 %v5289_v18  ;;  %v3110_v31 = vpop.xlane.xlu0 %3109 }
 0x63c   :  { %5271 = vrcp.f32 %v3110_v31  ;;  %3386 = vperm.xlu0 %4985, %v7677_v60   ;;  %3280 = vperm.xlu1 %4983, %v7776_v11  }
 0x63d   :  { %v5266_v40 = vpop.eup %5265 }
 0x63e   :  { %v7781_v20 = vmul.f32 %v5266_v40, %v7525_v41 }
 0x63f   :  { %v3116_v22 = vpop.xlane.xlu0 %3115 }
 0x640   :  { %5273 = vrcp.f32 %v3116_v22  ;;  %3398 = vperm.xlu0 %4985, %v7687_v43   ;;  %3290 = vperm.xlu1 %4983, %v7781_v20  }
 0x641   :  { %v5268_v7 = vpop.eup %5267 }
 0x642   :  { %v7786_v61 = vmul.f32 %v5268_v7, %v7537_v57 }
 0x643   :  { %v3122_v8 = vpop.xlane.xlu0 %3121 }
 0x644   :  { %5275 = vrcp.f32 %v3122_v8  ;;  %3406 = vperm.xlu0 %4985, %v7700_v59   ;;  %3300 = vperm.xlu1 %4983, %v7786_v61  }
 0x645   :  { %v5270_v23 = vpop.eup %5269 }
 0x646   :  { %v7791_v41 = vmul.f32 %v5270_v23, %v7547_v52 }
 0x647   :  { %v3128_v39 = vpop.xlane.xlu0 %3127 }
 0x648   :  { %5277 = vrcp.f32 %v3128_v39  ;;  %3414 = vperm.xlu0 %4985, %v7711_v51   ;;  %3310 = vperm.xlu1 %4983, %v7791_v41  }
 0x649   :  { %v5272_v31 = vpop.eup %5271 }
 0x64a   :  { %v7796_v57 = vmul.f32 %v5272_v31, %v7557_v47 }
 0x64c   :  { %3422 = vperm.xlu0 %4985, %v7727_v32   ;;  %3320 = vperm.xlu1 %4983, %v7796_v57  }
 0x64d   :  { %v5274_v40 = vpop.eup %5273 }
 0x64e   :  { %v7801_v22 = vmul.f32 %v5274_v40, %v7565_v13  ;;  %v7827_v13 = vpop.permute.xlu1 %3195 }
 0x64f   :  { %9169 = vst [vmem:[#allocation22_spill] sm:$0xff] %v7827_v13 }
 0x650   :  { %9166 = vst [vmem:[#allocation21_spill] sm:$0xff] %v7801_v22  ;;  %3430 = vperm.xlu0 %4985, %v7735_v3   ;;  %3330 = vperm.xlu1 %4983, %v7801_v22  }
 0x651   :  { %v5276_v52 = vpop.eup %5275 }
 0x652   :  { %v7806_v7 = vmul.f32 %v5276_v52, %v7575_v26  ;;  %v7832_v26 = vpop.permute.xlu1 %3205 }
 0x653   :  { %9170 = vst [vmem:[#allocation26_spill] sm:$0xff] %v7832_v26 }
 0x654   :  { %9167 = vst [vmem:[#allocation24_spill] sm:$0xff] %v7806_v7  ;;  %3438 = vperm.xlu0 %4985, %v7743_v29   ;;  %3340 = vperm.xlu1 %4983, %v7806_v7  }
 0x655   :  { %v5278_v47 = vpop.eup %5277 }
 0x656   :  { %v7811_v8 = vmul.f32 %v5278_v47, %v7583_v14  ;;  %v7836_v14 = vpop.permute.xlu1 %3210 }
 0x657   :  { %9171 = vst [vmem:[#allocation23_spill] sm:$0xff] %v7836_v14 }
 0x658   :  { %9168 = vst [vmem:[#allocation25_spill] sm:$0xff] %v7811_v8  ;;  %3446 = vperm.xlu0 %4985, %v7751_v1   ;;  %3350 = vperm.xlu1 %4983, %v7811_v8  }
 0x65c   :  { %3454 = vperm.xlu0 %4985, %v7776_v11   ;;  %4986 = vset.pattern.permute.xlu1 %v5289_v18 }
 0x65d   :  { %3390 = vperm.xlu1 %4986, %v7692_v12  }
 0x660   :  { %3462 = vperm.xlu0 %4985, %v7781_v20  }
 0x661   :  { %3394 = vperm.xlu1 %4986, %v7682_v4  }
 0x664   :  { %3470 = vperm.xlu0 %4985, %v7786_v61  }
 0x665   :  { %3402 = vperm.xlu1 %4986, %v7696_v44  }
 0x668   :  { %3478 = vperm.xlu0 %4985, %v7791_v41  }
 0x669   :  { %3410 = vperm.xlu1 %4986, %v7704_v34  }
 0x66c   :  { %3486 = vperm.xlu0 %4985, %v7796_v57  }
 0x66d   :  { %3418 = vperm.xlu1 %4986, %v7719_v15  }
 0x670   :  { %3494 = vperm.xlu0 %4985, %v7801_v22  }
 0x671   :  { %3426 = vperm.xlu1 %4986, %v7708_v19  }
 0x674   :  { %3502 = vperm.xlu0 %4985, %v7806_v7  }
 0x675   :  { %3434 = vperm.xlu1 %4986, %v7716_v27  }
 0x678   :  { %3510 = vperm.xlu0 %4985, %v7811_v8  }
 0x679   :  { %3442 = vperm.xlu1 %4986, %v7724_v25  }
 0x67a   :  { %v7842_v23 = vpop.permute.xlu0 %3200 }
 0x67b   :  { %9173 = vst [vmem:[#allocation28_spill] sm:$0xff] %v7842_v23 }
 0x67d   :  { %3450 = vperm.xlu1 %4986, %v7732_v6  }
 0x67e   :  { %v7839_v18 = vpop.permute.xlu1 %3215 }
 0x67f   :  { %9172 = vst [vmem:[#allocation39_spill] sm:$0xff] %v7839_v18 }
 0x681   :  { %3458 = vperm.xlu1 %4986, %v7740_v48  }
 0x682   :  { %v7844_v39 = vpop.permute.xlu1 %3220 }
 0x683   :  { %9174 = vst [vmem:[#allocation30_spill] sm:$0xff] %v7844_v39  ;;  %v5290_v39 = vmov 6  }
 0x684   :  { %4988 = vset.pattern.permute.xlu0 %v5290_v39 }
 0x685   :  { %3466 = vperm.xlu1 %4986, %v7748_v46  }
 0x686   :  { %v7852_v52 = vpop.permute.xlu1 %3225 }
 0x687   :  { %9177 = vst [vmem:[#allocation46_spill] sm:$0xff] %v7852_v52 }
 0x689   :  { %3474 = vperm.xlu1 %4986, %v7756_v33  }
 0x68a   :  { %v7847_v31 = vpop.permute.xlu0 %3245  ;;  %v7857_v18 = vpop.permute.xlu1 %3230 }
 0x68b   :  { %9175 = vst [vmem:[#allocation29_spill] sm:$0xff] %v7847_v31  ;;  %9179 = vst [vmem:[#allocation163_spill] sm:$0xff] %v7857_v18 }
 0x68d   :  { %3482 = vperm.xlu1 %4986, %v7760_v21  }
 0x68e   :  { %v7850_v40 = vpop.permute.xlu0 %3255  ;;  %v7865_v26 = vpop.permute.xlu1 %3235 }
 0x68f   :  { %9176 = vst [vmem:[#allocation27_spill] sm:$0xff] %v7850_v40  ;;  %9182 = vst [vmem:[#allocation166_spill] sm:$0xff] %v7865_v26 }
 0x691   :  { %3490 = vperm.xlu1 %4986, %v7764_v30  }
 0x692   :  { %v7855_v47 = vpop.permute.xlu0 %3265  ;;  %v7869_v52 = vpop.permute.xlu1 %3240 }
 0x693   :  { %9178 = vst [vmem:[#allocation35_spill] sm:$0xff] %v7855_v47  ;;  %9184 = vst [vmem:[#allocation168_spill] sm:$0xff] %v7869_v52 }
 0x695   :  { %3498 = vperm.xlu1 %4986, %v7768_v42  }
 0x696   :  { %v7860_v14 = vpop.permute.xlu0 %3275  ;;  %v7875_v23 = vpop.permute.xlu1 %3250 }
 0x697   :  { %9180 = vst [vmem:[#allocation164_spill] sm:$0xff] %v7860_v14  ;;  %9187 = vst [vmem:[#allocation171_spill] sm:$0xff] %v7875_v23 }
 0x699   :  { %3506 = vperm.xlu1 %4986, %v7772_v24  }
 0x69a   :  { %v7863_v31 = vpop.permute.xlu0 %3285  ;;  %v7879_v13 = vpop.permute.xlu1 %3260 }
 0x69b   :  { %9181 = vst [vmem:[#allocation165_spill] sm:$0xff] %v7863_v31  ;;  %9189 = vst [vmem:[#allocation173_spill] sm:$0xff] %v7879_v13 }
 0x69d   :  { %4987 = vset.pattern.permute.xlu1 %v5290_v39 }
 0x69e   :  { %v7867_v40 = vpop.permute.xlu0 %3295  ;;  %v7885_v26 = vpop.permute.xlu1 %3270 }
 0x69f   :  { %9183 = vst [vmem:[#allocation167_spill] sm:$0xff] %v7867_v40  ;;  %9192 = vst [vmem:[#allocation176_spill] sm:$0xff] %v7885_v26 }
 0x6a2   :  { %v7871_v47 = vpop.permute.xlu0 %3305 }
 0x6a3   :  { %9185 = vst [vmem:[#allocation169_spill] sm:$0xff] %v7871_v47 }
 0x6a6   :  { %v7873_v18 = vpop.permute.xlu0 %3315 }
 0x6a7   :  { %9186 = vst [vmem:[#allocation170_spill] sm:$0xff] %v7873_v18 }
 0x6aa   :  { %v7877_v14 = vpop.permute.xlu0 %3325 }
 0x6ab   :  { %9188 = vst [vmem:[#allocation172_spill] sm:$0xff] %v7877_v14 }
 0x6ae   :  { %v7881_v8 = vpop.permute.xlu0 %3335 }
 0x6af   :  { %9190 = vst [vmem:[#allocation174_spill] sm:$0xff] %v7881_v8 }
 0x6b2   :  { %v7883_v31 = vpop.permute.xlu0 %3345 }
 0x6b3   :  { %9191 = vst [vmem:[#allocation175_spill] sm:$0xff] %v7883_v31 }
 0x6b7   :  { %v7887_v39 = vpop.permute.xlu1 %3280  ;;  %v3387_v40 = vpop.permute.xlu0 %3386 }
 0x6b8   :  { %9193 = vst [vmem:[#allocation177_spill] sm:$0xff] %v7887_v39  ;;  %v3513_v52 = vmul.f32 %v3387_v40, %v6818_v16 }
 0x6ba   :  { %3577 = vrot.lane.b32.xlu1 %v3513_v52, %s5285_s6 }
 0x6bb   :  { %v7891_v18 = vpop.permute.xlu1 %3290  ;;  %v3399_v47 = vpop.permute.xlu0 %3398 }
 0x6bc   :  { %9194 = vst [vmem:[#allocation178_spill] sm:$0xff] %v7891_v18 }
 0x6bf   :  { %v7893_v23 = vpop.permute.xlu1 %3300  ;;  %v3407_v13 = vpop.permute.xlu0 %3406 }
 0x6c0   :  { %9195 = vst [vmem:[#allocation179_spill] sm:$0xff] %v7893_v23 }
 0x6c3   :  { %v7895_v14 = vpop.permute.xlu1 %3310  ;;  %v3415_v31 = vpop.permute.xlu0 %3414 }
 0x6c4   :  { %9196 = vst [vmem:[#allocation180_spill] sm:$0xff] %v7895_v14  ;;  %v3516_v14 = vmul.f32 %v3399_v47, %v6835_v53 }
 0x6c7   :  { %v7897_v8 = vpop.permute.xlu1 %3320  ;;  %v3423_v39 = vpop.permute.xlu0 %3422 }
 0x6c8   :  { %9197 = vst [vmem:[#allocation181_spill] sm:$0xff] %v7897_v8 }
 0x6cb   :  { %v7899_v7 = vpop.permute.xlu1 %3330  ;;  %v3431_v40 = vpop.permute.xlu0 %3430 }
 0x6cc   :  { %9198 = vst [vmem:[#allocation182_spill] sm:$0xff] %v7899_v7  ;;  %v3518_v7 = vmul.f32 %v3407_v13, %v6905_v36  ;;  %v3522_v13 = vmul.f32 %v3423_v39, %v6965_v50 }
 0x6cf   :  { %v7901_v26 = vpop.permute.xlu1 %3340  ;;  %v3439_v23 = vpop.permute.xlu0 %3438 }
 0x6d0   :  { %9199 = vst [vmem:[#allocation183_spill] sm:$0xff] %v7901_v26 }
 0x6d3   :  { %v7903_v24 = vpop.permute.xlu1 %3350  ;;  %v3447_v22 = vpop.permute.xlu0 %3446 }
 0x6d4   :  { %9200 = vst [vmem:[#allocation184_spill] sm:$0xff] %v7903_v24 }
 0x6d8   :  { %v3391_v52 = vpop.permute.xlu1 %3390 }
 0x6d9   :  { %v3514_v18 = vmul.f32 %v3391_v52, %v6850_v10  ;;  %v3520_v52 = vmul.f32 %v3415_v31, %v6893_v45 }
 0x6db   :  { %3579 = vrot.lane.b32.xlu0 %v3514_v18, %s5285_s6 }
 0x6dc   :  { %v3395_v16 = vpop.permute.xlu1 %3394 }
 0x6dd   :  { %v3515_v8 = vmul.f32 %v3395_v16, %v6802_v54  ;;  %v3455_v16 = vpop.permute.xlu0 %3454 }
 0x6df   :  { %3581 = vrot.lane.b32.xlu1 %v3515_v8, %s5285_s6  ;;  %3583 = vrot.lane.b32.xlu0 %v3516_v14, %s5285_s6 }
 0x6e0   :  { %v3403_v26 = vpop.permute.xlu1 %3402 }
 0x6e1   :  { %v3517_v24 = vmul.f32 %v3403_v26, %v6877_v58  ;;  %v3463_v31 = vpop.permute.xlu0 %3462 }
 0x6e3   :  { %3585 = vrot.lane.b32.xlu1 %v3517_v24, %s5285_s6  ;;  %3587 = vrot.lane.b32.xlu0 %v3518_v7, %s5285_s6  ;;  %v3524_v7 = vmul.f32 %v3431_v40, %v6957_v9  ;;  %v3528_v40 = vmul.f32 %v3447_v22, %v7021_v62  ;;  %v9201_v22 = vld [vmem:[#allocation105_spill] sm:$0xff] }
 0x6e4   :  { %v3411_v18 = vpop.permute.xlu1 %3410 }
 0x6e5   :  { %v3519_v47 = vmul.f32 %v3411_v18, %v6855_v63 }
 0x6e7   :  { %3589 = vrot.lane.b32.xlu1 %v3519_v47, %s5285_s6  ;;  %3591 = vrot.lane.b32.xlu0 %v3520_v52, %s5285_s6  ;;  %v3526_v52 = vmul.f32 %v3439_v23, %v7034_v2  ;;  %v3471_v47 = vpop.permute.xlu0 %3470 }
 0x6e8   :  { %v3419_v8 = vpop.permute.xlu1 %3418 }
 0x6e9   :  { %v3521_v26 = vmul.f32 %v3419_v8, %v6936_v17 }
 0x6eb   :  { %3593 = vrot.lane.b32.xlu1 %v3521_v26, %s5285_s6  ;;  %3595 = vrot.lane.b32.xlu0 %v3522_v13, %s5285_s6 }
 0x6ec   :  { %v3427_v24 = vpop.permute.xlu1 %3426 }
 0x6ed   :  { %v3523_v14 = vmul.f32 %v3427_v24, %v6917_v35  ;;  %v3530_v24 = vmul.f32 %v3455_v16, %v7102_v37  ;;  %v3534_v16 = vmul.f32 %v3471_v47, %v7172_v0  ;;  %v9204_v47 = vld [vmem:[#allocation91_spill] sm:$0xff] }
 0x6ef   :  { %3597 = vrot.lane.b32.xlu1 %v3523_v14, %s5285_s6  ;;  %3599 = vrot.lane.b32.xlu0 %v3524_v7, %s5285_s6  ;;  %v3479_v7 = vpop.permute.xlu0 %3478 }
 0x6f0   :  { %v3435_v18 = vpop.permute.xlu1 %3434 }
 0x6f1   :  { %v3525_v39 = vmul.f32 %v3435_v18, %v6995_v28  ;;  %v3532_v18 = vmul.f32 %v3463_v31, %v7089_v5  ;;  %v9202_v31 = vld [vmem:[#allocation109_spill] sm:$0xff] }
 0x6f3   :  { %3601 = vrot.lane.b32.xlu1 %v3525_v39, %s5285_s6  ;;  %3603 = vrot.lane.b32.xlu0 %v3526_v52, %s5285_s6  ;;  %v3487_v39 = vpop.permute.xlu0 %3486 }
 0x6f4   :  { %v3443_v8 = vpop.permute.xlu1 %3442 }
 0x6f5   :  { %v3527_v13 = vmul.f32 %v3443_v8, %v6976_v55 }
 0x6f7   :  { %3605 = vrot.lane.b32.xlu1 %v3527_v13, %s5285_s6  ;;  %3607 = vrot.lane.b32.xlu0 %v3528_v40, %s5285_s6 }
 0x6f8   :  { %v3451_v26 = vpop.permute.xlu1 %3450 }
 0x6f9   :  { %v3529_v23 = vmul.f32 %v3451_v26, %v7063_v56  ;;  %v3536_v26 = vmul.f32 %v3479_v7, %v7159_v38  ;;  %v9206_v38 = vld [vmem:[#allocation116_spill] sm:$0xff] }
 0x6fb   :  { %3609 = vrot.lane.b32.xlu1 %v3529_v23, %s5285_s6  ;;  %3611 = vrot.lane.b32.xlu0 %v3530_v24, %s5285_s6  ;;  %v3495_v23 = vpop.permute.xlu0 %3494 }
 0x6fc   :  { %v3459_v14 = vpop.permute.xlu1 %3458 }
 0x6fd   :  { %v3531_v52 = vmul.f32 %v3459_v14, %v9201_v22 }
 0x6ff   :  { %3613 = vrot.lane.b32.xlu1 %v3531_v52, %s5285_s6  ;;  %3615 = vrot.lane.b32.xlu0 %v3532_v18, %s5285_s6  ;;  %v9203_v18 = vld [vmem:[#allocation96_spill] sm:$0xff] }
 0x700   :  { %v3467_v8 = vpop.permute.xlu1 %3466  ;;  %v3538_v52 = vmul.f32 %v3487_v39, %v9203_v18  ;;  %v9208_v39 = vld [vmem:[#allocation32_spill] sm:$0xff] }
 0x701   :  { %v3533_v40 = vmul.f32 %v3467_v8, %v7131_v49  ;;  %v3503_v8 = vpop.permute.xlu0 %3502 }
 0x703   :  { %3617 = vrot.lane.b32.xlu1 %v3533_v40, %s5285_s6  ;;  %3619 = vrot.lane.b32.xlu0 %v3534_v16, %s5285_s6  ;;  %v9205_v40 = vld [vmem:[#allocation94_spill] sm:$0xff] }
 0x704   :  { %v3475_v13 = vpop.permute.xlu1 %3474  ;;  %v3540_v7 = vmul.f32 %v3495_v23, %v9205_v40  ;;  %v9210_v23 = vld [vmem:[#allocation121_spill] sm:$0xff] }
 0x705   :  { %v3535_v24 = vmul.f32 %v3475_v13, %v9202_v31 }
 0x707   :  { %3621 = vrot.lane.b32.xlu1 %v3535_v24, %s5285_s6  ;;  %3623 = vrot.lane.b32.xlu0 %v3536_v26, %s5285_s6  ;;  %v9207_v24 = vld [vmem:[#allocation7_spill] sm:$0xff] }
 0x708   :  { %v3483_v14 = vpop.permute.xlu1 %3482  ;;  %v3542_v31 = vmul.f32 %v3503_v8, %v9207_v24 }
 0x709   :  { %v3537_v0 = vmul.f32 %v3483_v14, %v9204_v47  ;;  %v3511_v14 = vpop.permute.xlu0 %3510 }
 0x70b   :  { %3625 = vrot.lane.b32.xlu1 %v3537_v0, %s5285_s6  ;;  %3627 = vrot.lane.b32.xlu0 %v3538_v52, %s5285_s6  ;;  %v9209_v52 = vld [vmem:[#allocation100_spill] sm:$0xff] }
 0x70c   :  { %v3491_v16 = vpop.permute.xlu1 %3490  ;;  %v3544_v47 = vmul.f32 %v3511_v14, %v9209_v52  ;;  %v5291_v14 = vmov 7  }
 0x70d   :  { %v3539_v13 = vmul.f32 %v3491_v16, %v9206_v38  ;;  %v9215_v16 = vld [vmem:[#allocation21_spill] sm:$0xff] }
 0x70f   :  { %3629 = vrot.lane.b32.xlu1 %v3539_v13, %s5285_s6  ;;  %3631 = vrot.lane.b32.xlu0 %v3540_v7, %s5285_s6 }
 0x710   :  { %v3499_v26 = vpop.permute.xlu1 %3498 }
 0x711   :  { %v3541_v18 = vmul.f32 %v3499_v26, %v9208_v39  ;;  %v9219_v26 = vld [vmem:[#allocation24_spill] sm:$0xff] }
 0x713   :  { %3633 = vrot.lane.b32.xlu1 %v3541_v18, %s5285_s6  ;;  %3635 = vrot.lane.b32.xlu0 %v3542_v31, %s5285_s6 }
 0x714   :  { %v3507_v0 = vpop.permute.xlu1 %3506 }
 0x715   :  { %v3543_v40 = vmul.f32 %v3507_v0, %v9210_v23 }
 0x717   :  { %3637 = vrot.lane.b32.xlu1 %v3543_v40, %s5285_s6  ;;  %3639 = vrot.lane.b32.xlu0 %v3544_v47, %s5285_s6  ;;  %v9216_v40 = vld [vmem:[#allocation20_spill] sm:$0xff] }
 0x71b   :  { %3706 = vperm.xlu1 %4987, %v7677_v60   ;;  %3710 = vperm.xlu0 %4988, %v7692_v12  }
 0x71f   :  { %3714 = vperm.xlu1 %4987, %v7682_v4   ;;  %3722 = vperm.xlu0 %4988, %v7696_v44  }
 0x723   :  { %3718 = vperm.xlu1 %4987, %v7687_v43   ;;  %3730 = vperm.xlu0 %4988, %v7704_v34  }
 0x727   :  { %3726 = vperm.xlu1 %4987, %v7700_v59   ;;  %3738 = vperm.xlu0 %4988, %v7719_v15  }
 0x72b   :  { %3734 = vperm.xlu1 %4987, %v7711_v51   ;;  %3746 = vperm.xlu0 %4988, %v7708_v19  }
 0x72c   :  { %v7993_v31 = vpop.permute.xlu1 %3577 }
 0x72d   :  { %9211 = vst [vmem:[#allocation116_spill] sm:$0xff] %v7993_v31  ;;  %v9222_v31 = vld [vmem:[#allocation25_spill] sm:$0xff] }
 0x72f   :  { %3742 = vperm.xlu1 %4987, %v7727_v32   ;;  %3754 = vperm.xlu0 %4988, %v7716_v27  }
 0x733   :  { %3750 = vperm.xlu1 %4987, %v7735_v3   ;;  %3762 = vperm.xlu0 %4988, %v7724_v25  }
 0x737   :  { %3758 = vperm.xlu1 %4987, %v7743_v29   ;;  %3770 = vperm.xlu0 %4988, %v7732_v6  }
 0x73b   :  { %3766 = vperm.xlu1 %4987, %v7751_v1   ;;  %3778 = vperm.xlu0 %4988, %v7740_v48  }
 0x73f   :  { %3774 = vperm.xlu1 %4987, %v7776_v11   ;;  %3786 = vperm.xlu0 %4988, %v7748_v46  }
 0x743   :  { %3782 = vperm.xlu1 %4987, %v7781_v20   ;;  %3794 = vperm.xlu0 %4988, %v7756_v33  }
 0x747   :  { %3790 = vperm.xlu1 %4987, %v7786_v61   ;;  %3802 = vperm.xlu0 %4988, %v7760_v21  }
 0x74b   :  { %3798 = vperm.xlu1 %4987, %v7791_v41   ;;  %3810 = vperm.xlu0 %4988, %v7764_v30   ;;  %v9247_v30 = vld [vmem:[#allocation89_spill] sm:$0xff] }
 0x74d   :  { %v7995_v18 = vpop.permute.xlu0 %3579 }
 0x74e   :  { %9212 = vst [vmem:[#allocation185_spill] sm:$0xff] %v7995_v18 }
 0x74f   :  { %3806 = vperm.xlu1 %4987, %v7796_v57   ;;  %3818 = vperm.xlu0 %4988, %v7768_v42  }
 0x751   :  { %v7999_v47 = vpop.permute.xlu1 %3581  ;;  %v8001_v8 = vpop.permute.xlu0 %3583 }
 0x752   :  { %9213 = vst [vmem:[#allocation186_spill] sm:$0xff] %v7999_v47  ;;  %9214 = vst [vmem:[#allocation187_spill] sm:$0xff] %v8001_v8 }
 0x753   :  { %3814 = vperm.xlu1 %4987, %v9215_v16   ;;  %3826 = vperm.xlu0 %4988, %v9216_v40  }
 0x755   :  { %v8005_v7 = vpop.permute.xlu1 %3585  ;;  %v8007_v13 = vpop.permute.xlu0 %3587 }
 0x756   :  { %9217 = vst [vmem:[#allocation21_spill] sm:$0xff] %v8005_v7  ;;  %9218 = vst [vmem:[#allocation188_spill] sm:$0xff] %v8007_v13 }
 0x757   :  { %3822 = vperm.xlu1 %4987, %v9219_v26   ;;  %4989 = vset.pattern.permute.xlu0 %v5291_v14 }
 0x759   :  { %v8010_v0 = vpop.permute.xlu1 %3589  ;;  %v8012_v18 = vpop.permute.xlu0 %3591 }
 0x75a   :  { %9220 = vst [vmem:[#allocation189_spill] sm:$0xff] %v8010_v0  ;;  %9221 = vst [vmem:[#allocation190_spill] sm:$0xff] %v8012_v18 }
 0x75b   :  { %3830 = vperm.xlu1 %4987, %v9222_v31  }
 0x75d   :  { %v8015_v47 = vpop.permute.xlu1 %3593  ;;  %v8017_v8 = vpop.permute.xlu0 %3595 }
 0x75e   :  { %9223 = vst [vmem:[#allocation191_spill] sm:$0xff] %v8015_v47  ;;  %9224 = vst [vmem:[#allocation192_spill] sm:$0xff] %v8017_v8 }
 0x75f   :  { %4990 = vset.pattern.permute.xlu1 %v5291_v14 }
 0x761   :  { %v8019_v40 = vpop.permute.xlu1 %3597  ;;  %v8021_v7 = vpop.permute.xlu0 %3599 }
 0x762   :  { %9225 = vst [vmem:[#allocation193_spill] sm:$0xff] %v8019_v40  ;;  %9226 = vst [vmem:[#allocation194_spill] sm:$0xff] %v8021_v7 }
 0x765   :  { %v8023_v13 = vpop.permute.xlu1 %3601  ;;  %v8025_v42 = vpop.permute.xlu0 %3603 }
 0x766   :  { %9227 = vst [vmem:[#allocation195_spill] sm:$0xff] %v8023_v13  ;;  %9228 = vst [vmem:[#allocation196_spill] sm:$0xff] %v8025_v42 }
 0x769   :  { %v8027_v26 = vpop.permute.xlu1 %3605  ;;  %v8029_v0 = vpop.permute.xlu0 %3607 }
 0x76a   :  { %9229 = vst [vmem:[#allocation197_spill] sm:$0xff] %v8027_v26  ;;  %9230 = vst [vmem:[#allocation198_spill] sm:$0xff] %v8029_v0 }
 0x76d   :  { %v8031_v18 = vpop.permute.xlu1 %3609  ;;  %v8033_v31 = vpop.permute.xlu0 %3611 }
 0x76e   :  { %9231 = vst [vmem:[#allocation199_spill] sm:$0xff] %v8031_v18  ;;  %9232 = vst [vmem:[#allocation200_spill] sm:$0xff] %v8033_v31 }
 0x771   :  { %v8035_v47 = vpop.permute.xlu1 %3613  ;;  %v8037_v8 = vpop.permute.xlu0 %3615 }
 0x772   :  { %9233 = vst [vmem:[#allocation201_spill] sm:$0xff] %v8035_v47  ;;  %9234 = vst [vmem:[#allocation202_spill] sm:$0xff] %v8037_v8 }
 0x775   :  { %v8039_v14 = vpop.permute.xlu1 %3617  ;;  %v8041_v40 = vpop.permute.xlu0 %3619 }
 0x776   :  { %9235 = vst [vmem:[#allocation203_spill] sm:$0xff] %v8039_v14  ;;  %9236 = vst [vmem:[#allocation204_spill] sm:$0xff] %v8041_v40 }
 0x779   :  { %v8043_v7 = vpop.permute.xlu1 %3621  ;;  %v8045_v13 = vpop.permute.xlu0 %3623 }
 0x77a   :  { %9237 = vst [vmem:[#allocation205_spill] sm:$0xff] %v8043_v7  ;;  %9238 = vst [vmem:[#allocation206_spill] sm:$0xff] %v8045_v13 }
 0x77d   :  { %v8047_v42 = vpop.permute.xlu1 %3625  ;;  %v8049_v26 = vpop.permute.xlu0 %3627 }
 0x77e   :  { %9239 = vst [vmem:[#allocation207_spill] sm:$0xff] %v8047_v42  ;;  %9240 = vst [vmem:[#allocation208_spill] sm:$0xff] %v8049_v26 }
 0x781   :  { %v8051_v0 = vpop.permute.xlu1 %3629  ;;  %v8053_v18 = vpop.permute.xlu0 %3631 }
 0x782   :  { %9241 = vst [vmem:[#allocation209_spill] sm:$0xff] %v8051_v0  ;;  %9242 = vst [vmem:[#allocation210_spill] sm:$0xff] %v8053_v18 }
 0x785   :  { %v8055_v31 = vpop.permute.xlu1 %3633  ;;  %v8057_v47 = vpop.permute.xlu0 %3635 }
 0x786   :  { %9243 = vst [vmem:[#allocation211_spill] sm:$0xff] %v8055_v31  ;;  %9244 = vst [vmem:[#allocation212_spill] sm:$0xff] %v8057_v47 }
 0x789   :  { %v8059_v8 = vpop.permute.xlu1 %3637  ;;  %v8061_v14 = vpop.permute.xlu0 %3639 }
 0x78a   :  { %9245 = vst [vmem:[#allocation213_spill] sm:$0xff] %v8059_v8  ;;  %9246 = vst [vmem:[#allocation214_spill] sm:$0xff] %v8061_v14 }
 0x796   :  { %v3707_v40 = vpop.permute.xlu1 %3706  ;;  %v3711_v7 = vpop.permute.xlu0 %3710 }
 0x797   :  { %v3833_v13 = vmul.f32 %v3707_v40, %v9247_v30  ;;  %v3834_v42 = vmul.f32 %v3711_v7, %v6850_v10 }
 0x799   :  { %3897 = vrot.lane.b32.xlu0 %v3833_v13, %s5287_s8  ;;  %3899 = vrot.lane.b32.xlu1 %v3834_v42, %s5287_s8 }
 0x79a   :  { %v3715_v0 = vpop.permute.xlu1 %3714  ;;  %v3723_v18 = vpop.permute.xlu0 %3722 }
 0x79b   :  { %v3835_v31 = vmul.f32 %v3715_v0, %v6802_v54  ;;  %v3837_v14 = vmul.f32 %v3723_v18, %v6877_v58 }
 0x79d   :  { %3901 = vrot.lane.b32.xlu0 %v3835_v31, %s5287_s8 }
 0x79e   :  { %v3719_v47 = vpop.permute.xlu1 %3718  ;;  %v3731_v8 = vpop.permute.xlu0 %3730 }
 0x79f   :  { %v3836_v26 = vmul.f32 %v3719_v47, %v6835_v53  ;;  %v3839_v42 = vmul.f32 %v3731_v8, %v6855_v63 }
 0x7a1   :  { %3903 = vrot.lane.b32.xlu1 %v3836_v26, %s5287_s8  ;;  %3905 = vrot.lane.b32.xlu0 %v3837_v14, %s5287_s8 }
 0x7a2   :  { %v3727_v40 = vpop.permute.xlu1 %3726  ;;  %v3739_v7 = vpop.permute.xlu0 %3738 }
 0x7a3   :  { %v3838_v13 = vmul.f32 %v3727_v40, %v6905_v36  ;;  %v3841_v18 = vmul.f32 %v3739_v7, %v6936_v17 }
 0x7a5   :  { %3907 = vrot.lane.b32.xlu1 %v3838_v13, %s5287_s8  ;;  %3909 = vrot.lane.b32.xlu0 %v3839_v42, %s5287_s8 }
 0x7a6   :  { %v3735_v31 = vpop.permute.xlu1 %3734  ;;  %v3747_v0 = vpop.permute.xlu0 %3746 }
 0x7a7   :  { %v3840_v47 = vmul.f32 %v3735_v31, %v6893_v45  ;;  %v3843_v8 = vmul.f32 %v3747_v0, %v6917_v35 }
 0x7a9   :  { %3911 = vrot.lane.b32.xlu1 %v3840_v47, %s5287_s8  ;;  %3913 = vrot.lane.b32.xlu0 %v3841_v18, %s5287_s8 }
 0x7aa   :  { %v3743_v26 = vpop.permute.xlu1 %3742  ;;  %v3755_v14 = vpop.permute.xlu0 %3754 }
 0x7ab   :  { %v3842_v40 = vmul.f32 %v3743_v26, %v6965_v50  ;;  %v3845_v7 = vmul.f32 %v3755_v14, %v6995_v28 }
 0x7ad   :  { %3915 = vrot.lane.b32.xlu1 %v3842_v40, %s5287_s8  ;;  %3917 = vrot.lane.b32.xlu0 %v3843_v8, %s5287_s8 }
 0x7ae   :  { %v3751_v42 = vpop.permute.xlu1 %3750  ;;  %v3763_v13 = vpop.permute.xlu0 %3762 }
 0x7af   :  { %v3844_v31 = vmul.f32 %v3751_v42, %v6957_v9  ;;  %v3847_v0 = vmul.f32 %v3763_v13, %v6976_v55 }
 0x7b1   :  { %3919 = vrot.lane.b32.xlu1 %v3844_v31, %s5287_s8  ;;  %3921 = vrot.lane.b32.xlu0 %v3845_v7, %s5287_s8 }
 0x7b2   :  { %v3759_v18 = vpop.permute.xlu1 %3758  ;;  %v3771_v47 = vpop.permute.xlu0 %3770 }
 0x7b3   :  { %v3846_v26 = vmul.f32 %v3759_v18, %v7034_v2  ;;  %v3849_v14 = vmul.f32 %v3771_v47, %v7063_v56  ;;  %v9248_v56 = vld [vmem:[#allocation109_spill] sm:$0xff] }
 0x7b5   :  { %3923 = vrot.lane.b32.xlu1 %v3846_v26, %s5287_s8  ;;  %3925 = vrot.lane.b32.xlu0 %v3847_v0, %s5287_s8 }
 0x7b6   :  { %v3767_v8 = vpop.permute.xlu1 %3766  ;;  %v3779_v40 = vpop.permute.xlu0 %3778 }
 0x7b7   :  { %v3848_v42 = vmul.f32 %v3767_v8, %v7021_v62  ;;  %v3851_v13 = vmul.f32 %v3779_v40, %v9201_v22  ;;  %v9249_v22 = vld [vmem:[#allocation84_spill] sm:$0xff] }
 0x7b9   :  { %3927 = vrot.lane.b32.xlu1 %v3848_v42, %s5287_s8  ;;  %3929 = vrot.lane.b32.xlu0 %v3849_v14, %s5287_s8 }
 0x7ba   :  { %v3775_v7 = vpop.permute.xlu1 %3774  ;;  %v3787_v31 = vpop.permute.xlu0 %3786 }
 0x7bb   :  { %v3850_v18 = vmul.f32 %v3775_v7, %v7102_v37  ;;  %v3853_v47 = vmul.f32 %v3787_v31, %v7131_v49  ;;  %v9250_v37 = vld [vmem:[#allocation91_spill] sm:$0xff]  ;;  %v9251_v49 = vld [vmem:[#allocation82_spill] sm:$0xff] }
 0x7bd   :  { %3931 = vrot.lane.b32.xlu1 %v3850_v18, %s5287_s8  ;;  %3933 = vrot.lane.b32.xlu0 %v3851_v13, %s5287_s8 }
 0x7be   :  { %v3783_v0 = vpop.permute.xlu1 %3782  ;;  %v3795_v26 = vpop.permute.xlu0 %3794 }
 0x7bf   :  { %v3852_v8 = vmul.f32 %v3783_v0, %v7089_v5  ;;  %v3855_v40 = vmul.f32 %v3795_v26, %v9248_v56  ;;  %v9252_v56 = vld [vmem:[#allocation96_spill] sm:$0xff] }
 0x7c1   :  { %3935 = vrot.lane.b32.xlu1 %v3852_v8, %s5287_s8  ;;  %3937 = vrot.lane.b32.xlu0 %v3853_v47, %s5287_s8 }
 0x7c2   :  { %v3791_v14 = vpop.permute.xlu1 %3790  ;;  %v3803_v42 = vpop.permute.xlu0 %3802 }
 0x7c3   :  { %v3854_v7 = vmul.f32 %v3791_v14, %v9249_v22  ;;  %v3857_v31 = vmul.f32 %v3803_v42, %v9250_v37  ;;  %v9253_v42 = vld [vmem:[#allocation94_spill] sm:$0xff] }
 0x7c5   :  { %3939 = vrot.lane.b32.xlu1 %v3854_v7, %s5287_s8  ;;  %3941 = vrot.lane.b32.xlu0 %v3855_v40, %s5287_s8 }
 0x7c6   :  { %v3799_v13 = vpop.permute.xlu1 %3798  ;;  %v3811_v18 = vpop.permute.xlu0 %3810 }
 0x7c7   :  { %v3856_v0 = vmul.f32 %v3799_v13, %v9251_v49  ;;  %v3859_v26 = vmul.f32 %v3811_v18, %v9206_v38 }
 0x7c9   :  { %3943 = vrot.lane.b32.xlu1 %v3856_v0, %s5287_s8  ;;  %3945 = vrot.lane.b32.xlu0 %v3857_v31, %s5287_s8 }
 0x7ca   :  { %v3807_v47 = vpop.permute.xlu1 %3806  ;;  %v3819_v8 = vpop.permute.xlu0 %3818 }
 0x7cb   :  { %v3858_v14 = vmul.f32 %v3807_v47, %v9252_v56  ;;  %v3861_v7 = vmul.f32 %v3819_v8, %v9208_v39 }
 0x7cd   :  { %3947 = vrot.lane.b32.xlu1 %v3858_v14, %s5287_s8  ;;  %3949 = vrot.lane.b32.xlu0 %v3859_v26, %s5287_s8 }
 0x7ce   :  { %v3815_v40 = vpop.permute.xlu1 %3814  ;;  %v3827_v13 = vpop.permute.xlu0 %3826 }
 0x7cf   :  { %v3860_v37 = vmul.f32 %v3815_v40, %v9253_v42  ;;  %v3863_v0 = vmul.f32 %v3827_v13, %v9210_v23 }
 0x7d1   :  { %3951 = vrot.lane.b32.xlu1 %v3860_v37, %s5287_s8  ;;  %3953 = vrot.lane.b32.xlu0 %v3861_v7, %s5287_s8 }
 0x7d2   :  { %v3823_v31 = vpop.permute.xlu1 %3822 }
 0x7d3   :  { %v3862_v18 = vmul.f32 %v3823_v31, %v9207_v24 }
 0x7d5   :  { %3955 = vrot.lane.b32.xlu1 %v3862_v18, %s5287_s8  ;;  %3957 = vrot.lane.b32.xlu0 %v3863_v0, %s5287_s8 }
 0x7d6   :  { %v3831_v47 = vpop.permute.xlu1 %3830 }
 0x7d7   :  { %v3864_v26 = vmul.f32 %v3831_v47, %v9209_v52 }
 0x7d9   :  { %3959 = vrot.lane.b32.xlu1 %v3864_v26, %s5287_s8  ;;  %4026 = vperm.xlu0 %4989, %v7677_v60   ;;  %v9254_v60 = vld [vmem:[#allocation19_spill] sm:$0xff] }
 0x7dd   :  { %4030 = vperm.xlu1 %4990, %v7692_v12   ;;  %4038 = vperm.xlu0 %4989, %v7687_v43  }
 0x7e1   :  { %4034 = vperm.xlu1 %4990, %v7682_v4   ;;  %4046 = vperm.xlu0 %4989, %v7700_v59   ;;  %v9255_v4 = vld [vmem:[#allocation24_spill] sm:$0xff]  ;;  %v9257_v59 = vld [vmem:[#allocation25_spill] sm:$0xff] }
 0x7e5   :  { %4042 = vperm.xlu1 %4990, %v7696_v44   ;;  %4054 = vperm.xlu0 %4989, %v7711_v51   ;;  %v9256_v44 = vld [vmem:[#allocation18_spill] sm:$0xff] }
 0x7e9   :  { %4050 = vperm.xlu1 %4990, %v7704_v34   ;;  %4062 = vperm.xlu0 %4989, %v7727_v32  }
 0x7ed   :  { %4058 = vperm.xlu1 %4990, %v7719_v15   ;;  %4070 = vperm.xlu0 %4989, %v7735_v3  }
 0x7f1   :  { %4066 = vperm.xlu1 %4990, %v7708_v19   ;;  %4078 = vperm.xlu0 %4989, %v7743_v29  }
 0x7f5   :  { %4074 = vperm.xlu1 %4990, %v7716_v27   ;;  %4086 = vperm.xlu0 %4989, %v7751_v1   ;;  %v9258_v27 = vld [vmem:[#allocation20_spill] sm:$0xff] }
 0x7f9   :  { %4082 = vperm.xlu1 %4990, %v7724_v25   ;;  %4094 = vperm.xlu0 %4989, %v7776_v11  }
 0x7fd   :  { %4090 = vperm.xlu1 %4990, %v7732_v6   ;;  %4102 = vperm.xlu0 %4989, %v7781_v20  }
 0x801   :  { %4098 = vperm.xlu1 %4990, %v7740_v48   ;;  %4110 = vperm.xlu0 %4989, %v7786_v61  }
 0x805   :  { %4106 = vperm.xlu1 %4990, %v7748_v46   ;;  %4118 = vperm.xlu0 %4989, %v7791_v41  }
 0x809   :  { %4114 = vperm.xlu1 %4990, %v7756_v33   ;;  %4126 = vperm.xlu0 %4989, %v7796_v57  }
 0x80b   :  { %v8152_v37 = vpop.permute.xlu0 %3897  ;;  %v8156_v32 = vpop.permute.xlu1 %3899 }
 0x80d   :  { %4122 = vperm.xlu1 %4990, %v7760_v21   ;;  %4134 = vperm.xlu0 %4989, %v9215_v16  }
 0x80f   :  { %v8158_v51 = vpop.permute.xlu0 %3901 }
 0x811   :  { %4130 = vperm.xlu1 %4990, %v9254_v60   ;;  %4142 = vperm.xlu0 %4989, %v9255_v4  }
 0x813   :  { %v8162_v43 = vpop.permute.xlu1 %3903  ;;  %v8164_v12 = vpop.permute.xlu0 %3905 }
 0x815   :  { %4138 = vperm.xlu1 %4990, %v9256_v44   ;;  %4150 = vperm.xlu0 %4989, %v9257_v59  }
 0x817   :  { %v8168_v34 = vpop.permute.xlu1 %3907  ;;  %v8170_v19 = vpop.permute.xlu0 %3909 }
 0x819   :  { %4146 = vperm.xlu1 %4990, %v9258_v27  }
 0x81b   :  { %v8173_v15 = vpop.permute.xlu1 %3911  ;;  %v8175_v25 = vpop.permute.xlu0 %3913 }
 0x81f   :  { %v8177_v6 = vpop.permute.xlu1 %3915  ;;  %v8179_v3 = vpop.permute.xlu0 %3917 }
 0x823   :  { %v8181_v48 = vpop.permute.xlu1 %3919  ;;  %v8183_v29 = vpop.permute.xlu0 %3921 }
 0x827   :  { %v8185_v46 = vpop.permute.xlu1 %3923  ;;  %v8187_v1 = vpop.permute.xlu0 %3925 }
 0x82b   :  { %v8189_v33 = vpop.permute.xlu1 %3927  ;;  %v8191_v21 = vpop.permute.xlu0 %3929 }
 0x82f   :  { %v8193_v11 = vpop.permute.xlu1 %3931  ;;  %v8195_v20 = vpop.permute.xlu0 %3933 }
 0x833   :  { %v8197_v61 = vpop.permute.xlu1 %3935  ;;  %v8199_v41 = vpop.permute.xlu0 %3937 }
 0x837   :  { %v8201_v57 = vpop.permute.xlu1 %3939  ;;  %v8203_v16 = vpop.permute.xlu0 %3941 }
 0x838   :  { %9259 = vst [vmem:[#allocation89_spill] sm:$0xff] %v8201_v57  ;;  %9260 = vst [vmem:[#allocation84_spill] sm:$0xff] %v8203_v16  ;;  %v9274_v16 = vld [vmem:[#allocation109_spill] sm:$0xff]  ;;  %v9275_v57 = vld [vmem:[#allocation91_spill] sm:$0xff] }
 0x83b   :  { %v8205_v8 = vpop.permute.xlu1 %3943  ;;  %v8207_v14 = vpop.permute.xlu0 %3945 }
 0x83c   :  { %9261 = vst [vmem:[#allocation82_spill] sm:$0xff] %v8205_v8  ;;  %9262 = vst [vmem:[#allocation96_spill] sm:$0xff] %v8207_v14  ;;  %v9272_v14 = vld [vmem:[#allocation105_spill] sm:$0xff]  ;;  %v9273_v8 = vld [vmem:[#allocation112_spill] sm:$0xff] }
 0x83f   :  { %v8209_v40 = vpop.permute.xlu1 %3947  ;;  %v8211_v7 = vpop.permute.xlu0 %3949 }
 0x840   :  { %9263 = vst [vmem:[#allocation19_spill] sm:$0xff] %v8209_v40  ;;  %9264 = vst [vmem:[#allocation24_spill] sm:$0xff] %v8211_v7  ;;  %v9270_v7 = vld [vmem:[#allocation108_spill] sm:$0xff]  ;;  %v9271_v40 = vld [vmem:[#allocation106_spill] sm:$0xff] }
 0x843   :  { %v8213_v13 = vpop.permute.xlu1 %3951  ;;  %v8215_v31 = vpop.permute.xlu0 %3953 }
 0x844   :  { %9265 = vst [vmem:[#allocation18_spill] sm:$0xff] %v8213_v13  ;;  %9266 = vst [vmem:[#allocation25_spill] sm:$0xff] %v8215_v31 }
 0x847   :  { %v8217_v0 = vpop.permute.xlu1 %3955  ;;  %v8219_v18 = vpop.permute.xlu0 %3957 }
 0x848   :  { %9267 = vst [vmem:[#allocation20_spill] sm:$0xff] %v8217_v0  ;;  %9268 = vst [vmem:[#allocation215_spill] sm:$0xff] %v8219_v18 }
 0x84b   :  { %v8221_v47 = vpop.permute.xlu1 %3959 }
 0x84c   :  { %9269 = vst [vmem:[#allocation216_spill] sm:$0xff] %v8221_v47 }
 0x854   :  { %v4027_v26 = vpop.permute.xlu0 %4026 }
 0x855   :  { %v4153_v60 = vmul.f32 %v4027_v26, %v9247_v30 }
 0x857   :  { %4217 = vrot.lane.b32.xlu1 %v4153_v60, %s5286_s2 }
 0x858   :  { %v4031_v4 = vpop.permute.xlu1 %4030  ;;  %v4039_v44 = vpop.permute.xlu0 %4038 }
 0x859   :  { %v4154_v59 = vmul.f32 %v4031_v4, %v6850_v10  ;;  %v4156_v31 = vmul.f32 %v4039_v44, %v6835_v53 }
 0x85b   :  { %4219 = vrot.lane.b32.xlu0 %v4154_v59, %s5286_s2 }
 0x85c   :  { %v4035_v27 = vpop.permute.xlu1 %4034  ;;  %v4047_v13 = vpop.permute.xlu0 %4046 }
 0x85d   :  { %v4155_v0 = vmul.f32 %v4035_v27, %v6802_v54  ;;  %v4158_v60 = vmul.f32 %v4047_v13, %v6905_v36 }
 0x85f   :  { %4221 = vrot.lane.b32.xlu1 %v4155_v0, %s5286_s2  ;;  %4223 = vrot.lane.b32.xlu0 %v4156_v31, %s5286_s2 }
 0x860   :  { %v4043_v47 = vpop.permute.xlu1 %4042  ;;  %v4055_v26 = vpop.permute.xlu0 %4054 }
 0x861   :  { %v4157_v18 = vmul.f32 %v4043_v47, %v6877_v58  ;;  %v4160_v44 = vmul.f32 %v4055_v26, %v6893_v45 }
 0x863   :  { %4225 = vrot.lane.b32.xlu1 %v4157_v18, %s5286_s2  ;;  %4227 = vrot.lane.b32.xlu0 %v4158_v60, %s5286_s2 }
 0x864   :  { %v4051_v4 = vpop.permute.xlu1 %4050  ;;  %v4063_v59 = vpop.permute.xlu0 %4062 }
 0x865   :  { %v4159_v27 = vmul.f32 %v4051_v4, %v6855_v63  ;;  %v4162_v13 = vmul.f32 %v4063_v59, %v6965_v50 }
 0x867   :  { %4229 = vrot.lane.b32.xlu1 %v4159_v27, %s5286_s2  ;;  %4231 = vrot.lane.b32.xlu0 %v4160_v44, %s5286_s2 }
 0x868   :  { %v4059_v31 = vpop.permute.xlu1 %4058  ;;  %v4071_v0 = vpop.permute.xlu0 %4070 }
 0x869   :  { %v4161_v47 = vmul.f32 %v4059_v31, %v6936_v17  ;;  %v4164_v26 = vmul.f32 %v4071_v0, %v6957_v9 }
 0x86b   :  { %4233 = vrot.lane.b32.xlu1 %v4161_v47, %s5286_s2  ;;  %4235 = vrot.lane.b32.xlu0 %v4162_v13, %s5286_s2 }
 0x86c   :  { %v4067_v18 = vpop.permute.xlu1 %4066  ;;  %v4079_v60 = vpop.permute.xlu0 %4078 }
 0x86d   :  { %v4163_v4 = vmul.f32 %v4067_v18, %v6917_v35  ;;  %v4166_v59 = vmul.f32 %v4079_v60, %v7034_v2 }
 0x86f   :  { %4237 = vrot.lane.b32.xlu1 %v4163_v4, %s5286_s2  ;;  %4239 = vrot.lane.b32.xlu0 %v4164_v26, %s5286_s2 }
 0x870   :  { %v4075_v44 = vpop.permute.xlu1 %4074  ;;  %v4087_v27 = vpop.permute.xlu0 %4086 }
 0x871   :  { %v4165_v31 = vmul.f32 %v4075_v44, %v6995_v28  ;;  %v4168_v0 = vmul.f32 %v4087_v27, %v7021_v62 }
 0x873   :  { %4241 = vrot.lane.b32.xlu1 %v4165_v31, %s5286_s2  ;;  %4243 = vrot.lane.b32.xlu0 %v4166_v59, %s5286_s2 }
 0x874   :  { %v4083_v13 = vpop.permute.xlu1 %4082  ;;  %v4095_v47 = vpop.permute.xlu0 %4094 }
 0x875   :  { %v4167_v18 = vmul.f32 %v4083_v13, %v6976_v55  ;;  %v4170_v60 = vmul.f32 %v4095_v47, %v9270_v7 }
 0x877   :  { %4245 = vrot.lane.b32.xlu1 %v4167_v18, %s5286_s2  ;;  %4247 = vrot.lane.b32.xlu0 %v4168_v0, %s5286_s2 }
 0x878   :  { %v4091_v26 = vpop.permute.xlu1 %4090  ;;  %v4103_v4 = vpop.permute.xlu0 %4102 }
 0x879   :  { %v4169_v44 = vmul.f32 %v4091_v26, %v9271_v40  ;;  %v4172_v27 = vmul.f32 %v4103_v4, %v7089_v5 }
 0x87b   :  { %4249 = vrot.lane.b32.xlu1 %v4169_v44, %s5286_s2  ;;  %4251 = vrot.lane.b32.xlu0 %v4170_v60, %s5286_s2 }
 0x87c   :  { %v4099_v59 = vpop.permute.xlu1 %4098  ;;  %v4111_v31 = vpop.permute.xlu0 %4110 }
 0x87d   :  { %v4171_v13 = vmul.f32 %v4099_v59, %v9272_v14  ;;  %v4174_v47 = vmul.f32 %v4111_v31, %v9249_v22 }
 0x87f   :  { %4253 = vrot.lane.b32.xlu1 %v4171_v13, %s5286_s2  ;;  %4255 = vrot.lane.b32.xlu0 %v4172_v27, %s5286_s2 }
 0x880   :  { %v4107_v0 = vpop.permute.xlu1 %4106  ;;  %v4119_v18 = vpop.permute.xlu0 %4118 }
 0x881   :  { %v4173_v26 = vmul.f32 %v4107_v0, %v9273_v8  ;;  %v4176_v4 = vmul.f32 %v4119_v18, %v9251_v49 }
 0x883   :  { %4257 = vrot.lane.b32.xlu1 %v4173_v26, %s5286_s2  ;;  %4259 = vrot.lane.b32.xlu0 %v4174_v47, %s5286_s2 }
 0x884   :  { %v4115_v60 = vpop.permute.xlu1 %4114  ;;  %v4127_v44 = vpop.permute.xlu0 %4126 }
 0x885   :  { %v4175_v59 = vmul.f32 %v4115_v60, %v9274_v16  ;;  %v4178_v31 = vmul.f32 %v4127_v44, %v9252_v56 }
 0x887   :  { %4261 = vrot.lane.b32.xlu1 %v4175_v59, %s5286_s2  ;;  %4263 = vrot.lane.b32.xlu0 %v4176_v4, %s5286_s2 }
 0x888   :  { %v4123_v27 = vpop.permute.xlu1 %4122  ;;  %v4135_v13 = vpop.permute.xlu0 %4134 }
 0x889   :  { %v4177_v0 = vmul.f32 %v4123_v27, %v9275_v57  ;;  %v4180_v18 = vmul.f32 %v4135_v13, %v9253_v42 }
 0x88b   :  { %4265 = vrot.lane.b32.xlu1 %v4177_v0, %s5286_s2  ;;  %4267 = vrot.lane.b32.xlu0 %v4178_v31, %s5286_s2 }
 0x88c   :  { %v4131_v47 = vpop.permute.xlu1 %4130  ;;  %v4143_v26 = vpop.permute.xlu0 %4142 }
 0x88d   :  { %v4179_v60 = vmul.f32 %v4131_v47, %v9206_v38  ;;  %v4182_v59 = vmul.f32 %v4143_v26, %v9207_v24  ;;  %v9276_v47 = vld [vmem:[#allocation22_spill] sm:$0xff]  ;;  %v9277_v26 = vld [vmem:[#allocation116_spill] sm:$0xff] }
 0x88f   :  { %4269 = vrot.lane.b32.xlu1 %v4179_v60, %s5286_s2  ;;  %4271 = vrot.lane.b32.xlu0 %v4180_v18, %s5286_s2  ;;  %v3353_v18 = vmul.f32 %v9276_v47, %v9247_v30 }
 0x890   :  { %v4139_v4 = vpop.permute.xlu1 %4138  ;;  %v4151_v27 = vpop.permute.xlu0 %4150 }
 0x891   :  { %v4181_v44 = vmul.f32 %v4139_v4, %v9208_v39  ;;  %v4184_v0 = vmul.f32 %v4151_v27, %v9209_v52  ;;  %v3673_v60 = vadd.f32 %v9277_v26, %v3353_v18  ;;  %v9278_v4 = vld [vmem:[#allocation28_spill] sm:$0xff]  ;;  %v9279_v39 = vld [vmem:[#allocation185_spill] sm:$0xff]  ;;  %v9282_v18 = vld [vmem:[#allocation186_spill] sm:$0xff] }
 0x892   :  { %v3354_v24 = vmul.f32 %v9278_v4, %v6850_v10  ;;  %v9283_v4 = vld [vmem:[#allocation187_spill] sm:$0xff] }
 0x893   :  { %4273 = vrot.lane.b32.xlu1 %v4181_v44, %s5286_s2  ;;  %4275 = vrot.lane.b32.xlu0 %v4182_v59, %s5286_s2  ;;  %v3993_v44 = vadd.f32 %v8152_v37, %v3673_v60 }
 0x894   :  { %v4147_v31 = vpop.permute.xlu1 %4146  ;;  %v3674_v42 = vadd.f32 %v9279_v39, %v3354_v24  ;;  %v9284_v24 = vld [vmem:[#allocation39_spill] sm:$0xff] }
 0x895   :  { %v4183_v13 = vmul.f32 %v4147_v31, %v9210_v23  ;;  %v9280_v31 = vld [vmem:[#allocation26_spill] sm:$0xff]  ;;  %v3357_v39 = vmul.f32 %v9284_v24, %v6877_v58  ;;  %v9289_v24 = vld [vmem:[#allocation163_spill] sm:$0xff] }
 0x896   :  { %v3355_v52 = vmul.f32 %v9280_v31, %v6802_v54  ;;  %v3994_v23 = vadd.f32 %v8156_v32, %v3674_v42 }
 0x897   :  { %4277 = vrot.lane.b32.xlu1 %v4183_v13, %s5286_s2  ;;  %4279 = vrot.lane.b32.xlu0 %v4184_v0, %s5286_s2  ;;  %v9281_v13 = vld [vmem:[#allocation23_spill] sm:$0xff] }
 0x898   :  { %v3356_v0 = vmul.f32 %v9281_v13, %v6835_v53  ;;  %v3675_v26 = vadd.f32 %v9282_v18, %v3355_v52  ;;  %v9287_v52 = vld [vmem:[#allocation188_spill] sm:$0xff] }
 0x89a   :  { %v3676_v37 = vadd.f32 %v9283_v4, %v3356_v0  ;;  %v3995_v31 = vadd.f32 %v8158_v51, %v3675_v26 }
 0x89c   :  { %v3996_v13 = vadd.f32 %v8162_v43, %v3676_v37 }
 0x8c9   :  { %v4218_v59 = vpop.permute.xlu1 %4217 }
 0x8ca   :  { %v4313_v27 = vadd.f32 %v4218_v59, %v3993_v44  ;;  %v9285_v44 = vld [vmem:[#allocation30_spill] sm:$0xff] }
 0x8cb   :  { %v3358_v59 = vmul.f32 %v9285_v44, %v6905_v36  ;;  %v3360_v44 = vmul.f32 %v9289_v24, %v6893_v45 }
 0x8cc   :  { %4377 = vrot.lane.b32.xlu1 %v4313_v27, %s5292_s9  ;;  %v9286_v27 = vld [vmem:[#allocation21_spill] sm:$0xff] }
 0x8cd   :  { %v4220_v47 = vpop.permute.xlu0 %4219  ;;  %v3677_v54 = vadd.f32 %v9286_v27, %v3357_v39  ;;  %v3678_v18 = vadd.f32 %v9287_v52, %v3358_v59  ;;  %v9291_v59 = vld [vmem:[#allocation190_spill] sm:$0xff]  ;;  %v9293_v52 = vld [vmem:[#allocation168_spill] sm:$0xff] }
 0x8ce   :  { %v4314_v60 = vadd.f32 %v4220_v47, %v3994_v23  ;;  %v9288_v47 = vld [vmem:[#allocation46_spill] sm:$0xff] }
 0x8cf   :  { %v3359_v4 = vmul.f32 %v9288_v47, %v6855_v63  ;;  %v3997_v51 = vadd.f32 %v8164_v12, %v3677_v54  ;;  %v3998_v43 = vadd.f32 %v8168_v34, %v3678_v18  ;;  %v3362_v54 = vmul.f32 %v9293_v52, %v6965_v50 }
 0x8d0   :  { %4379 = vrot.lane.b32.xlu0 %v4314_v60, %s5292_s9  ;;  %v9290_v60 = vld [vmem:[#allocation189_spill] sm:$0xff] }
 0x8d1   :  { %v4222_v42 = vpop.permute.xlu1 %4221  ;;  %v4224_v32 = vpop.permute.xlu0 %4223  ;;  %v3679_v39 = vadd.f32 %v9290_v60, %v3359_v4  ;;  %v9295_v4 = vld [vmem:[#allocation192_spill] sm:$0xff] }
 0x8d2   :  { %v4315_v0 = vadd.f32 %v4222_v42, %v3995_v31  ;;  %v4316_v23 = vadd.f32 %v4224_v32, %v3996_v13  ;;  %v3680_v31 = vadd.f32 %v9291_v59, %v3360_v44  ;;  %v9292_v32 = vld [vmem:[#allocation166_spill] sm:$0xff]  ;;  %v3682_v24 = vadd.f32 %v9295_v4, %v3362_v54  ;;  %v9300_v54 = vld [vmem:[#allocation27_spill] sm:$0xff] }
 0x8d3   :  { %v3361_v27 = vmul.f32 %v9292_v32, %v6936_v17  ;;  %v3999_v12 = vadd.f32 %v8170_v19, %v3679_v39 }
 0x8d4   :  { %4381 = vrot.lane.b32.xlu1 %v4315_v0, %s5292_s9  ;;  %4383 = vrot.lane.b32.xlu0 %v4316_v23, %s5292_s9  ;;  %v4000_v34 = vadd.f32 %v8173_v15, %v3680_v31  ;;  %v9294_v23 = vld [vmem:[#allocation191_spill] sm:$0xff]  ;;  %v4002_v60 = vadd.f32 %v8177_v6, %v3682_v24  ;;  %v9298_v31 = vld [vmem:[#allocation193_spill] sm:$0xff]  ;;  %v9303_v24 = vld [vmem:[#allocation196_spill] sm:$0xff] }
 0x8d5   :  { %v4226_v26 = vpop.permute.xlu1 %4225  ;;  %v4228_v37 = vpop.permute.xlu0 %4227  ;;  %v3681_v47 = vadd.f32 %v9294_v23, %v3361_v27 }
 0x8d6   :  { %v4317_v13 = vadd.f32 %v4226_v26, %v3997_v51  ;;  %v4318_v42 = vadd.f32 %v4228_v37, %v3998_v43  ;;  %v9296_v43 = vld [vmem:[#allocation29_spill] sm:$0xff]  ;;  %v9297_v37 = vld [vmem:[#allocation171_spill] sm:$0xff] }
 0x8d7   :  { %v3363_v26 = vmul.f32 %v9296_v43, %v6917_v35  ;;  %v3364_v19 = vmul.f32 %v9297_v37, %v6957_v9  ;;  %v4001_v15 = vadd.f32 %v8175_v25, %v3681_v47  ;;  %v9302_v47 = vld [vmem:[#allocation195_spill] sm:$0xff] }
 0x8d8   :  { %4385 = vrot.lane.b32.xlu1 %v4317_v13, %s5292_s9  ;;  %4387 = vrot.lane.b32.xlu0 %v4318_v42, %s5292_s9  ;;  %v9299_v42 = vld [vmem:[#allocation194_spill] sm:$0xff] }
 0x8d9   :  { %v4230_v18 = vpop.permute.xlu1 %4229  ;;  %v4232_v0 = vpop.permute.xlu0 %4231  ;;  %v3683_v13 = vadd.f32 %v9298_v31, %v3363_v26  ;;  %v3684_v32 = vadd.f32 %v9299_v42, %v3364_v19  ;;  %v9304_v26 = vld [vmem:[#allocation35_spill] sm:$0xff]  ;;  %v9305_v19 = vld [vmem:[#allocation176_spill] sm:$0xff] }
 0x8da   :  { %v4319_v44 = vadd.f32 %v4230_v18, %v3999_v12  ;;  %v4320_v51 = vadd.f32 %v4232_v0, %v4000_v34  ;;  %v3365_v12 = vmul.f32 %v9300_v54, %v6995_v28  ;;  %v9301_v34 = vld [vmem:[#allocation173_spill] sm:$0xff]  ;;  %v3367_v37 = vmul.f32 %v9304_v26, %v6976_v55 }
 0x8db   :  { %v3366_v25 = vmul.f32 %v9301_v34, %v7034_v2  ;;  %v4003_v6 = vadd.f32 %v8179_v3, %v3683_v13  ;;  %v4004_v18 = vadd.f32 %v8181_v48, %v3684_v32  ;;  %v3368_v3 = vmul.f32 %v9305_v19, %v7021_v62  ;;  %v9307_v13 = vld [vmem:[#allocation198_spill] sm:$0xff] }
 0x8dc   :  { %4389 = vrot.lane.b32.xlu1 %v4319_v44, %s5292_s9  ;;  %4391 = vrot.lane.b32.xlu0 %v4320_v51, %s5292_s9  ;;  %v3685_v4 = vadd.f32 %v9302_v47, %v3365_v12  ;;  %v9309_v12 = vld [vmem:[#allocation177_spill] sm:$0xff] }
 0x8dd   :  { %v4234_v39 = vpop.permute.xlu1 %4233  ;;  %v4236_v59 = vpop.permute.xlu0 %4235  ;;  %v3686_v44 = vadd.f32 %v9303_v24, %v3366_v25  ;;  %v3688_v42 = vadd.f32 %v9307_v13, %v3368_v3  ;;  %v9314_v3 = vld [vmem:[#allocation201_spill] sm:$0xff] }
 0x8de   :  { %v4321_v27 = vadd.f32 %v4234_v39, %v4001_v15  ;;  %v4322_v52 = vadd.f32 %v4236_v59, %v4002_v60  ;;  %v4005_v48 = vadd.f32 %v8183_v29, %v3685_v4  ;;  %v9306_v59 = vld [vmem:[#allocation197_spill] sm:$0xff]  ;;  %v3370_v29 = vmul.f32 %v9309_v12, %v9270_v7 }
 0x8df   :  { %v4006_v15 = vadd.f32 %v8185_v46, %v3686_v44  ;;  %v3687_v31 = vadd.f32 %v9306_v59, %v3367_v37  ;;  %v4008_v34 = vadd.f32 %v8189_v33, %v3688_v42  ;;  %v9312_v44 = vld [vmem:[#allocation165_spill] sm:$0xff]  ;;  %v9317_v42 = vld [vmem:[#allocation179_spill] sm:$0xff] }
 0x8e0   :  { %4393 = vrot.lane.b32.xlu1 %v4321_v27, %s5292_s9  ;;  %4395 = vrot.lane.b32.xlu0 %v4322_v52, %s5292_s9  ;;  %v9308_v52 = vld [vmem:[#allocation164_spill] sm:$0xff] }
 0x8e1   :  { %v4238_v0 = vpop.permute.xlu1 %4237  ;;  %v4240_v23 = vpop.permute.xlu0 %4239  ;;  %v3369_v54 = vmul.f32 %v9308_v52, %v9271_v40  ;;  %v4007_v46 = vadd.f32 %v8187_v1, %v3687_v31  ;;  %v9316_v31 = vld [vmem:[#allocation167_spill] sm:$0xff] }
 0x8e2   :  { %v4323_v51 = vadd.f32 %v4238_v0, %v4003_v6  ;;  %v4324_v43 = vadd.f32 %v4240_v23, %v4004_v18  ;;  %v9310_v18 = vld [vmem:[#allocation199_spill] sm:$0xff]  ;;  %v9311_v23 = vld [vmem:[#allocation200_spill] sm:$0xff]  ;;  %v3373_v13 = vmul.f32 %v9316_v31, %v9273_v8 }
 0x8e3   :  { %v3689_v0 = vadd.f32 %v9310_v18, %v3369_v54  ;;  %v3690_v47 = vadd.f32 %v9311_v23, %v3370_v29  ;;  %v9318_v54 = vld [vmem:[#allocation203_spill] sm:$0xff]  ;;  %v9319_v29 = vld [vmem:[#allocation204_spill] sm:$0xff]  ;;  %v9322_v23 = vld [vmem:[#allocation89_spill] sm:$0xff] }
 0x8e4   :  { %4397 = vrot.lane.b32.xlu1 %v4323_v51, %s5292_s9  ;;  %4399 = vrot.lane.b32.xlu0 %v4324_v43, %s5292_s9  ;;  %v3371_v51 = vmul.f32 %v9312_v44, %v9272_v14  ;;  %v9313_v43 = vld [vmem:[#allocation178_spill] sm:$0xff]  ;;  %v3693_v12 = vadd.f32 %v9318_v54, %v3373_v13  ;;  %v9323_v44 = vld [vmem:[#allocation205_spill] sm:$0xff]  ;;  %v9329_v13 = vld [vmem:[#allocation207_spill] sm:$0xff] }
 0x8e5   :  { %v4242_v60 = vpop.permute.xlu1 %4241  ;;  %v4244_v39 = vpop.permute.xlu0 %4243  ;;  %v3372_v1 = vmul.f32 %v9313_v43, %v7089_v5  ;;  %v4009_v33 = vadd.f32 %v8191_v21, %v3689_v0  ;;  %v4010_v26 = vadd.f32 %v8193_v11, %v3690_v47  ;;  %v3374_v21 = vmul.f32 %v9317_v42, %v9249_v22  ;;  %v9321_v0 = vld [vmem:[#allocation180_spill] sm:$0xff]  ;;  %v9324_v43 = vld [vmem:[#allocation206_spill] sm:$0xff] }
 0x8e6   :  { %v4325_v32 = vadd.f32 %v4242_v60, %v4005_v48  ;;  %v4326_v27 = vadd.f32 %v4244_v39, %v4006_v15  ;;  %v3691_v48 = vadd.f32 %v9314_v3, %v3371_v51  ;;  %v9315_v15 = vld [vmem:[#allocation202_spill] sm:$0xff]  ;;  %v9326_v3 = vld [vmem:[#allocation181_spill] sm:$0xff] }
 0x8e7   :  { %v3692_v60 = vadd.f32 %v9315_v15, %v3372_v1 }
 0x8e8   :  { %4401 = vrot.lane.b32.xlu1 %v4325_v32, %s5292_s9  ;;  %4403 = vrot.lane.b32.xlu0 %v4326_v27, %s5292_s9  ;;  %v4011_v11 = vadd.f32 %v8195_v20, %v3691_v48  ;;  %v3376_v20 = vmul.f32 %v9321_v0, %v9251_v49  ;;  %v9327_v48 = vld [vmem:[#allocation84_spill] sm:$0xff] }
 0x8e9   :  { %v4246_v25 = vpop.permute.xlu1 %4245  ;;  %v4248_v6 = vpop.permute.xlu0 %4247  ;;  %v4012_v32 = vadd.f32 %v8197_v61, %v3692_v60  ;;  %v4013_v61 = vadd.f32 %v8199_v41, %v3693_v12  ;;  %v3378_v41 = vmul.f32 %v9326_v3, %v9252_v56  ;;  %v9328_v60 = vld [vmem:[#allocation82_spill] sm:$0xff] }
 0x8ea   :  { %v4327_v4 = vadd.f32 %v4246_v25, %v4007_v46  ;;  %v4328_v24 = vadd.f32 %v4248_v6, %v4008_v34  ;;  %v3694_v46 = vadd.f32 %v9319_v29, %v3374_v21  ;;  %v9320_v6 = vld [vmem:[#allocation169_spill] sm:$0xff]  ;;  %v3696_v1 = vadd.f32 %v9324_v43, %v3376_v20  ;;  %v9330_v21 = vld [vmem:[#allocation208_spill] sm:$0xff]  ;;  %v9332_v12 = vld [vmem:[#allocation94_spill] sm:$0xff] }
 0x8eb   :  { %v3375_v18 = vmul.f32 %v9320_v6, %v9274_v16  ;;  %v9333_v29 = vld [vmem:[#allocation182_spill] sm:$0xff]  ;;  %v9335_v6 = vld [vmem:[#allocation19_spill] sm:$0xff] }
 0x8ec   :  { %4405 = vrot.lane.b32.xlu1 %v4327_v4, %s5292_s9  ;;  %4407 = vrot.lane.b32.xlu0 %v4328_v24, %s5292_s9  ;;  %v4014_v47 = vadd.f32 %v9322_v23, %v3694_v46  ;;  %v3380_v46 = vmul.f32 %v9333_v29, %v9332_v12  ;;  %v9339_v43 = vld [vmem:[#allocation174_spill] sm:$0xff] }
 0x8ed   :  { %v4250_v37 = vpop.permute.xlu1 %4249  ;;  %v4252_v19 = vpop.permute.xlu0 %4251  ;;  %v3695_v51 = vadd.f32 %v9323_v44, %v3375_v18 }
 0x8ee   :  { %v4329_v39 = vadd.f32 %v4250_v37, %v4009_v33  ;;  %v4330_v59 = vadd.f32 %v4252_v19, %v4010_v26  ;;  %v9325_v37 = vld [vmem:[#allocation170_spill] sm:$0xff] }
 0x8ef   :  { %v3377_v19 = vmul.f32 %v9325_v37, %v9275_v57  ;;  %v4015_v15 = vadd.f32 %v9327_v48, %v3695_v51  ;;  %v9338_v51 = vld [vmem:[#allocation32_spill] sm:$0xff] }
 0x8f0   :  { %4409 = vrot.lane.b32.xlu1 %v4329_v39, %s5292_s9  ;;  %4411 = vrot.lane.b32.xlu0 %v4330_v59, %s5292_s9  ;;  %v4016_v39 = vadd.f32 %v9328_v60, %v3696_v1  ;;  %v3381_v1 = vmul.f32 %v9339_v43, %v9338_v51 }
 0x8f1   :  { %v4254_v27 = vpop.permute.xlu1 %4253  ;;  %v4256_v52 = vpop.permute.xlu0 %4255  ;;  %v3697_v42 = vadd.f32 %v9329_v13, %v3377_v19  ;;  %v9342_v19 = vld [vmem:[#allocation24_spill] sm:$0xff] }
 0x8f2   :  { %v4331_v34 = vadd.f32 %v4254_v27, %v4011_v11  ;;  %v4332_v25 = vadd.f32 %v4256_v52, %v4012_v32  ;;  %v3698_v11 = vadd.f32 %v9330_v21, %v3378_v41  ;;  %v9331_v52 = vld [vmem:[#allocation172_spill] sm:$0xff]  ;;  %v9343_v41 = vld [vmem:[#allocation18_spill] sm:$0xff] }
 0x8f3   :  { %v3379_v54 = vmul.f32 %v9331_v52, %v9206_v38  ;;  %v9348_v52 = vld [vmem:[#allocation100_spill] sm:$0xff] }
 0x8f4   :  { %4413 = vrot.lane.b32.xlu1 %v4331_v34, %s5292_s9  ;;  %4415 = vrot.lane.b32.xlu0 %v4332_v25, %s5292_s9  ;;  %v9334_v34 = vld [vmem:[#allocation96_spill] sm:$0xff]  ;;  %v4018_v18 = vadd.f32 %v9335_v6, %v3698_v11  ;;  %v9346_v11 = vld [vmem:[#allocation121_spill] sm:$0xff] }
 0x8f5   :  { %v4258_v4 = vpop.permute.xlu1 %4257  ;;  %v4260_v24 = vpop.permute.xlu0 %4259  ;;  %v4017_v25 = vadd.f32 %v9334_v34, %v3697_v42 }
 0x8f6   :  { %v4333_v33 = vadd.f32 %v4258_v4, %v4013_v61  ;;  %v4334_v26 = vadd.f32 %v4260_v24, %v4014_v47  ;;  %v9336_v61 = vld [vmem:[#allocation209_spill] sm:$0xff]  ;;  %v9337_v47 = vld [vmem:[#allocation210_spill] sm:$0xff] }
 0x8f7   :  { %v3699_v23 = vadd.f32 %v9336_v61, %v3379_v54  ;;  %v3700_v4 = vadd.f32 %v9337_v47, %v3380_v46  ;;  %v9349_v54 = vld [vmem:[#allocation184_spill] sm:$0xff]  ;;  %v9350_v46 = vld [vmem:[#allocation25_spill] sm:$0xff] }
 0x8f8   :  { %4417 = vrot.lane.b32.xlu1 %v4333_v33, %s5292_s9  ;;  %4419 = vrot.lane.b32.xlu0 %v4334_v26, %s5292_s9  ;;  %v9340_v33 = vld [vmem:[#allocation7_spill] sm:$0xff]  ;;  %v3384_v29 = vmul.f32 %v9349_v54, %v9348_v52 }
 0x8f9   :  { %v4262_v59 = vpop.permute.xlu1 %4261  ;;  %v4264_v31 = vpop.permute.xlu0 %4263  ;;  %v9341_v26 = vld [vmem:[#allocation183_spill] sm:$0xff]  ;;  %v4019_v3 = vadd.f32 %v9342_v19, %v3699_v23  ;;  %v4020_v48 = vadd.f32 %v9343_v41, %v3700_v4  ;;  %v9353_v23 = vld [vmem:[#allocation214_spill] sm:$0xff] }
 0x8fa   :  { %v4335_v32 = vadd.f32 %v4262_v59, %v4015_v15  ;;  %v4336_v27 = vadd.f32 %v4264_v31, %v4016_v39  ;;  %v3382_v37 = vmul.f32 %v9341_v26, %v9340_v33  ;;  %v9344_v39 = vld [vmem:[#allocation211_spill] sm:$0xff]  ;;  %v9345_v31 = vld [vmem:[#allocation212_spill] sm:$0xff]  ;;  %v3704_v47 = vadd.f32 %v9353_v23, %v3384_v29 }
 0x8fb   :  { %v3701_v59 = vadd.f32 %v9344_v39, %v3381_v1  ;;  %v9355_v1 = vld [vmem:[#allocation216_spill] sm:$0xff]  ;;  %v9362_v29 = vld [vmem:[#allocation87_spill] sm:$0xff] }
 0x8fc   :  { %4421 = vrot.lane.b32.xlu1 %v4335_v32, %s5292_s9  ;;  %4423 = vrot.lane.b32.xlu0 %v4336_v27, %s5292_s9  ;;  %v3702_v13 = vadd.f32 %v9345_v31, %v3382_v37  ;;  %v9347_v32 = vld [vmem:[#allocation175_spill] sm:$0xff]  ;;  %v4024_v26 = vadd.f32 %v9355_v1, %v3704_v47 }
 0x8fd   :  { %v4266_v0 = vpop.permute.xlu1 %4265  ;;  %v4268_v20 = vpop.permute.xlu0 %4267  ;;  %v3383_v27 = vmul.f32 %v9347_v32, %v9346_v11  ;;  %v4021_v34 = vadd.f32 %v9350_v46, %v3701_v59  ;;  %v9358_v59 = vld [vmem:[#allocation81_spill] sm:$0xff]  ;;  %v9363_v46 = vld [vmem:[#allocation67_spill] sm:$0xff] }
 0x8fe   :  { %v4337_v24 = vadd.f32 %v4266_v0, %v4017_v25  ;;  %v4338_v44 = vadd.f32 %v4268_v20, %v4018_v18  ;;  %v9351_v25 = vld [vmem:[#allocation20_spill] sm:$0xff]  ;;  %v9352_v20 = vld [vmem:[#allocation213_spill] sm:$0xff]  ;;  %v9368_v47 = vld [vmem:[#allocation75_spill] sm:$0xff] }
 0x8ff   :  { %v4022_v6 = vadd.f32 %v9351_v25, %v3702_v13  ;;  %v3703_v61 = vadd.f32 %v9352_v20, %v3383_v27  ;;  %v9359_v13 = vld [vmem:[#allocation41_spill] sm:$0xff]  ;;  %v9361_v27 = vld [vmem:[#allocation68_spill] sm:$0xff]  ;;  %v9364_v25 = vld [vmem:[#allocation115_spill] sm:$0xff] }
 0x900   :  { %4425 = vrot.lane.b32.xlu1 %v4337_v24, %s5292_s9  ;;  %4427 = vrot.lane.b32.xlu0 %v4338_v44, %s5292_s9  ;;  %v9354_v44 = vld [vmem:[#allocation215_spill] sm:$0xff]  ;;  %v1723_v54 = vmul.f32 %v9361_v27, %v6835_v53 }
 0x901   :  { %v4270_v15 = vpop.permute.xlu1 %4269  ;;  %v4272_v60 = vpop.permute.xlu0 %4271  ;;  %v4023_v43 = vadd.f32 %v9354_v44, %v3703_v61  ;;  %v9369_v44 = vld [vmem:[#allocation42_spill] sm:$0xff] }
 0x902   :  { %v4339_v42 = vadd.f32 %v4270_v15, %v4019_v3  ;;  %v4340_v21 = vadd.f32 %v4272_v60, %v4020_v48  ;;  %v9356_v48 = vld [vmem:[#allocation66_spill] sm:$0xff]  ;;  %v9357_v60 = vld [vmem:[#allocation69_spill] sm:$0xff] }
 0x903   :  { %v1720_v15 = vmul.f32 %v9356_v48, %v9247_v30  ;;  %v1721_v39 = vmul.f32 %v9357_v60, %v6850_v10  ;;  %v9367_v10 = vld [vmem:[#allocation113_spill] sm:$0xff] }
 0x904   :  { %4429 = vrot.lane.b32.xlu1 %v4339_v42, %s5292_s9  ;;  %4431 = vrot.lane.b32.xlu0 %v4340_v21, %s5292_s9  ;;  %v9360_v21 = vld [vmem:[#allocation125_spill] sm:$0xff] }
 0x905   :  { %v4274_v18 = vpop.permute.xlu1 %4273  ;;  %v4276_v0 = vpop.permute.xlu0 %4275  ;;  %v2040_v31 = vadd.f32 %v9358_v59, %v1720_v15  ;;  %v2041_v32 = vadd.f32 %v9360_v21, %v1721_v39  ;;  %v9375_v39 = vld [vmem:[#allocation119_spill] sm:$0xff]  ;;  %v9377_v21 = vld [vmem:[#allocation114_spill] sm:$0xff] }
 0x906   :  { %v4341_v4 = vadd.f32 %v4274_v18, %v4021_v34  ;;  %v4342_v24 = vadd.f32 %v4276_v0, %v4022_v6  ;;  %v1722_v34 = vmul.f32 %v9363_v46, %v9362_v29  ;;  %v9365_v18 = vld [vmem:[#allocation47_spill] sm:$0xff]  ;;  %v9366_v0 = vld [vmem:[#allocation88_spill] sm:$0xff]  ;;  %v9380_v46 = vld [vmem:[#allocation133_spill] sm:$0xff] }
 0x907   :  { %v2360_v42 = vadd.f32 %v9359_v13, %v2040_v31  ;;  %v2043_v30 = vadd.f32 %v9365_v18, %v1723_v54  ;;  %v2361_v20 = vadd.f32 %v9366_v0, %v2041_v32  ;;  %v9376_v13 = vld [vmem:[#allocation71_spill] sm:$0xff] }
 0x908   :  { %4433 = vrot.lane.b32.xlu1 %v4341_v4, %s5292_s9  ;;  %4435 = vrot.lane.b32.xlu0 %v4342_v24, %s5292_s9  ;;  %v2042_v61 = vadd.f32 %v9367_v10, %v1722_v34  ;;  %v1725_v4 = vmul.f32 %v9368_v47, %v6905_v36  ;;  %v9374_v36 = vld [vmem:[#allocation74_spill] sm:$0xff]  ;;  %v9379_v54 = vld [vmem:[#allocation131_spill] sm:$0xff]  ;;  %v9381_v34 = vld [vmem:[#allocation124_spill] sm:$0xff] }
 0x909   :  { %v4278_v37 = vpop.permute.xlu1 %4277  ;;  %v4280_v19 = vpop.permute.xlu0 %4279  ;;  %v2680_v6 = vadd.f32 %v9364_v25, %v2360_v42  ;;  %v1727_v60 = vmul.f32 %v9374_v36, %v6893_v45  ;;  %v1726_v42 = vmul.f32 %v9376_v13, %v6855_v63  ;;  %v9383_v63 = vld [vmem:[#allocation72_spill] sm:$0xff] }
 0x90a   :  { %v4343_v3 = vadd.f32 %v4278_v37, %v4023_v43  ;;  %v4344_v41 = vadd.f32 %v4280_v19, %v4024_v26  ;;  %v2362_v53 = vadd.f32 %v9369_v44, %v2042_v61  ;;  %v9370_v43 = vld [vmem:[#allocation73_spill] sm:$0xff]  ;;  %v9372_v19 = vld [vmem:[#allocation127_spill] sm:$0xff]  ;;  %v9393_v13 = vld [vmem:[#allocation92_spill] sm:$0xff] }
 0x90b   :  { %v1724_v1 = vmul.f32 %v9370_v43, %v6877_v58  ;;  %v9371_v26 = vld [vmem:[#allocation117_spill] sm:$0xff]  ;;  %v2047_v45 = vadd.f32 %v9380_v46, %v1727_v60  ;;  %v9398_v46 = vld [vmem:[#allocation3_spill] sm:$0xff] }
 0x90c   :  { %4437 = vrot.lane.b32.xlu1 %v4343_v3, %s5292_s9  ;;  %4439 = vrot.lane.b32.xlu0 %v4344_v41, %s5292_s9  ;;  %v2363_v37 = vadd.f32 %v9371_v26, %v2043_v30  ;;  %v2681_v3 = vadd.f32 %v9372_v19, %v2361_v20  ;;  %v9373_v41 = vld [vmem:[#allocation137_spill] sm:$0xff]  ;;  %v2682_v32 = vadd.f32 %v9377_v21, %v2362_v53  ;;  %v9387_v53 = vld [vmem:[#allocation122_spill] sm:$0xff] }
 0x90d   :  { %v2045_v48 = vadd.f32 %v9373_v41, %v1725_v4  ;;  %v2044_v59 = vadd.f32 %v9375_v39, %v1724_v1  ;;  %v9378_v58 = vld [vmem:[#allocation45_spill] sm:$0xff]  ;;  %v1729_v20 = vmul.f32 %v9383_v63, %v6965_v50  ;;  %v9386_v50 = vld [vmem:[#allocation120_spill] sm:$0xff]  ;;  %v2367_v43 = vadd.f32 %v9387_v53, %v2047_v45  ;;  %v9388_v1 = vld [vmem:[#allocation139_spill] sm:$0xff] }
 0x90e   :  { %v2683_v27 = vadd.f32 %v9378_v58, %v2363_v37  ;;  %v9385_v4 = vld [vmem:[#allocation129_spill] sm:$0xff]  ;;  %v9389_v37 = vld [vmem:[#allocation8_spill] sm:$0xff]  ;;  %v9390_v41 = vld [vmem:[#allocation70_spill] sm:$0xff] }
 0x90f   :  { %v2364_v29 = vadd.f32 %v9379_v54, %v2044_v59  ;;  %v2365_v25 = vadd.f32 %v9381_v34, %v2045_v48  ;;  %v1731_v48 = vmul.f32 %v9390_v41, %v6957_v9  ;;  %v9392_v59 = vld [vmem:[#allocation77_spill] sm:$0xff]  ;;  %v9394_v9 = vld [vmem:[#allocation135_spill] sm:$0xff]  ;;  %v9400_v63 = vld [vmem:[#allocation90_spill] sm:$0xff] }
 0x910   :  { %v2687_v21 = vadd.f32 %v9394_v9, %v2367_v43  ;;  %v9408_v41 = vld [vmem:[#allocation85_spill] sm:$0xff]  ;;  %v9414_v9 = vld [vmem:[#allocation11_spill] sm:$0xff] }
 0x911   :  { %v2684_v44 = vadd.f32 %v9386_v50, %v2364_v29  ;;  %v2685_v26 = vadd.f32 %v9388_v1, %v2365_v25  ;;  %v9397_v29 = vld [vmem:[#allocation6_spill] sm:$0xff]  ;;  %v9406_v1 = vld [vmem:[#allocation76_spill] sm:$0xff] }
 0x93e   :  { %v4378_v23 = vpop.permute.xlu1 %4377 }
 0x93f   :  { %v4474_v24 = vsel %vm4473_vm3, %v2680_v6, %v4378_v23  ;;  %v9382_v6 = vld [vmem:[#allocation118_spill] sm:$0xff]  ;;  %v9384_v23 = vld [vmem:[#allocation79_spill] sm:$0xff] }
 0x940   :  { %4506 = vst.msk [vmem:[%s8774_s7] sm:$0xff] %vm132_vm0, %v4474_v24  ;;  %v2046_v18 = vadd.f32 %v9382_v6, %v1726_v42  ;;  %v1728_v47 = vmul.f32 %v9384_v23, %v6936_v17  ;;  %v2049_v17 = vadd.f32 %v9389_v37, %v1729_v20  ;;  %v9399_v6 = vld [vmem:[#allocation78_spill] sm:$0xff]  ;;  %v1732_v20 = vmul.f32 %v9400_v63, %v6995_v28  ;;  %v9407_v37 = vld [vmem:[#allocation15_spill] sm:$0xff] }
 0x942   :  { %v4380_v15 = vpop.permute.xlu0 %4379  ;;  %v2366_v24 = vadd.f32 %v9385_v4, %v2046_v18  ;;  %v1733_v18 = vmul.f32 %v9399_v6, %v7034_v2  ;;  %v9402_v2 = vld [vmem:[#allocation37_spill] sm:$0xff] }
 0x943   :  { %v4475_v31 = vsel %vm4473_vm3, %v2681_v3, %v4380_v15  ;;  %v9391_v15 = vld [vmem:[#allocation2_spill] sm:$0xff] }
 0x944   :  { %4507 = vst.msk [vmem:[%s8774_s7 + $0x8] sm:$0xff] %vm132_vm0, %v4475_v31  ;;  %v2048_v36 = vadd.f32 %v9391_v15, %v1728_v47  ;;  %v1730_v31 = vmul.f32 %v9392_v59, %v6917_v35  ;;  %v2686_v42 = vadd.f32 %v9393_v13, %v2366_v24  ;;  %v2369_v35 = vadd.f32 %v9397_v29, %v2049_v17  ;;  %v9403_v47 = vld [vmem:[#allocation36_spill] sm:$0xff]  ;;  %v9409_v15 = vld [vmem:[#allocation31_spill] sm:$0xff] }
 0x945   :  { %v9404_v24 = vld [vmem:[#allocation44_spill] sm:$0xff]  ;;  %v2052_v17 = vadd.f32 %v9407_v37, %v1732_v20  ;;  %v9421_v20 = vld [vmem:[#allocation145_spill] sm:$0xff] }
 0x946   :  { %v4382_v30 = vpop.permute.xlu1 %4381  ;;  %v4384_v0 = vpop.permute.xlu0 %4383  ;;  %v2050_v45 = vadd.f32 %v9398_v46, %v1730_v31  ;;  %v2689_v50 = vadd.f32 %v9404_v24, %v2369_v35  ;;  %v9412_v31 = vld [vmem:[#allocation49_spill] sm:$0xff]  ;;  %v9416_v46 = vld [vmem:[#allocation99_spill] sm:$0xff] }
 0x947   :  { %v4476_v10 = vsel %vm4473_vm3, %v2682_v32, %v4382_v30  ;;  %v4477_v61 = vsel %vm4473_vm3, %v2683_v27, %v4384_v0  ;;  %v9395_v32 = vld [vmem:[#allocation33_spill] sm:$0xff]  ;;  %v9396_v27 = vld [vmem:[#allocation40_spill] sm:$0xff] }
 0x948   :  { %4508 = vst.msk [vmem:[%s8774_s7 + $0x10] sm:$0xff] %vm132_vm0, %v4476_v10  ;;  %4509 = vst.msk [vmem:[%s8774_s7 + $0x18] sm:$0xff] %vm132_vm0, %v4477_v61  ;;  %v2368_v58 = vadd.f32 %v9395_v32, %v2048_v36  ;;  %v2051_v54 = vadd.f32 %v9396_v27, %v1731_v48  ;;  %v9401_v10 = vld [vmem:[#allocation34_spill] sm:$0xff]  ;;  %v1734_v48 = vmul.f32 %v9408_v41, %v6976_v55 }
 0x949   :  { %v2370_v61 = vadd.f32 %v9401_v10, %v2050_v45  ;;  %v9415_v27 = vld [vmem:[#allocation86_spill] sm:$0xff]  ;;  %v1736_v45 = vmul.f32 %v9416_v46, %v9271_v40  ;;  %v9438_v46 = vld [vmem:[#allocation95_spill] sm:$0xff] }
 0x94a   :  { %v4386_v19 = vpop.permute.xlu1 %4385  ;;  %v4388_v3 = vpop.permute.xlu0 %4387  ;;  %v2688_v23 = vadd.f32 %v9402_v2, %v2368_v58  ;;  %v2371_v4 = vadd.f32 %v9403_v47, %v2051_v54  ;;  %v1737_v54 = vmul.f32 %v9415_v27, %v9270_v7  ;;  %v9418_v7 = vld [vmem:[#allocation14_spill] sm:$0xff]  ;;  %v9422_v2 = vld [vmem:[#allocation83_spill] sm:$0xff] }
 0x94b   :  { %v4478_v60 = vsel %vm4473_vm3, %v2684_v44, %v4386_v19  ;;  %v4479_v39 = vsel %vm4473_vm3, %v2685_v26, %v4388_v3  ;;  %v9405_v44 = vld [vmem:[#allocation48_spill] sm:$0xff]  ;;  %v1735_v26 = vmul.f32 %v9406_v1, %v7021_v62  ;;  %v2690_v36 = vadd.f32 %v9409_v15, %v2370_v61  ;;  %v9410_v62 = vld [vmem:[#allocation51_spill] sm:$0xff]  ;;  %v9423_v47 = vld [vmem:[#allocation134_spill] sm:$0xff] }
 0x94c   :  { %4510 = vst.msk [vmem:[%s8774_s7 + $0x20] sm:$0xff] %vm132_vm0, %v4478_v60  ;;  %4511 = vst.msk [vmem:[%s8774_s7 + $0x28] sm:$0xff] %vm132_vm0, %v4479_v39  ;;  %v2053_v28 = vadd.f32 %v9405_v44, %v1733_v18  ;;  %v2691_v60 = vadd.f32 %v9410_v62, %v2371_v4  ;;  %v9411_v39 = vld [vmem:[#allocation12_spill] sm:$0xff]  ;;  %v9419_v18 = vld [vmem:[#allocation126_spill] sm:$0xff]  ;;  %v2057_v40 = vadd.f32 %v9421_v20, %v1737_v54 }
 0x94d   :  { %v2372_v59 = vadd.f32 %v9411_v39, %v2052_v17  ;;  %v2055_v13 = vadd.f32 %v9412_v31, %v1735_v26  ;;  %v2056_v4 = vadd.f32 %v9423_v47, %v1736_v45  ;;  %v9424_v44 = vld [vmem:[#allocation97_spill] sm:$0xff]  ;;  %v9427_v26 = vld [vmem:[#allocation64_spill] sm:$0xff]  ;;  %v9428_v17 = vld [vmem:[#allocation142_spill] sm:$0xff]  ;;  %v1743_v45 = vmul.f32 %v9438_v46, %v9251_v49 }
 0x94e   :  { %v4390_v34 = vpop.permute.xlu1 %4389  ;;  %v4392_v25 = vpop.permute.xlu0 %4391  ;;  %v9430_v41 = vld [vmem:[#allocation130_spill] sm:$0xff]  ;;  %v9432_v31 = vld [vmem:[#allocation104_spill] sm:$0xff]  ;;  %v9437_v54 = vld [vmem:[#allocation53_spill] sm:$0xff] }
 0x94f   :  { %v4480_v30 = vsel %vm4473_vm3, %v2686_v42, %v4390_v34  ;;  %v4481_v0 = vsel %vm4473_vm3, %v2687_v21, %v4392_v25  ;;  %v9413_v42 = vld [vmem:[#allocation128_spill] sm:$0xff]  ;;  %v2054_v21 = vadd.f32 %v9414_v9, %v1734_v48  ;;  %v2692_v6 = vadd.f32 %v9418_v7, %v2372_v59  ;;  %v9431_v62 = vld [vmem:[#allocation98_spill] sm:$0xff]  ;;  %v9446_v47 = vld [vmem:[#allocation5_spill] sm:$0xff] }
 0x950   :  { %4512 = vst.msk [vmem:[%s8774_s7 + $0x30] sm:$0xff] %vm132_vm0, %v4480_v30  ;;  %4513 = vst.msk [vmem:[%s8774_s7 + $0x38] sm:$0xff] %vm132_vm0, %v4481_v0  ;;  %v2373_v55 = vadd.f32 %v9413_v42, %v2053_v28  ;;  %v9417_v34 = vld [vmem:[#allocation52_spill] sm:$0xff]  ;;  %v2375_v30 = vadd.f32 %v9419_v18, %v2055_v13  ;;  %v9420_v0 = vld [vmem:[#allocation61_spill] sm:$0xff]  ;;  %v1738_v28 = vmul.f32 %v9424_v44, %v9272_v14 }
 0x951   :  { %v2374_v25 = vadd.f32 %v9417_v34, %v2054_v21  ;;  %v2376_v37 = vadd.f32 %v9427_v26, %v2056_v4  ;;  %v1740_v13 = vmul.f32 %v9432_v31, %v9273_v8  ;;  %v9433_v42 = vld [vmem:[#allocation65_spill] sm:$0xff]  ;;  %v9435_v21 = vld [vmem:[#allocation138_spill] sm:$0xff]  ;;  %v9442_v49 = vld [vmem:[#allocation144_spill] sm:$0xff] }
 0x952   :  { %v4394_v53 = vpop.permute.xlu1 %4393  ;;  %v4396_v43 = vpop.permute.xlu0 %4395  ;;  %v2693_v63 = vadd.f32 %v9420_v0, %v2373_v55  ;;  %v2058_v48 = vadd.f32 %v9430_v41, %v1738_v28  ;;  %v9439_v34 = vld [vmem:[#allocation9_spill] sm:$0xff]  ;;  %v9440_v18 = vld [vmem:[#allocation102_spill] sm:$0xff]  ;;  %v9441_v0 = vld [vmem:[#allocation132_spill] sm:$0xff] }
 0x953   :  { %v4482_v19 = vsel %vm4473_vm3, %v2688_v23, %v4394_v53  ;;  %v4483_v3 = vsel %vm4473_vm3, %v2689_v50, %v4396_v43  ;;  %v1739_v23 = vmul.f32 %v9422_v2, %v7089_v5  ;;  %v9425_v53 = vld [vmem:[#allocation10_spill] sm:$0xff]  ;;  %v9426_v5 = vld [vmem:[#allocation56_spill] sm:$0xff]  ;;  %v9447_v44 = vld [vmem:[#allocation103_spill] sm:$0xff] }
 0x954   :  { %4514 = vst.msk [vmem:[%s8774_s7 + $0x40] sm:$0xff] %vm132_vm0, %v4482_v19  ;;  %4515 = vst.msk [vmem:[%s8774_s7 + $0x48] sm:$0xff] %vm132_vm0, %v4483_v3  ;;  %v2694_v43 = vadd.f32 %v9425_v53, %v2374_v25  ;;  %v2695_v1 = vadd.f32 %v9426_v5, %v2375_v30  ;;  %v9429_v3 = vld [vmem:[#allocation140_spill] sm:$0xff]  ;;  %v2378_v55 = vadd.f32 %v9433_v42, %v2058_v48  ;;  %v9449_v26 = vld [vmem:[#allocation149_spill] sm:$0xff] }
 0x955   :  { %v2059_v19 = vadd.f32 %v9428_v17, %v1739_v23  ;;  %v2377_v14 = vadd.f32 %v9429_v3, %v2057_v40  ;;  %v2060_v25 = vadd.f32 %v9439_v34, %v1740_v13  ;;  %v1742_v30 = vmul.f32 %v9440_v18, %v9274_v16  ;;  %v9443_v40 = vld [vmem:[#allocation150_spill] sm:$0xff]  ;;  %v9445_v23 = vld [vmem:[#allocation13_spill] sm:$0xff]  ;;  %v9448_v5 = vld [vmem:[#allocation80_spill] sm:$0xff] }
 0x956   :  { %v4398_v32 = vpop.permute.xlu1 %4397  ;;  %v4400_v58 = vpop.permute.xlu0 %4399  ;;  %v1745_v28 = vmul.f32 %v9447_v44, %v9252_v56  ;;  %v9450_v56 = vld [vmem:[#allocation38_spill] sm:$0xff]  ;;  %v9463_v34 = vld [vmem:[#allocation111_spill] sm:$0xff] }
 0x957   :  { %v4484_v29 = vsel %vm4473_vm3, %v2690_v36, %v4398_v32  ;;  %v4485_v35 = vsel %vm4473_vm3, %v2691_v60, %v4400_v58  ;;  %v1741_v60 = vmul.f32 %v9431_v62, %v9249_v22  ;;  %v9434_v22 = vld [vmem:[#allocation136_spill] sm:$0xff]  ;;  %v2379_v32 = vadd.f32 %v9435_v21, %v2059_v19  ;;  %v9436_v58 = vld [vmem:[#allocation147_spill] sm:$0xff]  ;;  %v9451_v19 = vld [vmem:[#allocation50_spill] sm:$0xff] }
 0x958   :  { %4516 = vst.msk [vmem:[%s8774_s7 + $0x50] sm:$0xff] %vm132_vm0, %v4484_v29  ;;  %4517 = vst.msk [vmem:[%s8774_s7 + $0x58] sm:$0xff] %vm132_vm0, %v4485_v35  ;;  %v2696_v9 = vadd.f32 %v9434_v22, %v2376_v37  ;;  %v2697_v27 = vadd.f32 %v9436_v58, %v2377_v14  ;;  %v2062_v4 = vadd.f32 %v9446_v47, %v1742_v30  ;;  %v9452_v14 = vld [vmem:[#allocation155_spill] sm:$0xff]  ;;  %v9453_v48 = vld [vmem:[#allocation62_spill] sm:$0xff] }
 0x959   :  { %v2061_v8 = vadd.f32 %v9437_v54, %v1741_v60  ;;  %v2699_v20 = vadd.f32 %v9442_v49, %v2379_v32  ;;  %v9454_v62 = vld [vmem:[#allocation101_spill] sm:$0xff]  ;;  %v9456_v42 = vld [vmem:[#allocation110_spill] sm:$0xff]  ;;  %v9457_v22 = vld [vmem:[#allocation4_spill] sm:$0xff] }
 0x95a   :  { %v4402_v10 = vpop.permute.xlu1 %4401  ;;  %v4404_v61 = vpop.permute.xlu0 %4403  ;;  %v2382_v37 = vadd.f32 %v9449_v26, %v2062_v4  ;;  %v1747_v60 = vmul.f32 %v9454_v62, %v9332_v12  ;;  %v9458_v12 = vld [vmem:[#allocation154_spill] sm:$0xff]  ;;  %v9459_v32 = vld [vmem:[#allocation59_spill] sm:$0xff]  ;;  %v9479_v62 = vld [vmem:[#allocation157_spill] sm:$0xff] }
 0x95b   :  { %v4486_v24 = vsel %vm4473_vm3, %v2692_v6, %v4402_v10  ;;  %v4487_v50 = vsel %vm4473_vm3, %v2693_v63, %v4404_v61  ;;  %v2698_v63 = vadd.f32 %v9441_v0, %v2378_v55  ;;  %v2380_v10 = vadd.f32 %v9443_v40, %v2060_v25  ;;  %v9444_v61 = vld [vmem:[#allocation152_spill] sm:$0xff]  ;;  %v9464_v18 = vld [vmem:[#allocation123_spill] sm:$0xff]  ;;  %v9465_v0 = vld [vmem:[#allocation54_spill] sm:$0xff] }
 0x95c   :  { %4518 = vst.msk [vmem:[%s8774_s7 + $0x60] sm:$0xff] %vm132_vm0, %v4486_v24  ;;  %4519 = vst.msk [vmem:[%s8774_s7 + $0x68] sm:$0xff] %vm132_vm0, %v4487_v50  ;;  %v2063_v2 = vadd.f32 %v9444_v61, %v1743_v45  ;;  %v2381_v16 = vadd.f32 %v9445_v23, %v2061_v8  ;;  %v1746_v55 = vmul.f32 %v9456_v42, %v9206_v38  ;;  %v9461_v8 = vld [vmem:[#allocation141_spill] sm:$0xff]  ;;  %v9470_v47 = vld [vmem:[#allocation107_spill] sm:$0xff] }
 0x95d   :  { %v2700_v17 = vadd.f32 %v9450_v56, %v2380_v10  ;;  %v1749_v25 = vmul.f32 %v9463_v34, %v9340_v33  ;;  %v1748_v30 = vmul.f32 %v9464_v18, %v9338_v51  ;;  %v9466_v33 = vld [vmem:[#allocation16_spill] sm:$0xff]  ;;  %v1751_v4 = vmul.f32 %v9470_v47, %v9348_v52  ;;  %v9474_v52 = vld [vmem:[#allocation63_spill] sm:$0xff]  ;;  %v9482_v42 = vld [vmem:[#allocation162_spill] sm:$0xff] }
 0x95e   :  { %v4406_v15 = vpop.permute.xlu1 %4405  ;;  %v4408_v36 = vpop.permute.xlu0 %4407  ;;  %v2383_v3 = vadd.f32 %v9451_v19, %v2063_v2  ;;  %v2701_v41 = vadd.f32 %v9452_v14, %v2381_v16  ;;  %v9468_v10 = vld [vmem:[#allocation156_spill] sm:$0xff]  ;;  %v9469_v2 = vld [vmem:[#allocation161_spill] sm:$0xff] }
 0x95f   :  { %v4488_v39 = vsel %vm4473_vm3, %v2694_v43, %v4406_v15  ;;  %v4489_v59 = vsel %vm4473_vm3, %v2695_v1, %v4408_v36  ;;  %v1744_v1 = vmul.f32 %v9448_v5, %v9275_v57  ;;  %v2065_v57 = vadd.f32 %v9453_v48, %v1745_v28  ;;  %v9473_v5 = vld [vmem:[#allocation57_spill] sm:$0xff]  ;;  %v9478_v48 = vld [vmem:[#allocation143_spill] sm:$0xff] }
 0x960   :  { %4520 = vst.msk [vmem:[%s8774_s7 + $0x70] sm:$0xff] %vm132_vm0, %v4488_v39  ;;  %4521 = vst.msk [vmem:[%s8774_s7 + $0x78] sm:$0xff] %vm132_vm0, %v4489_v59  ;;  %v9455_v39 = vld [vmem:[#allocation17_spill] sm:$0xff]  ;;  %v2703_v21 = vadd.f32 %v9458_v12, %v2383_v3  ;;  %v2069_v51 = vadd.f32 %v9469_v2, %v1749_v25  ;;  %v9477_v3 = vld [vmem:[#allocation55_spill] sm:$0xff] }
 0x961   :  { %v2064_v59 = vadd.f32 %v9455_v39, %v1744_v1  ;;  %v2385_v38 = vadd.f32 %v9461_v8, %v2065_v57  ;;  %v9480_v39 = vld [vmem:[#allocation151_spill] sm:$0xff] }
 0x962   :  { %v4410_v29 = vpop.permute.xlu1 %4409  ;;  %v4412_v35 = vpop.permute.xlu0 %4411 }
 0x963   :  { %v4490_v7 = vsel %vm4473_vm3, %v2696_v9, %v4410_v29  ;;  %v4491_v6 = vsel %vm4473_vm3, %v2697_v27, %v4412_v35  ;;  %v2702_v9 = vadd.f32 %v9457_v22, %v2382_v37  ;;  %v2384_v58 = vadd.f32 %v9459_v32, %v2064_v59  ;;  %v9460_v27 = vld [vmem:[#allocation58_spill] sm:$0xff]  ;;  %v9462_v29 = vld [vmem:[#allocation43_spill] sm:$0xff] }
 0x964   :  { %4522 = vst.msk [vmem:[%s8774_s7 + $0x80] sm:$0xff] %vm132_vm0, %v4490_v7  ;;  %4523 = vst.msk [vmem:[%s8774_s7 + $0x88] sm:$0xff] %vm132_vm0, %v4491_v6  ;;  %v2067_v54 = vadd.f32 %v9460_v27, %v1747_v60  ;;  %v2066_v35 = vadd.f32 %v9462_v29, %v1746_v55  ;;  %v2705_v61 = vadd.f32 %v9468_v10, %v2385_v38  ;;  %v9475_v37 = vld [vmem:[#allocation158_spill] sm:$0xff]  ;;  %v9484_v27 = vld [vmem:[#allocation160_spill] sm:$0xff] }
 0x965   :  { %v2704_v49 = vadd.f32 %v9466_v33, %v2384_v58  ;;  %v9483_v32 = vld [vmem:[#allocation146_spill] sm:$0xff] }
 0x966   :  { %v4414_v24 = vpop.permute.xlu1 %4413  ;;  %v4416_v50 = vpop.permute.xlu0 %4415 }
 0x967   :  { %v4492_v53 = vsel %vm4473_vm3, %v2698_v63, %v4414_v24  ;;  %v4493_v43 = vsel %vm4473_vm3, %v2699_v20, %v4416_v50  ;;  %v2386_v63 = vadd.f32 %v9465_v0, %v2066_v35  ;;  %v9467_v20 = vld [vmem:[#allocation60_spill] sm:$0xff] }
 0x968   :  { %4524 = vst.msk [vmem:[%s8774_s7 + $0x90] sm:$0xff] %vm132_vm0, %v4492_v53  ;;  %4525 = vst.msk [vmem:[%s8774_s7 + $0x98] sm:$0xff] %vm132_vm0, %v4493_v43  ;;  %v2387_v40 = vadd.f32 %v9467_v20, %v2067_v54  ;;  %v9471_v24 = vld [vmem:[#allocation148_spill] sm:$0xff]  ;;  %v9472_v53 = vld [vmem:[#allocation93_spill] sm:$0xff] }
 0x969   :  { %v2068_v50 = vadd.f32 %v9471_v24, %v1748_v30  ;;  %v1750_v43 = vmul.f32 %v9472_v53, %v9346_v11  ;;  %v2706_v1 = vadd.f32 %v9473_v5, %v2386_v63  ;;  %v2389_v11 = vadd.f32 %v9477_v3, %v2069_v51 }
 0x96a   :  { %v4418_v15 = vpop.permute.xlu1 %4417  ;;  %v4420_v36 = vpop.permute.xlu0 %4419  ;;  %v2707_v26 = vadd.f32 %v9474_v52, %v2387_v40 }
 0x96b   :  { %v4494_v31 = vsel %vm4473_vm3, %v2700_v17, %v4418_v15  ;;  %v4495_v13 = vsel %vm4473_vm3, %v2701_v41, %v4420_v36  ;;  %v2388_v56 = vadd.f32 %v9475_v37, %v2068_v50  ;;  %v9476_v17 = vld [vmem:[#allocation159_spill] sm:$0xff]  ;;  %v2070_v57 = vadd.f32 %v9478_v48, %v1750_v43 }
 0x96c   :  { %4526 = vst.msk [vmem:[%s8774_s7 + $0xa0] sm:$0xff] %vm132_vm0, %v4494_v31  ;;  %4527 = vst.msk [vmem:[%s8774_s7 + $0xa8] sm:$0xff] %vm132_vm0, %v4495_v13  ;;  %v2071_v19 = vadd.f32 %v9476_v17, %v1751_v4  ;;  %v9481_v31 = vld [vmem:[#allocation153_spill] sm:$0xff]  ;;  %v2709_v55 = vadd.f32 %v9482_v42, %v2389_v11 }
 0x96d   :  { %v2390_v60 = vadd.f32 %v9479_v62, %v2070_v57  ;;  %v2708_v59 = vadd.f32 %v9480_v39, %v2388_v56 }
 0x96e   :  { %v4422_v46 = vpop.permute.xlu1 %4421  ;;  %v4424_v45 = vpop.permute.xlu0 %4423  ;;  %v2391_v13 = vadd.f32 %v9481_v31, %v2071_v19 }
 0x96f   :  { %v4496_v7 = vsel %vm4473_vm3, %v2702_v9, %v4422_v46  ;;  %v4497_v6 = vsel %vm4473_vm3, %v2703_v21, %v4424_v45  ;;  %v2710_v58 = vadd.f32 %v9483_v32, %v2390_v60 }
 0x970   :  { %4528 = vst.msk [vmem:[%s8774_s7 + $0xb0] sm:$0xff] %vm132_vm0, %v4496_v7  ;;  %4529 = vst.msk [vmem:[%s8774_s7 + $0xb8] sm:$0xff] %vm132_vm0, %v4497_v6  ;;  %v2711_v54 = vadd.f32 %v9484_v27, %v2391_v13 }
 0x972   :  { %v4426_v23 = vpop.permute.xlu1 %4425  ;;  %v4428_v16 = vpop.permute.xlu0 %4427 }
 0x973   :  { %v4498_v44 = vsel %vm4473_vm3, %v2704_v49, %v4426_v23  ;;  %v4499_v28 = vsel %vm4473_vm3, %v2705_v61, %v4428_v16 }
 0x974   :  { %4530 = vst.msk [vmem:[%s8774_s7 + $0xc0] sm:$0xff] %vm132_vm0, %v4498_v44  ;;  %4531 = vst.msk [vmem:[%s8774_s7 + $0xc8] sm:$0xff] %vm132_vm0, %v4499_v28 }
 0x976   :  { %v4430_v14 = vpop.permute.xlu1 %4429  ;;  %v4432_v41 = vpop.permute.xlu0 %4431 }
 0x977   :  { %v4500_v15 = vsel %vm4473_vm3, %v2706_v1, %v4430_v14  ;;  %v4501_v36 = vsel %vm4473_vm3, %v2707_v26, %v4432_v41 }
 0x978   :  { %4532 = vst.msk [vmem:[%s8774_s7 + $0xd0] sm:$0xff] %vm132_vm0, %v4500_v15  ;;  %4533 = vst.msk [vmem:[%s8774_s7 + $0xd8] sm:$0xff] %vm132_vm0, %v4501_v36 }
 0x97a   :  { %v4434_v22 = vpop.permute.xlu1 %4433  ;;  %v4436_v9 = vpop.permute.xlu0 %4435 }
 0x97b   :  { %v4502_v12 = vsel %vm4473_vm3, %v2708_v59, %v4434_v22  ;;  %v4503_v21 = vsel %vm4473_vm3, %v2709_v55, %v4436_v9 }
 0x97c   :  { %4534 = vst.msk [vmem:[%s8774_s7 + $0xe0] sm:$0xff] %vm132_vm0, %v4502_v12  ;;  %4535 = vst.msk [vmem:[%s8774_s7 + $0xe8] sm:$0xff] %vm132_vm0, %v4503_v21 }
 0x97e   :  { %v4438_v8 = vpop.permute.xlu1 %4437  ;;  %v4440_v38 = vpop.permute.xlu0 %4439 }
 0x97f   :  { %v4504_v29 = vsel %vm4473_vm3, %v2710_v58, %v4438_v8  ;;  %v4505_v35 = vsel %vm4473_vm3, %v2711_v54, %v4440_v38 }
 0x980   :  { %4536 = vst.msk [vmem:[%s8774_s7 + $0xf0] sm:$0xff] %vm132_vm0, %v4504_v29  ;;  %4537 = vst.msk [vmem:[%s8774_s7 + $0xf8] sm:$0xff] %vm132_vm0, %v4505_v35 }

</bundles_post_ra>
